<compile_context>
chip_gen: v7x
topology: tpu7x:2x2x1
jax: 0.10.0
libtpu: 0.0.40
codegen_flags: <defaults>
</compile_context>

<pallas_src>
import jax
import jax.numpy as jnp
import numpy as np
from jax.experimental import pallas as pl
from jax.experimental.pallas import tpu as pltpu


# ----------------------------------------------------------------------------
# Fused FrontLSTM kernel
# ----------------------------------------------------------------------------
def make_front_lstm_kernel(num_layers, hidden, B, T):
    L, H = num_layers, hidden

    def kernel(x_s_ref, x2d_ref, w_hc_ref, b_hc_ref, *rest):
        # rest = [wihT_0, whhT_0, b_0, ..., wihT_{L-1}, whhT_{L-1}, b_{L-1},
        #         fc_wT, fc_b, out_ref, gx_scr, seq_scr]
        lstm_refs = rest[: 3 * L]
        fc_w_ref = rest[3 * L]
        fc_b_ref = rest[3 * L + 1]
        o_ref = rest[3 * L + 2]
        gx_scr = rest[3 * L + 3]      # (B, T, 4H)  precomputed input projection
        seq_scr = rest[3 * L + 4]     # (B, T, H)   hidden sequence -> next layer

        # ---- fused fc_h & fc_c + ReLU: one matmul, h0/c0 never leave VMEM ---
        hc = jnp.dot(x_s_ref[...], w_hc_ref[...],
                     preferred_element_type=jnp.float32)
        hc = jnp.maximum(hc + b_hc_ref[...], 0.0)          # (B, 2*L*H)

        h = None
        for l in range(L):
            wihT = lstm_refs[3 * l][...]                    # (Din_l, 4H)
            whhT = lstm_refs[3 * l + 1][...]                # (H, 4H)
            b = lstm_refs[3 * l + 2][...]                   # (1, 4H) = b_ih+b_hh

            # Initial state for this layer (matches PyTorch reshape/transpose):
            h = hc[:, l * H:(l + 1) * H]                    # (B, H)
            c = hc[:, (L + l) * H:(L + l + 1) * H]          # (B, H)

            # Input projection for ALL timesteps in one big matmul
            # (rows are batch-major: row = b*T + t), bias folded in.
            if l == 0:
                x_in = x2d_ref[...]                         # (B*T, Ddyn)
            else:
                x_in = seq_scr[...].reshape(B * T, H)       # (B*T, H)
            gx = jnp.dot(x_in, wihT,
                         preferred_element_type=jnp.float32) + b
            gx_scr[...] = gx.reshape(B, T, 4 * H)

            # Serial recurrence: per step only  h @ W_hh^T + gx[:, t, :].
            # T is small & static -> fully unrolled, no grid overhead.
            for t in range(T):
                gates = gx_scr[:, t, :] + jnp.dot(
                    h, whhT, preferred_element_type=jnp.float32)   # (B, 4H)
                sg = jax.nn.sigmoid(gates)                  # full-vreg EUP op
                tg = jnp.tanh(gates)                        # full-vreg EUP op
                i_g = sg[:, 0 * H:1 * H]
                f_g = sg[:, 1 * H:2 * H]
                g_g = tg[:, 2 * H:3 * H]
                o_g = sg[:, 3 * H:4 * H]
                c = f_g * c + i_g * g_g
                h = o_g * jnp.tanh(c)
                if l < L - 1:
                    # inter-layer dropout is identity in eval mode
                    seq_scr[:, t, :] = h

        # ---- final fc + ReLU on last-timestep, top-layer hidden state -------
        out = jnp.dot(h, fc_w_ref[...], preferred_element_type=jnp.float32)
        o_ref[...] = jnp.maximum(out + fc_b_ref[...], 0.0)

    return kernel


# ----------------------------------------------------------------------------
# One-time parameter repack (transposes / concats happen ONCE, not per call)
# ----------------------------------------------------------------------------
def pack_params(params, num_layers, hidden):
    L, H = num_layers, hidden
    w_hc_T = jnp.concatenate([params["fc_h_w"], params["fc_c_w"]], axis=0).T
    b_hc = jnp.concatenate([params["fc_h_b"], params["fc_c_b"]]).reshape(1, 2 * L * H)
    lstm_flat = []
    for l in range(L):
        w_ih, w_hh, b_ih, b_hh = params["lstm"][l]
        lstm_flat += [
            w_ih.T,                                   # (Din_l, 4H)
            w_hh.T,                                   # (H, 4H)
            (b_ih + b_hh).reshape(1, 4 * H),          # (1, 4H)
        ]
    return {
        "w_hc_T": w_hc_T,                             # (Dsta, 2*L*H)
        "b_hc": b_hc,                                 # (1, 2*L*H)
        "lstm_flat": lstm_flat,
        "fc_w_T": params["fc_w"].T,                   # (H, Dout)
        "fc_b": params["fc_b"].reshape(1, -1),        # (1, Dout)
    }


# ----------------------------------------------------------------------------
# Wrapper
# ----------------------------------------------------------------------------
def front_lstm_forward(packed, x_s, x_d, num_layers, hidden):
    B, T, Ddyn = x_d.shape
    L, H = num_layers, hidden
    Dout = packed["fc_w_T"].shape[1]

    # Free row-major reshape (no HBM transpose pass).
    x2d = x_d.reshape(B * T, Ddyn)

    n_inputs = 4 + 3 * L + 2
    vmem_spec = pl.BlockSpec(memory_space=pltpu.MemorySpace.VMEM)
    kernel = make_front_lstm_kernel(L, H, B, T)

    return pl.pallas_call(
        kernel,
        out_shape=jax.ShapeDtypeStruct((B, Dout), jnp.float32),
        in_specs=[vmem_spec] * n_inputs,
        out_specs=vmem_spec,
        scratch_shapes=[
            pltpu.VMEM((B, T, 4 * H), jnp.float32),   # per-layer input projection
            pltpu.VMEM((B, T, H), jnp.float32),       # hidden sequence feed-forward
        ],
        compiler_params=pltpu.CompilerParams(vmem_limit_bytes=32 * 1024 * 1024),
    )(x_s, x2d, packed["w_hc_T"], packed["b_hc"],
      *packed["lstm_flat"], packed["fc_w_T"], packed["fc_b"])


# ----------------------------------------------------------------------------
# Pure-JAX reference (PyTorch semantics, eval mode)
# ----------------------------------------------------------------------------
def ref_forward(params, x_s, x_d, num_layers, hidden):
    B, T, _ = x_d.shape
    relu = lambda v: jnp.maximum(v, 0.0)
    h0 = relu(x_s @ params["fc_h_w"].T + params["fc_h_b"])
    c0 = relu(x_s @ params["fc_c_w"].T + params["fc_c_b"])
    h0 = jnp.transpose(h0.reshape(B, num_layers, hidden), (1, 0, 2))
    c0 = jnp.transpose(c0.reshape(B, num_layers, hidden), (1, 0, 2))

    h = [h0[l] for l in range(num_layers)]
    c = [c0[l] for l in range(num_layers)]
    for t in range(T):
        x_in = x_d[:, t, :]
        for l in range(num_layers):
            w_ih, w_hh, b_ih, b_hh = params["lstm"][l]
            g = x_in @ w_ih.T + b_ih + h[l] @ w_hh.T + b_hh
            i_g = jax.nn.sigmoid(g[:, 0 * hidden:1 * hidden])
            f_g = jax.nn.sigmoid(g[:, 1 * hidden:2 * hidden])
            g_g = jnp.tanh(g[:, 2 * hidden:3 * hidden])
            o_g = jax.nn.sigmoid(g[:, 3 * hidden:4 * hidden])
            c[l] = f_g * c[l] + i_g * g_g
            h[l] = o_g * jnp.tanh(c[l])
            x_in = h[l]
    return relu(h[-1] @ params["fc_w"].T + params["fc_b"])


# ----------------------------------------------------------------------------
def init_params(key, input_size_sta, input_size_dyn, hidden, output, num_layers):
    keys = jax.random.split(key, 8 + 4 * num_layers)
    k = iter(keys)

    def unif(kk, shape, fan_in):
        s = 1.0 / np.sqrt(fan_in)
        return jax.random.uniform(kk, shape, jnp.float32, -s, s)

    params = {
        "fc_h_w": unif(next(k), (num_layers * hidden, input_size_sta), input_size_sta),
        "fc_h_b": unif(next(k), (num_layers * hidden,), input_size_sta),
        "fc_c_w": unif(next(k), (num_layers * hidden, input_size_sta), input_size_sta),
        "fc_c_b": unif(next(k), (num_layers * hidden,), input_size_sta),
        "fc_w": unif(next(k), (output, hidden), hidden),
        "fc_b": unif(next(k), (output,), hidden),
        "lstm": [],
    }
    for l in range(num_layers):
        din = input_size_dyn if l == 0 else hidden
        params["lstm"].append((
            unif(next(k), (4 * hidden, din), hidden),     # w_ih
            unif(next(k), (4 * hidden, hidden), hidden),  # w_hh
            unif(next(k), (4 * hidden,), hidden),         # b_ih
            unif(next(k), (4 * hidden,), hidden),         # b_hh
        ))
    return params


if __name__ == "__main__":
    # Small shapes consistent with the module's forward signature.
    B, T = 8, 8
    input_size_sta, input_size_dyn = 6, 5
    hidden, output, num_layers = 32, 4, 2

    key = jax.random.PRNGKey(0)
    kp, ks, kd = jax.random.split(key, 3)

    params = init_params(kp, input_size_sta, input_size_dyn, hidden, output, num_layers)
    packed = pack_params(params, num_layers, hidden)

    x_s = jax.random.normal(ks, (B, input_size_sta), jnp.float32)
    x_d = jax.random.normal(kd, (B, T, input_size_dyn), jnp.float32)

    out = front_lstm_forward(packed, x_s, x_d, num_layers, hidden)
    out = jax.block_until_ready(out)

    ref = ref_forward(params, x_s, x_d, num_layers, hidden)
    np.testing.assert_allclose(np.asarray(out), np.asarray(ref), rtol=2e-4, atol=2e-4)

    print("KERNEL_OK")
</pallas_src>

<mosaic_0001>
module attributes {stable_mosaic.version = 11 : i64} {
  func.func @kernel(%arg0: memref<8x6xf32, #tpu.memory_space<vmem>>, %arg1: memref<64x5xf32, #tpu.memory_space<vmem>>, %arg2: memref<6x128xf32, #tpu.memory_space<vmem>>, %arg3: memref<1x128xf32, #tpu.memory_space<vmem>>, %arg4: memref<5x128xf32, #tpu.memory_space<vmem>>, %arg5: memref<32x128xf32, #tpu.memory_space<vmem>>, %arg6: memref<1x128xf32, #tpu.memory_space<vmem>>, %arg7: memref<32x128xf32, #tpu.memory_space<vmem>>, %arg8: memref<32x128xf32, #tpu.memory_space<vmem>>, %arg9: memref<1x128xf32, #tpu.memory_space<vmem>>, %arg10: memref<32x4xf32, #tpu.memory_space<vmem>>, %arg11: memref<1x4xf32, #tpu.memory_space<vmem>>, %arg12: memref<8x4xf32, #tpu.memory_space<vmem>>, %arg13: memref<8x8x128xf32, #tpu.memory_space<vmem>>, %arg14: memref<8x8x32xf32, #tpu.memory_space<vmem>>) attributes {dimension_semantics = [], scalar_prefetch = 0 : i64, scratch_operands = 2 : i64, tpu.core_type = #tpu.core_type<tc>} {
    %c0 = arith.constant 0 : index
    %c0_0 = arith.constant 0 : index
    %0 = vector.load %arg0[%c0, %c0_0] : memref<8x6xf32, #tpu.memory_space<vmem>>, vector<8x6xf32>
    %c0_1 = arith.constant 0 : index
    %c0_2 = arith.constant 0 : index
    %1 = vector.load %arg2[%c0_1, %c0_2] : memref<6x128xf32, #tpu.memory_space<vmem>>, vector<6x128xf32>
    %cst = arith.constant dense<0.000000e+00> : vector<8x128xf32>
    %2 = tpu.matmul %0, %1, %cst {dimension_numbers = #tpu.dot_dimension_numbers<[1], [0], [0], [1], [0, 0, 1, 1], [], []>} : vector<8x6xf32>, vector<6x128xf32>, vector<8x128xf32> -> vector<8x128xf32>
    %c0_3 = arith.constant 0 : index
    %c0_4 = arith.constant 0 : index
    %3 = vector.load %arg3[%c0_3, %c0_4] : memref<1x128xf32, #tpu.memory_space<vmem>>, vector<1x128xf32>
    %4 = vector.broadcast %3 : vector<1x128xf32> to vector<8x128xf32>
    %5 = arith.addf %2, %4 : vector<8x128xf32>
    %cst_5 = arith.constant 0.000000e+00 : f32
    %6 = vector.broadcast %cst_5 : f32 to vector<8x128xf32>
    %7 = arith.maximumf %5, %6 : vector<8x128xf32>
    %c0_6 = arith.constant 0 : index
    %c0_7 = arith.constant 0 : index
    %8 = vector.load %arg4[%c0_6, %c0_7] : memref<5x128xf32, #tpu.memory_space<vmem>>, vector<5x128xf32>
    %c0_8 = arith.constant 0 : index
    %c0_9 = arith.constant 0 : index
    %9 = vector.load %arg5[%c0_8, %c0_9] : memref<32x128xf32, #tpu.memory_space<vmem>>, vector<32x128xf32>
    %c0_10 = arith.constant 0 : index
    %c0_11 = arith.constant 0 : index
    %10 = vector.load %arg6[%c0_10, %c0_11] : memref<1x128xf32, #tpu.memory_space<vmem>>, vector<1x128xf32>
    %11 = vector.extract_strided_slice %7 {offsets = [0, 0], sizes = [8, 32], strides = [1, 1]} : vector<8x128xf32> to vector<8x32xf32>
    %12 = vector.extract_strided_slice %7 {offsets = [0, 64], sizes = [8, 32], strides = [1, 1]} : vector<8x128xf32> to vector<8x32xf32>
    %c0_12 = arith.constant 0 : index
    %c0_13 = arith.constant 0 : index
    %13 = vector.load %arg1[%c0_12, %c0_13] : memref<64x5xf32, #tpu.memory_space<vmem>>, vector<64x5xf32>
    %cst_14 = arith.constant dense<0.000000e+00> : vector<64x128xf32>
    %14 = tpu.matmul %13, %8, %cst_14 {dimension_numbers = #tpu.dot_dimension_numbers<[1], [0], [0], [1], [0, 0, 1, 1], [], []>} : vector<64x5xf32>, vector<5x128xf32>, vector<64x128xf32> -> vector<64x128xf32>
    %15 = vector.broadcast %10 : vector<1x128xf32> to vector<64x128xf32>
    %16 = arith.addf %14, %15 : vector<64x128xf32>
    %17 = vector.shape_cast %16 : vector<64x128xf32> to vector<8x8x128xf32>
    %c0_15 = arith.constant 0 : index
    %c0_16 = arith.constant 0 : index
    %c0_17 = arith.constant 0 : index
    %18 = vector.load %arg13[%c0_15, %c0_16, %c0_17] : memref<8x8x128xf32, #tpu.memory_space<vmem>>, vector<8x8x128xf32>
    tpu.vector_store %arg13[%c0_15, %c0_16, %c0_17], %17 {strides = array<i32>} : memref<8x8x128xf32, #tpu.memory_space<vmem>>, vector<8x8x128xf32>,
    %c0_18 = arith.constant 0 : index
    %c0_19 = arith.constant 0 : index
    %c0_20 = arith.constant 0 : index
    %19 = vector.load %arg13[%c0_18, %c0_19, %c0_20] : memref<8x8x128xf32, #tpu.memory_space<vmem>>, vector<8x1x128xf32>
    %20 = vector.shape_cast %19 : vector<8x1x128xf32> to vector<8x128xf32>
    %cst_21 = arith.constant dense<0.000000e+00> : vector<8x128xf32>
    %21 = tpu.matmul %11, %9, %cst_21 {dimension_numbers = #tpu.dot_dimension_numbers<[1], [0], [0], [1], [0, 0, 1, 1], [], []>} : vector<8x32xf32>, vector<32x128xf32>, vector<8x128xf32> -> vector<8x128xf32>
    %22 = arith.addf %20, %21 : vector<8x128xf32>
    %23 = arith.negf %22 : vector<8x128xf32>
    %24 = math.exp %23 : vector<8x128xf32>
    %cst_22 = arith.constant 1.000000e+00 : f32
    %25 = vector.broadcast %cst_22 : f32 to vector<8x128xf32>
    %26 = arith.addf %25, %24 : vector<8x128xf32>
    %27 = arith.divf %25, %26 : vector<8x128xf32>
    %28 = math.tanh %22 : vector<8x128xf32>
    %29 = vector.extract_strided_slice %27 {offsets = [0, 0], sizes = [8, 32], strides = [1, 1]} : vector<8x128xf32> to vector<8x32xf32>
    %30 = vector.extract_strided_slice %27 {offsets = [0, 32], sizes = [8, 32], strides = [1, 1]} : vector<8x128xf32> to vector<8x32xf32>
    %31 = vector.extract_strided_slice %28 {offsets = [0, 64], sizes = [8, 32], strides = [1, 1]} : vector<8x128xf32> to vector<8x32xf32>
    %32 = vector.extract_strided_slice %27 {offsets = [0, 96], sizes = [8, 32], strides = [1, 1]} : vector<8x128xf32> to vector<8x32xf32>
    %33 = arith.mulf %30, %12 : vector<8x32xf32>
    %34 = arith.mulf %29, %31 : vector<8x32xf32>
    %35 = arith.addf %33, %34 : vector<8x32xf32>
    %36 = math.tanh %35 : vector<8x32xf32>
    %37 = arith.mulf %32, %36 : vector<8x32xf32>
    %c0_23 = arith.constant 0 : index
    %c0_24 = arith.constant 0 : index
    %c0_25 = arith.constant 0 : index
    %38 = vector.load %arg14[%c0_23, %c0_24, %c0_25] : memref<8x8x32xf32, #tpu.memory_space<vmem>>, vector<8x1x32xf32>
    %39 = vector.shape_cast %38 : vector<8x1x32xf32> to vector<8x32xf32>
    %40 = vector.shape_cast %37 : vector<8x32xf32> to vector<8x1x32xf32>
    tpu.vector_store %arg14[%c0_23, %c0_24, %c0_25], %40 {strides = array<i32>} : memref<8x8x32xf32, #tpu.memory_space<vmem>>, vector<8x1x32xf32>,
    %c0_26 = arith.constant 0 : index
    %c1 = arith.constant 1 : index
    %c0_27 = arith.constant 0 : index
    %41 = vector.load %arg13[%c0_26, %c1, %c0_27] : memref<8x8x128xf32, #tpu.memory_space<vmem>>, vector<8x1x128xf32>
    %42 = vector.shape_cast %41 : vector<8x1x128xf32> to vector<8x128xf32>
    %cst_28 = arith.constant dense<0.000000e+00> : vector<8x128xf32>
    %43 = tpu.matmul %37, %9, %cst_28 {dimension_numbers = #tpu.dot_dimension_numbers<[1], [0], [0], [1], [0, 0, 1, 1], [], []>} : vector<8x32xf32>, vector<32x128xf32>, vector<8x128xf32> -> vector<8x128xf32>
    %44 = arith.addf %42, %43 : vector<8x128xf32>
    %45 = arith.negf %44 : vector<8x128xf32>
    %46 = math.exp %45 : vector<8x128xf32>
    %cst_29 = arith.constant 1.000000e+00 : f32
    %47 = vector.broadcast %cst_29 : f32 to vector<8x128xf32>
    %48 = arith.addf %47, %46 : vector<8x128xf32>
    %49 = arith.divf %47, %48 : vector<8x128xf32>
    %50 = math.tanh %44 : vector<8x128xf32>
    %51 = vector.extract_strided_slice %49 {offsets = [0, 0], sizes = [8, 32], strides = [1, 1]} : vector<8x128xf32> to vector<8x32xf32>
    %52 = vector.extract_strided_slice %49 {offsets = [0, 32], sizes = [8, 32], strides = [1, 1]} : vector<8x128xf32> to vector<8x32xf32>
    %53 = vector.extract_strided_slice %50 {offsets = [0, 64], sizes = [8, 32], strides = [1, 1]} : vector<8x128xf32> to vector<8x32xf32>
    %54 = vector.extract_strided_slice %49 {offsets = [0, 96], sizes = [8, 32], strides = [1, 1]} : vector<8x128xf32> to vector<8x32xf32>
    %55 = arith.mulf %52, %35 : vector<8x32xf32>
    %56 = arith.mulf %51, %53 : vector<8x32xf32>
    %57 = arith.addf %55, %56 : vector<8x32xf32>
    %58 = math.tanh %57 : vector<8x32xf32>
    %59 = arith.mulf %54, %58 : vector<8x32xf32>
    %c0_30 = arith.constant 0 : index
    %c1_31 = arith.constant 1 : index
    %c0_32 = arith.constant 0 : index
    %60 = vector.load %arg14[%c0_30, %c1_31, %c0_32] : memref<8x8x32xf32, #tpu.memory_space<vmem>>, vector<8x1x32xf32>
    %61 = vector.shape_cast %60 : vector<8x1x32xf32> to vector<8x32xf32>
    %62 = vector.shape_cast %59 : vector<8x32xf32> to vector<8x1x32xf32>
    tpu.vector_store %arg14[%c0_30, %c1_31, %c0_32], %62 {strides = array<i32>} : memref<8x8x32xf32, #tpu.memory_space<vmem>>, vector<8x1x32xf32>,
    %c0_33 = arith.constant 0 : index
    %c2 = arith.constant 2 : index
    %c0_34 = arith.constant 0 : index
    %63 = vector.load %arg13[%c0_33, %c2, %c0_34] : memref<8x8x128xf32, #tpu.memory_space<vmem>>, vector<8x1x128xf32>
    %64 = vector.shape_cast %63 : vector<8x1x128xf32> to vector<8x128xf32>
    %cst_35 = arith.constant dense<0.000000e+00> : vector<8x128xf32>
    %65 = tpu.matmul %59, %9, %cst_35 {dimension_numbers = #tpu.dot_dimension_numbers<[1], [0], [0], [1], [0, 0, 1, 1], [], []>} : vector<8x32xf32>, vector<32x128xf32>, vector<8x128xf32> -> vector<8x128xf32>
    %66 = arith.addf %64, %65 : vector<8x128xf32>
    %67 = arith.negf %66 : vector<8x128xf32>
    %68 = math.exp %67 : vector<8x128xf32>
    %cst_36 = arith.constant 1.000000e+00 : f32
    %69 = vector.broadcast %cst_36 : f32 to vector<8x128xf32>
    %70 = arith.addf %69, %68 : vector<8x128xf32>
    %71 = arith.divf %69, %70 : vector<8x128xf32>
    %72 = math.tanh %66 : vector<8x128xf32>
    %73 = vector.extract_strided_slice %71 {offsets = [0, 0], sizes = [8, 32], strides = [1, 1]} : vector<8x128xf32> to vector<8x32xf32>
    %74 = vector.extract_strided_slice %71 {offsets = [0, 32], sizes = [8, 32], strides = [1, 1]} : vector<8x128xf32> to vector<8x32xf32>
    %75 = vector.extract_strided_slice %72 {offsets = [0, 64], sizes = [8, 32], strides = [1, 1]} : vector<8x128xf32> to vector<8x32xf32>
    %76 = vector.extract_strided_slice %71 {offsets = [0, 96], sizes = [8, 32], strides = [1, 1]} : vector<8x128xf32> to vector<8x32xf32>
    %77 = arith.mulf %74, %57 : vector<8x32xf32>
    %78 = arith.mulf %73, %75 : vector<8x32xf32>
    %79 = arith.addf %77, %78 : vector<8x32xf32>
    %80 = math.tanh %79 : vector<8x32xf32>
    %81 = arith.mulf %76, %80 : vector<8x32xf32>
    %c0_37 = arith.constant 0 : index
    %c2_38 = arith.constant 2 : index
    %c0_39 = arith.constant 0 : index
    %82 = vector.load %arg14[%c0_37, %c2_38, %c0_39] : memref<8x8x32xf32, #tpu.memory_space<vmem>>, vector<8x1x32xf32>
    %83 = vector.shape_cast %82 : vector<8x1x32xf32> to vector<8x32xf32>
    %84 = vector.shape_cast %81 : vector<8x32xf32> to vector<8x1x32xf32>
    tpu.vector_store %arg14[%c0_37, %c2_38, %c0_39], %84 {strides = array<i32>} : memref<8x8x32xf32, #tpu.memory_space<vmem>>, vector<8x1x32xf32>,
    %c0_40 = arith.constant 0 : index
    %c3 = arith.constant 3 : index
    %c0_41 = arith.constant 0 : index
    %85 = vector.load %arg13[%c0_40, %c3, %c0_41] : memref<8x8x128xf32, #tpu.memory_space<vmem>>, vector<8x1x128xf32>
    %86 = vector.shape_cast %85 : vector<8x1x128xf32> to vector<8x128xf32>
    %cst_42 = arith.constant dense<0.000000e+00> : vector<8x128xf32>
    %87 = tpu.matmul %81, %9, %cst_42 {dimension_numbers = #tpu.dot_dimension_numbers<[1], [0], [0], [1], [0, 0, 1, 1], [], []>} : vector<8x32xf32>, vector<32x128xf32>, vector<8x128xf32> -> vector<8x128xf32>
    %88 = arith.addf %86, %87 : vector<8x128xf32>
    %89 = arith.negf %88 : vector<8x128xf32>
    %90 = math.exp %89 : vector<8x128xf32>
    %cst_43 = arith.constant 1.000000e+00 : f32
    %91 = vector.broadcast %cst_43 : f32 to vector<8x128xf32>
    %92 = arith.addf %91, %90 : vector<8x128xf32>
    %93 = arith.divf %91, %92 : vector<8x128xf32>
    %94 = math.tanh %88 : vector<8x128xf32>
    %95 = vector.extract_strided_slice %93 {offsets = [0, 0], sizes = [8, 32], strides = [1, 1]} : vector<8x128xf32> to vector<8x32xf32>
    %96 = vector.extract_strided_slice %93 {offsets = [0, 32], sizes = [8, 32], strides = [1, 1]} : vector<8x128xf32> to vector<8x32xf32>
    %97 = vector.extract_strided_slice %94 {offsets = [0, 64], sizes = [8, 32], strides = [1, 1]} : vector<8x128xf32> to vector<8x32xf32>
    %98 = vector.extract_strided_slice %93 {offsets = [0, 96], sizes = [8, 32], strides = [1, 1]} : vector<8x128xf32> to vector<8x32xf32>
    %99 = arith.mulf %96, %79 : vector<8x32xf32>
    %100 = arith.mulf %95, %97 : vector<8x32xf32>
    %101 = arith.addf %99, %100 : vector<8x32xf32>
    %102 = math.tanh %101 : vector<8x32xf32>
    %103 = arith.mulf %98, %102 : vector<8x32xf32>
    %c0_44 = arith.constant 0 : index
    %c3_45 = arith.constant 3 : index
    %c0_46 = arith.constant 0 : index
    %104 = vector.load %arg14[%c0_44, %c3_45, %c0_46] : memref<8x8x32xf32, #tpu.memory_space<vmem>>, vector<8x1x32xf32>
    %105 = vector.shape_cast %104 : vector<8x1x32xf32> to vector<8x32xf32>
    %106 = vector.shape_cast %103 : vector<8x32xf32> to vector<8x1x32xf32>
    tpu.vector_store %arg14[%c0_44, %c3_45, %c0_46], %106 {strides = array<i32>} : memref<8x8x32xf32, #tpu.memory_space<vmem>>, vector<8x1x32xf32>,
    %c0_47 = arith.constant 0 : index
    %c4 = arith.constant 4 : index
    %c0_48 = arith.constant 0 : index
    %107 = vector.load %arg13[%c0_47, %c4, %c0_48] : memref<8x8x128xf32, #tpu.memory_space<vmem>>, vector<8x1x128xf32>
    %108 = vector.shape_cast %107 : vector<8x1x128xf32> to vector<8x128xf32>
    %cst_49 = arith.constant dense<0.000000e+00> : vector<8x128xf32>
    %109 = tpu.matmul %103, %9, %cst_49 {dimension_numbers = #tpu.dot_dimension_numbers<[1], [0], [0], [1], [0, 0, 1, 1], [], []>} : vector<8x32xf32>, vector<32x128xf32>, vector<8x128xf32> -> vector<8x128xf32>
    %110 = arith.addf %108, %109 : vector<8x128xf32>
    %111 = arith.negf %110 : vector<8x128xf32>
    %112 = math.exp %111 : vector<8x128xf32>
    %cst_50 = arith.constant 1.000000e+00 : f32
    %113 = vector.broadcast %cst_50 : f32 to vector<8x128xf32>
    %114 = arith.addf %113, %112 : vector<8x128xf32>
    %115 = arith.divf %113, %114 : vector<8x128xf32>
    %116 = math.tanh %110 : vector<8x128xf32>
    %117 = vector.extract_strided_slice %115 {offsets = [0, 0], sizes = [8, 32], strides = [1, 1]} : vector<8x128xf32> to vector<8x32xf32>
    %118 = vector.extract_strided_slice %115 {offsets = [0, 32], sizes = [8, 32], strides = [1, 1]} : vector<8x128xf32> to vector<8x32xf32>
    %119 = vector.extract_strided_slice %116 {offsets = [0, 64], sizes = [8, 32], strides = [1, 1]} : vector<8x128xf32> to vector<8x32xf32>
    %120 = vector.extract_strided_slice %115 {offsets = [0, 96], sizes = [8, 32], strides = [1, 1]} : vector<8x128xf32> to vector<8x32xf32>
    %121 = arith.mulf %118, %101 : vector<8x32xf32>
    %122 = arith.mulf %117, %119 : vector<8x32xf32>
    %123 = arith.addf %121, %122 : vector<8x32xf32>
    %124 = math.tanh %123 : vector<8x32xf32>
    %125 = arith.mulf %120, %124 : vector<8x32xf32>
    %c0_51 = arith.constant 0 : index
    %c4_52 = arith.constant 4 : index
    %c0_53 = arith.constant 0 : index
    %126 = vector.load %arg14[%c0_51, %c4_52, %c0_53] : memref<8x8x32xf32, #tpu.memory_space<vmem>>, vector<8x1x32xf32>
    %127 = vector.shape_cast %126 : vector<8x1x32xf32> to vector<8x32xf32>
    %128 = vector.shape_cast %125 : vector<8x32xf32> to vector<8x1x32xf32>
    tpu.vector_store %arg14[%c0_51, %c4_52, %c0_53], %128 {strides = array<i32>} : memref<8x8x32xf32, #tpu.memory_space<vmem>>, vector<8x1x32xf32>,
    %c0_54 = arith.constant 0 : index
    %c5 = arith.constant 5 : index
    %c0_55 = arith.constant 0 : index
    %129 = vector.load %arg13[%c0_54, %c5, %c0_55] : memref<8x8x128xf32, #tpu.memory_space<vmem>>, vector<8x1x128xf32>
    %130 = vector.shape_cast %129 : vector<8x1x128xf32> to vector<8x128xf32>
    %cst_56 = arith.constant dense<0.000000e+00> : vector<8x128xf32>
    %131 = tpu.matmul %125, %9, %cst_56 {dimension_numbers = #tpu.dot_dimension_numbers<[1], [0], [0], [1], [0, 0, 1, 1], [], []>} : vector<8x32xf32>, vector<32x128xf32>, vector<8x128xf32> -> vector<8x128xf32>
    %132 = arith.addf %130, %131 : vector<8x128xf32>
    %133 = arith.negf %132 : vector<8x128xf32>
    %134 = math.exp %133 : vector<8x128xf32>
    %cst_57 = arith.constant 1.000000e+00 : f32
    %135 = vector.broadcast %cst_57 : f32 to vector<8x128xf32>
    %136 = arith.addf %135, %134 : vector<8x128xf32>
    %137 = arith.divf %135, %136 : vector<8x128xf32>
    %138 = math.tanh %132 : vector<8x128xf32>
    %139 = vector.extract_strided_slice %137 {offsets = [0, 0], sizes = [8, 32], strides = [1, 1]} : vector<8x128xf32> to vector<8x32xf32>
    %140 = vector.extract_strided_slice %137 {offsets = [0, 32], sizes = [8, 32], strides = [1, 1]} : vector<8x128xf32> to vector<8x32xf32>
    %141 = vector.extract_strided_slice %138 {offsets = [0, 64], sizes = [8, 32], strides = [1, 1]} : vector<8x128xf32> to vector<8x32xf32>
    %142 = vector.extract_strided_slice %137 {offsets = [0, 96], sizes = [8, 32], strides = [1, 1]} : vector<8x128xf32> to vector<8x32xf32>
    %143 = arith.mulf %140, %123 : vector<8x32xf32>
    %144 = arith.mulf %139, %141 : vector<8x32xf32>
    %145 = arith.addf %143, %144 : vector<8x32xf32>
    %146 = math.tanh %145 : vector<8x32xf32>
    %147 = arith.mulf %142, %146 : vector<8x32xf32>
    %c0_58 = arith.constant 0 : index
    %c5_59 = arith.constant 5 : index
    %c0_60 = arith.constant 0 : index
    %148 = vector.load %arg14[%c0_58, %c5_59, %c0_60] : memref<8x8x32xf32, #tpu.memory_space<vmem>>, vector<8x1x32xf32>
    %149 = vector.shape_cast %148 : vector<8x1x32xf32> to vector<8x32xf32>
    %150 = vector.shape_cast %147 : vector<8x32xf32> to vector<8x1x32xf32>
    tpu.vector_store %arg14[%c0_58, %c5_59, %c0_60], %150 {strides = array<i32>} : memref<8x8x32xf32, #tpu.memory_space<vmem>>, vector<8x1x32xf32>,
    %c0_61 = arith.constant 0 : index
    %c6 = arith.constant 6 : index
    %c0_62 = arith.constant 0 : index
    %151 = vector.load %arg13[%c0_61, %c6, %c0_62] : memref<8x8x128xf32, #tpu.memory_space<vmem>>, vector<8x1x128xf32>
    %152 = vector.shape_cast %151 : vector<8x1x128xf32> to vector<8x128xf32>
    %cst_63 = arith.constant dense<0.000000e+00> : vector<8x128xf32>
    %153 = tpu.matmul %147, %9, %cst_63 {dimension_numbers = #tpu.dot_dimension_numbers<[1], [0], [0], [1], [0, 0, 1, 1], [], []>} : vector<8x32xf32>, vector<32x128xf32>, vector<8x128xf32> -> vector<8x128xf32>
    %154 = arith.addf %152, %153 : vector<8x128xf32>
    %155 = arith.negf %154 : vector<8x128xf32>
    %156 = math.exp %155 : vector<8x128xf32>
    %cst_64 = arith.constant 1.000000e+00 : f32
    %157 = vector.broadcast %cst_64 : f32 to vector<8x128xf32>
    %158 = arith.addf %157, %156 : vector<8x128xf32>
    %159 = arith.divf %157, %158 : vector<8x128xf32>
    %160 = math.tanh %154 : vector<8x128xf32>
    %161 = vector.extract_strided_slice %159 {offsets = [0, 0], sizes = [8, 32], strides = [1, 1]} : vector<8x128xf32> to vector<8x32xf32>
    %162 = vector.extract_strided_slice %159 {offsets = [0, 32], sizes = [8, 32], strides = [1, 1]} : vector<8x128xf32> to vector<8x32xf32>
    %163 = vector.extract_strided_slice %160 {offsets = [0, 64], sizes = [8, 32], strides = [1, 1]} : vector<8x128xf32> to vector<8x32xf32>
    %164 = vector.extract_strided_slice %159 {offsets = [0, 96], sizes = [8, 32], strides = [1, 1]} : vector<8x128xf32> to vector<8x32xf32>
    %165 = arith.mulf %162, %145 : vector<8x32xf32>
    %166 = arith.mulf %161, %163 : vector<8x32xf32>
    %167 = arith.addf %165, %166 : vector<8x32xf32>
    %168 = math.tanh %167 : vector<8x32xf32>
    %169 = arith.mulf %164, %168 : vector<8x32xf32>
    %c0_65 = arith.constant 0 : index
    %c6_66 = arith.constant 6 : index
    %c0_67 = arith.constant 0 : index
    %170 = vector.load %arg14[%c0_65, %c6_66, %c0_67] : memref<8x8x32xf32, #tpu.memory_space<vmem>>, vector<8x1x32xf32>
    %171 = vector.shape_cast %170 : vector<8x1x32xf32> to vector<8x32xf32>
    %172 = vector.shape_cast %169 : vector<8x32xf32> to vector<8x1x32xf32>
    tpu.vector_store %arg14[%c0_65, %c6_66, %c0_67], %172 {strides = array<i32>} : memref<8x8x32xf32, #tpu.memory_space<vmem>>, vector<8x1x32xf32>,
    %c0_68 = arith.constant 0 : index
    %c7 = arith.constant 7 : index
    %c0_69 = arith.constant 0 : index
    %173 = vector.load %arg13[%c0_68, %c7, %c0_69] : memref<8x8x128xf32, #tpu.memory_space<vmem>>, vector<8x1x128xf32>
    %174 = vector.shape_cast %173 : vector<8x1x128xf32> to vector<8x128xf32>
    %cst_70 = arith.constant dense<0.000000e+00> : vector<8x128xf32>
    %175 = tpu.matmul %169, %9, %cst_70 {dimension_numbers = #tpu.dot_dimension_numbers<[1], [0], [0], [1], [0, 0, 1, 1], [], []>} : vector<8x32xf32>, vector<32x128xf32>, vector<8x128xf32> -> vector<8x128xf32>
    %176 = arith.addf %174, %175 : vector<8x128xf32>
    %177 = arith.negf %176 : vector<8x128xf32>
    %178 = math.exp %177 : vector<8x128xf32>
    %cst_71 = arith.constant 1.000000e+00 : f32
    %179 = vector.broadcast %cst_71 : f32 to vector<8x128xf32>
    %180 = arith.addf %179, %178 : vector<8x128xf32>
    %181 = arith.divf %179, %180 : vector<8x128xf32>
    %182 = math.tanh %176 : vector<8x128xf32>
    %183 = vector.extract_strided_slice %181 {offsets = [0, 0], sizes = [8, 32], strides = [1, 1]} : vector<8x128xf32> to vector<8x32xf32>
    %184 = vector.extract_strided_slice %181 {offsets = [0, 32], sizes = [8, 32], strides = [1, 1]} : vector<8x128xf32> to vector<8x32xf32>
    %185 = vector.extract_strided_slice %182 {offsets = [0, 64], sizes = [8, 32], strides = [1, 1]} : vector<8x128xf32> to vector<8x32xf32>
    %186 = vector.extract_strided_slice %181 {offsets = [0, 96], sizes = [8, 32], strides = [1, 1]} : vector<8x128xf32> to vector<8x32xf32>
    %187 = arith.mulf %184, %167 : vector<8x32xf32>
    %188 = arith.mulf %183, %185 : vector<8x32xf32>
    %189 = arith.addf %187, %188 : vector<8x32xf32>
    %190 = math.tanh %189 : vector<8x32xf32>
    %191 = arith.mulf %186, %190 : vector<8x32xf32>
    %c0_72 = arith.constant 0 : index
    %c7_73 = arith.constant 7 : index
    %c0_74 = arith.constant 0 : index
    %192 = vector.load %arg14[%c0_72, %c7_73, %c0_74] : memref<8x8x32xf32, #tpu.memory_space<vmem>>, vector<8x1x32xf32>
    %193 = vector.shape_cast %192 : vector<8x1x32xf32> to vector<8x32xf32>
    %194 = vector.shape_cast %191 : vector<8x32xf32> to vector<8x1x32xf32>
    tpu.vector_store %arg14[%c0_72, %c7_73, %c0_74], %194 {strides = array<i32>} : memref<8x8x32xf32, #tpu.memory_space<vmem>>, vector<8x1x32xf32>,
    %c0_75 = arith.constant 0 : index
    %c0_76 = arith.constant 0 : index
    %195 = vector.load %arg7[%c0_75, %c0_76] : memref<32x128xf32, #tpu.memory_space<vmem>>, vector<32x128xf32>
    %c0_77 = arith.constant 0 : index
    %c0_78 = arith.constant 0 : index
    %196 = vector.load %arg8[%c0_77, %c0_78] : memref<32x128xf32, #tpu.memory_space<vmem>>, vector<32x128xf32>
    %c0_79 = arith.constant 0 : index
    %c0_80 = arith.constant 0 : index
    %197 = vector.load %arg9[%c0_79, %c0_80] : memref<1x128xf32, #tpu.memory_space<vmem>>, vector<1x128xf32>
    %198 = vector.extract_strided_slice %7 {offsets = [0, 32], sizes = [8, 32], strides = [1, 1]} : vector<8x128xf32> to vector<8x32xf32>
    %199 = vector.extract_strided_slice %7 {offsets = [0, 96], sizes = [8, 32], strides = [1, 1]} : vector<8x128xf32> to vector<8x32xf32>
    %c0_81 = arith.constant 0 : index
    %c0_82 = arith.constant 0 : index
    %c0_83 = arith.constant 0 : index
    %200 = vector.load %arg14[%c0_81, %c0_82, %c0_83] : memref<8x8x32xf32, #tpu.memory_space<vmem>>, vector<8x8x32xf32>
    %201 = vector.shape_cast %200 : vector<8x8x32xf32> to vector<64x32xf32>
    %cst_84 = arith.constant dense<0.000000e+00> : vector<64x128xf32>
    %202 = tpu.matmul %201, %195, %cst_84 {dimension_numbers = #tpu.dot_dimension_numbers<[1], [0], [0], [1], [0, 0, 1, 1], [], []>} : vector<64x32xf32>, vector<32x128xf32>, vector<64x128xf32> -> vector<64x128xf32>
    %203 = vector.broadcast %197 : vector<1x128xf32> to vector<64x128xf32>
    %204 = arith.addf %202, %203 : vector<64x128xf32>
    %205 = vector.shape_cast %204 : vector<64x128xf32> to vector<8x8x128xf32>
    %c0_85 = arith.constant 0 : index
    %c0_86 = arith.constant 0 : index
    %c0_87 = arith.constant 0 : index
    %206 = vector.load %arg13[%c0_85, %c0_86, %c0_87] : memref<8x8x128xf32, #tpu.memory_space<vmem>>, vector<8x8x128xf32>
    tpu.vector_store %arg13[%c0_85, %c0_86, %c0_87], %205 {strides = array<i32>} : memref<8x8x128xf32, #tpu.memory_space<vmem>>, vector<8x8x128xf32>,
    %c0_88 = arith.constant 0 : index
    %c0_89 = arith.constant 0 : index
    %c0_90 = arith.constant 0 : index
    %207 = vector.load %arg13[%c0_88, %c0_89, %c0_90] : memref<8x8x128xf32, #tpu.memory_space<vmem>>, vector<8x1x128xf32>
    %208 = vector.shape_cast %207 : vector<8x1x128xf32> to vector<8x128xf32>
    %cst_91 = arith.constant dense<0.000000e+00> : vector<8x128xf32>
    %209 = tpu.matmul %198, %196, %cst_91 {dimension_numbers = #tpu.dot_dimension_numbers<[1], [0], [0], [1], [0, 0, 1, 1], [], []>} : vector<8x32xf32>, vector<32x128xf32>, vector<8x128xf32> -> vector<8x128xf32>
    %210 = arith.addf %208, %209 : vector<8x128xf32>
    %211 = arith.negf %210 : vector<8x128xf32>
    %212 = math.exp %211 : vector<8x128xf32>
    %cst_92 = arith.constant 1.000000e+00 : f32
    %213 = vector.broadcast %cst_92 : f32 to vector<8x128xf32>
    %214 = arith.addf %213, %212 : vector<8x128xf32>
    %215 = arith.divf %213, %214 : vector<8x128xf32>
    %216 = math.tanh %210 : vector<8x128xf32>
    %217 = vector.extract_strided_slice %215 {offsets = [0, 0], sizes = [8, 32], strides = [1, 1]} : vector<8x128xf32> to vector<8x32xf32>
    %218 = vector.extract_strided_slice %215 {offsets = [0, 32], sizes = [8, 32], strides = [1, 1]} : vector<8x128xf32> to vector<8x32xf32>
    %219 = vector.extract_strided_slice %216 {offsets = [0, 64], sizes = [8, 32], strides = [1, 1]} : vector<8x128xf32> to vector<8x32xf32>
    %220 = vector.extract_strided_slice %215 {offsets = [0, 96], sizes = [8, 32], strides = [1, 1]} : vector<8x128xf32> to vector<8x32xf32>
    %221 = arith.mulf %218, %199 : vector<8x32xf32>
    %222 = arith.mulf %217, %219 : vector<8x32xf32>
    %223 = arith.addf %221, %222 : vector<8x32xf32>
    %224 = math.tanh %223 : vector<8x32xf32>
    %225 = arith.mulf %220, %224 : vector<8x32xf32>
    %c0_93 = arith.constant 0 : index
    %c1_94 = arith.constant 1 : index
    %c0_95 = arith.constant 0 : index
    %226 = vector.load %arg13[%c0_93, %c1_94, %c0_95] : memref<8x8x128xf32, #tpu.memory_space<vmem>>, vector<8x1x128xf32>
    %227 = vector.shape_cast %226 : vector<8x1x128xf32> to vector<8x128xf32>
    %cst_96 = arith.constant dense<0.000000e+00> : vector<8x128xf32>
    %228 = tpu.matmul %225, %196, %cst_96 {dimension_numbers = #tpu.dot_dimension_numbers<[1], [0], [0], [1], [0, 0, 1, 1], [], []>} : vector<8x32xf32>, vector<32x128xf32>, vector<8x128xf32> -> vector<8x128xf32>
    %229 = arith.addf %227, %228 : vector<8x128xf32>
    %230 = arith.negf %229 : vector<8x128xf32>
    %231 = math.exp %230 : vector<8x128xf32>
    %cst_97 = arith.constant 1.000000e+00 : f32
    %232 = vector.broadcast %cst_97 : f32 to vector<8x128xf32>
    %233 = arith.addf %232, %231 : vector<8x128xf32>
    %234 = arith.divf %232, %233 : vector<8x128xf32>
    %235 = math.tanh %229 : vector<8x128xf32>
    %236 = vector.extract_strided_slice %234 {offsets = [0, 0], sizes = [8, 32], strides = [1, 1]} : vector<8x128xf32> to vector<8x32xf32>
    %237 = vector.extract_strided_slice %234 {offsets = [0, 32], sizes = [8, 32], strides = [1, 1]} : vector<8x128xf32> to vector<8x32xf32>
    %238 = vector.extract_strided_slice %235 {offsets = [0, 64], sizes = [8, 32], strides = [1, 1]} : vector<8x128xf32> to vector<8x32xf32>
    %239 = vector.extract_strided_slice %234 {offsets = [0, 96], sizes = [8, 32], strides = [1, 1]} : vector<8x128xf32> to vector<8x32xf32>
    %240 = arith.mulf %237, %223 : vector<8x32xf32>
    %241 = arith.mulf %236, %238 : vector<8x32xf32>
    %242 = arith.addf %240, %241 : vector<8x32xf32>
    %243 = math.tanh %242 : vector<8x32xf32>
    %244 = arith.mulf %239, %243 : vector<8x32xf32>
    %c0_98 = arith.constant 0 : index
    %c2_99 = arith.constant 2 : index
    %c0_100 = arith.constant 0 : index
    %245 = vector.load %arg13[%c0_98, %c2_99, %c0_100] : memref<8x8x128xf32, #tpu.memory_space<vmem>>, vector<8x1x128xf32>
    %246 = vector.shape_cast %245 : vector<8x1x128xf32> to vector<8x128xf32>
    %cst_101 = arith.constant dense<0.000000e+00> : vector<8x128xf32>
    %247 = tpu.matmul %244, %196, %cst_101 {dimension_numbers = #tpu.dot_dimension_numbers<[1], [0], [0], [1], [0, 0, 1, 1], [], []>} : vector<8x32xf32>, vector<32x128xf32>, vector<8x128xf32> -> vector<8x128xf32>
    %248 = arith.addf %246, %247 : vector<8x128xf32>
    %249 = arith.negf %248 : vector<8x128xf32>
    %250 = math.exp %249 : vector<8x128xf32>
    %cst_102 = arith.constant 1.000000e+00 : f32
    %251 = vector.broadcast %cst_102 : f32 to vector<8x128xf32>
    %252 = arith.addf %251, %250 : vector<8x128xf32>
    %253 = arith.divf %251, %252 : vector<8x128xf32>
    %254 = math.tanh %248 : vector<8x128xf32>
    %255 = vector.extract_strided_slice %253 {offsets = [0, 0], sizes = [8, 32], strides = [1, 1]} : vector<8x128xf32> to vector<8x32xf32>
    %256 = vector.extract_strided_slice %253 {offsets = [0, 32], sizes = [8, 32], strides = [1, 1]} : vector<8x128xf32> to vector<8x32xf32>
    %257 = vector.extract_strided_slice %254 {offsets = [0, 64], sizes = [8, 32], strides = [1, 1]} : vector<8x128xf32> to vector<8x32xf32>
    %258 = vector.extract_strided_slice %253 {offsets = [0, 96], sizes = [8, 32], strides = [1, 1]} : vector<8x128xf32> to vector<8x32xf32>
    %259 = arith.mulf %256, %242 : vector<8x32xf32>
    %260 = arith.mulf %255, %257 : vector<8x32xf32>
    %261 = arith.addf %259, %260 : vector<8x32xf32>
    %262 = math.tanh %261 : vector<8x32xf32>
    %263 = arith.mulf %258, %262 : vector<8x32xf32>
    %c0_103 = arith.constant 0 : index
    %c3_104 = arith.constant 3 : index
    %c0_105 = arith.constant 0 : index
    %264 = vector.load %arg13[%c0_103, %c3_104, %c0_105] : memref<8x8x128xf32, #tpu.memory_space<vmem>>, vector<8x1x128xf32>
    %265 = vector.shape_cast %264 : vector<8x1x128xf32> to vector<8x128xf32>
    %cst_106 = arith.constant dense<0.000000e+00> : vector<8x128xf32>
    %266 = tpu.matmul %263, %196, %cst_106 {dimension_numbers = #tpu.dot_dimension_numbers<[1], [0], [0], [1], [0, 0, 1, 1], [], []>} : vector<8x32xf32>, vector<32x128xf32>, vector<8x128xf32> -> vector<8x128xf32>
    %267 = arith.addf %265, %266 : vector<8x128xf32>
    %268 = arith.negf %267 : vector<8x128xf32>
    %269 = math.exp %268 : vector<8x128xf32>
    %cst_107 = arith.constant 1.000000e+00 : f32
    %270 = vector.broadcast %cst_107 : f32 to vector<8x128xf32>
    %271 = arith.addf %270, %269 : vector<8x128xf32>
    %272 = arith.divf %270, %271 : vector<8x128xf32>
    %273 = math.tanh %267 : vector<8x128xf32>
    %274 = vector.extract_strided_slice %272 {offsets = [0, 0], sizes = [8, 32], strides = [1, 1]} : vector<8x128xf32> to vector<8x32xf32>
    %275 = vector.extract_strided_slice %272 {offsets = [0, 32], sizes = [8, 32], strides = [1, 1]} : vector<8x128xf32> to vector<8x32xf32>
    %276 = vector.extract_strided_slice %273 {offsets = [0, 64], sizes = [8, 32], strides = [1, 1]} : vector<8x128xf32> to vector<8x32xf32>
    %277 = vector.extract_strided_slice %272 {offsets = [0, 96], sizes = [8, 32], strides = [1, 1]} : vector<8x128xf32> to vector<8x32xf32>
    %278 = arith.mulf %275, %261 : vector<8x32xf32>
    %279 = arith.mulf %274, %276 : vector<8x32xf32>
    %280 = arith.addf %278, %279 : vector<8x32xf32>
    %281 = math.tanh %280 : vector<8x32xf32>
    %282 = arith.mulf %277, %281 : vector<8x32xf32>
    %c0_108 = arith.constant 0 : index
    %c4_109 = arith.constant 4 : index
    %c0_110 = arith.constant 0 : index
    %283 = vector.load %arg13[%c0_108, %c4_109, %c0_110] : memref<8x8x128xf32, #tpu.memory_space<vmem>>, vector<8x1x128xf32>
    %284 = vector.shape_cast %283 : vector<8x1x128xf32> to vector<8x128xf32>
    %cst_111 = arith.constant dense<0.000000e+00> : vector<8x128xf32>
    %285 = tpu.matmul %282, %196, %cst_111 {dimension_numbers = #tpu.dot_dimension_numbers<[1], [0], [0], [1], [0, 0, 1, 1], [], []>} : vector<8x32xf32>, vector<32x128xf32>, vector<8x128xf32> -> vector<8x128xf32>
    %286 = arith.addf %284, %285 : vector<8x128xf32>
    %287 = arith.negf %286 : vector<8x128xf32>
    %288 = math.exp %287 : vector<8x128xf32>
    %cst_112 = arith.constant 1.000000e+00 : f32
    %289 = vector.broadcast %cst_112 : f32 to vector<8x128xf32>
    %290 = arith.addf %289, %288 : vector<8x128xf32>
    %291 = arith.divf %289, %290 : vector<8x128xf32>
    %292 = math.tanh %286 : vector<8x128xf32>
    %293 = vector.extract_strided_slice %291 {offsets = [0, 0], sizes = [8, 32], strides = [1, 1]} : vector<8x128xf32> to vector<8x32xf32>
    %294 = vector.extract_strided_slice %291 {offsets = [0, 32], sizes = [8, 32], strides = [1, 1]} : vector<8x128xf32> to vector<8x32xf32>
    %295 = vector.extract_strided_slice %292 {offsets = [0, 64], sizes = [8, 32], strides = [1, 1]} : vector<8x128xf32> to vector<8x32xf32>
    %296 = vector.extract_strided_slice %291 {offsets = [0, 96], sizes = [8, 32], strides = [1, 1]} : vector<8x128xf32> to vector<8x32xf32>
    %297 = arith.mulf %294, %280 : vector<8x32xf32>
    %298 = arith.mulf %293, %295 : vector<8x32xf32>
    %299 = arith.addf %297, %298 : vector<8x32xf32>
    %300 = math.tanh %299 : vector<8x32xf32>
    %301 = arith.mulf %296, %300 : vector<8x32xf32>
    %c0_113 = arith.constant 0 : index
    %c5_114 = arith.constant 5 : index
    %c0_115 = arith.constant 0 : index
    %302 = vector.load %arg13[%c0_113, %c5_114, %c0_115] : memref<8x8x128xf32, #tpu.memory_space<vmem>>, vector<8x1x128xf32>
    %303 = vector.shape_cast %302 : vector<8x1x128xf32> to vector<8x128xf32>
    %cst_116 = arith.constant dense<0.000000e+00> : vector<8x128xf32>
    %304 = tpu.matmul %301, %196, %cst_116 {dimension_numbers = #tpu.dot_dimension_numbers<[1], [0], [0], [1], [0, 0, 1, 1], [], []>} : vector<8x32xf32>, vector<32x128xf32>, vector<8x128xf32> -> vector<8x128xf32>
    %305 = arith.addf %303, %304 : vector<8x128xf32>
    %306 = arith.negf %305 : vector<8x128xf32>
    %307 = math.exp %306 : vector<8x128xf32>
    %cst_117 = arith.constant 1.000000e+00 : f32
    %308 = vector.broadcast %cst_117 : f32 to vector<8x128xf32>
    %309 = arith.addf %308, %307 : vector<8x128xf32>
    %310 = arith.divf %308, %309 : vector<8x128xf32>
    %311 = math.tanh %305 : vector<8x128xf32>
    %312 = vector.extract_strided_slice %310 {offsets = [0, 0], sizes = [8, 32], strides = [1, 1]} : vector<8x128xf32> to vector<8x32xf32>
    %313 = vector.extract_strided_slice %310 {offsets = [0, 32], sizes = [8, 32], strides = [1, 1]} : vector<8x128xf32> to vector<8x32xf32>
    %314 = vector.extract_strided_slice %311 {offsets = [0, 64], sizes = [8, 32], strides = [1, 1]} : vector<8x128xf32> to vector<8x32xf32>
    %315 = vector.extract_strided_slice %310 {offsets = [0, 96], sizes = [8, 32], strides = [1, 1]} : vector<8x128xf32> to vector<8x32xf32>
    %316 = arith.mulf %313, %299 : vector<8x32xf32>
    %317 = arith.mulf %312, %314 : vector<8x32xf32>
    %318 = arith.addf %316, %317 : vector<8x32xf32>
    %319 = math.tanh %318 : vector<8x32xf32>
    %320 = arith.mulf %315, %319 : vector<8x32xf32>
    %c0_118 = arith.constant 0 : index
    %c6_119 = arith.constant 6 : index
    %c0_120 = arith.constant 0 : index
    %321 = vector.load %arg13[%c0_118, %c6_119, %c0_120] : memref<8x8x128xf32, #tpu.memory_space<vmem>>, vector<8x1x128xf32>
    %322 = vector.shape_cast %321 : vector<8x1x128xf32> to vector<8x128xf32>
    %cst_121 = arith.constant dense<0.000000e+00> : vector<8x128xf32>
    %323 = tpu.matmul %320, %196, %cst_121 {dimension_numbers = #tpu.dot_dimension_numbers<[1], [0], [0], [1], [0, 0, 1, 1], [], []>} : vector<8x32xf32>, vector<32x128xf32>, vector<8x128xf32> -> vector<8x128xf32>
    %324 = arith.addf %322, %323 : vector<8x128xf32>
    %325 = arith.negf %324 : vector<8x128xf32>
    %326 = math.exp %325 : vector<8x128xf32>
    %cst_122 = arith.constant 1.000000e+00 : f32
    %327 = vector.broadcast %cst_122 : f32 to vector<8x128xf32>
    %328 = arith.addf %327, %326 : vector<8x128xf32>
    %329 = arith.divf %327, %328 : vector<8x128xf32>
    %330 = math.tanh %324 : vector<8x128xf32>
    %331 = vector.extract_strided_slice %329 {offsets = [0, 0], sizes = [8, 32], strides = [1, 1]} : vector<8x128xf32> to vector<8x32xf32>
    %332 = vector.extract_strided_slice %329 {offsets = [0, 32], sizes = [8, 32], strides = [1, 1]} : vector<8x128xf32> to vector<8x32xf32>
    %333 = vector.extract_strided_slice %330 {offsets = [0, 64], sizes = [8, 32], strides = [1, 1]} : vector<8x128xf32> to vector<8x32xf32>
    %334 = vector.extract_strided_slice %329 {offsets = [0, 96], sizes = [8, 32], strides = [1, 1]} : vector<8x128xf32> to vector<8x32xf32>
    %335 = arith.mulf %332, %318 : vector<8x32xf32>
    %336 = arith.mulf %331, %333 : vector<8x32xf32>
    %337 = arith.addf %335, %336 : vector<8x32xf32>
    %338 = math.tanh %337 : vector<8x32xf32>
    %339 = arith.mulf %334, %338 : vector<8x32xf32>
    %c0_123 = arith.constant 0 : index
    %c7_124 = arith.constant 7 : index
    %c0_125 = arith.constant 0 : index
    %340 = vector.load %arg13[%c0_123, %c7_124, %c0_125] : memref<8x8x128xf32, #tpu.memory_space<vmem>>, vector<8x1x128xf32>
    %341 = vector.shape_cast %340 : vector<8x1x128xf32> to vector<8x128xf32>
    %cst_126 = arith.constant dense<0.000000e+00> : vector<8x128xf32>
    %342 = tpu.matmul %339, %196, %cst_126 {dimension_numbers = #tpu.dot_dimension_numbers<[1], [0], [0], [1], [0, 0, 1, 1], [], []>} : vector<8x32xf32>, vector<32x128xf32>, vector<8x128xf32> -> vector<8x128xf32>
    %343 = arith.addf %341, %342 : vector<8x128xf32>
    %344 = arith.negf %343 : vector<8x128xf32>
    %345 = math.exp %344 : vector<8x128xf32>
    %cst_127 = arith.constant 1.000000e+00 : f32
    %346 = vector.broadcast %cst_127 : f32 to vector<8x128xf32>
    %347 = arith.addf %346, %345 : vector<8x128xf32>
    %348 = arith.divf %346, %347 : vector<8x128xf32>
    %349 = math.tanh %343 : vector<8x128xf32>
    %350 = vector.extract_strided_slice %348 {offsets = [0, 0], sizes = [8, 32], strides = [1, 1]} : vector<8x128xf32> to vector<8x32xf32>
    %351 = vector.extract_strided_slice %348 {offsets = [0, 32], sizes = [8, 32], strides = [1, 1]} : vector<8x128xf32> to vector<8x32xf32>
    %352 = vector.extract_strided_slice %349 {offsets = [0, 64], sizes = [8, 32], strides = [1, 1]} : vector<8x128xf32> to vector<8x32xf32>
    %353 = vector.extract_strided_slice %348 {offsets = [0, 96], sizes = [8, 32], strides = [1, 1]} : vector<8x128xf32> to vector<8x32xf32>
    %354 = arith.mulf %351, %337 : vector<8x32xf32>
    %355 = arith.mulf %350, %352 : vector<8x32xf32>
    %356 = arith.addf %354, %355 : vector<8x32xf32>
    %357 = math.tanh %356 : vector<8x32xf32>
    %358 = arith.mulf %353, %357 : vector<8x32xf32>
    %c0_128 = arith.constant 0 : index
    %c0_129 = arith.constant 0 : index
    %359 = vector.load %arg10[%c0_128, %c0_129] : memref<32x4xf32, #tpu.memory_space<vmem>>, vector<32x4xf32>
    %cst_130 = arith.constant dense<0.000000e+00> : vector<8x4xf32>
    %360 = tpu.matmul %358, %359, %cst_130 {dimension_numbers = #tpu.dot_dimension_numbers<[1], [0], [0], [1], [0, 0, 1, 1], [], []>} : vector<8x32xf32>, vector<32x4xf32>, vector<8x4xf32> -> vector<8x4xf32>
    %c0_131 = arith.constant 0 : index
    %c0_132 = arith.constant 0 : index
    %361 = vector.load %arg11[%c0_131, %c0_132] : memref<1x4xf32, #tpu.memory_space<vmem>>, vector<1x4xf32>
    %362 = vector.broadcast %361 : vector<1x4xf32> to vector<8x4xf32>
    %363 = arith.addf %360, %362 : vector<8x4xf32>
    %cst_133 = arith.constant 0.000000e+00 : f32
    %364 = vector.broadcast %cst_133 : f32 to vector<8x4xf32>
    %365 = arith.maximumf %363, %364 : vector<8x4xf32>
    %c0_134 = arith.constant 0 : index
    %c0_135 = arith.constant 0 : index
    %366 = vector.load %arg12[%c0_134, %c0_135] : memref<8x4xf32, #tpu.memory_space<vmem>>, vector<8x4xf32>
    tpu.vector_store %arg12[%c0_134, %c0_135], %365 {strides = array<i32>} : memref<8x4xf32, #tpu.memory_space<vmem>>, vector<8x4xf32>,
    return
  }
}

</mosaic_0001>

<bundles_post_ra>
// kernel: tpu_custom_call.1
= control target key start
LH: loop header
LB: loop body
LE: loop exit
PB: predicated region body
PF: predicated region fallthrough
CT: control target
= control target key end

     0   :  { %17 = vsyncpa [#allocation5], 0  ;;  %s7646_s21 = smov [#allocation4]   ;;  %s9989_s0 = inlined_call_operand.hbm [shape: f32[8,6], index: 0, kind: input, shape index: {}]   ;;  %s9990_s1 = inlined_call_operand.vmem [shape: f32[64,5], index: 1, kind: input, shape index: {}]   ;;  %s9991_s2 = inlined_call_operand.vmem [shape: f32[6,128], index: 2, kind: input, shape index: {}]   ;;  %s9992_s3 = inlined_call_operand.vmem [shape: f32[1,128], index: 3, kind: input, shape index: {}]   ;;  %s9993_s4 = inlined_call_operand.vmem [shape: f32[5,128], index: 4, kind: input, shape index: {}]   ;;  %s9994_s5 = inlined_call_operand.vmem [shape: f32[32,128], index: 5, kind: input, shape index: {}]   ;;  %s9995_s6 = inlined_call_operand.vmem [shape: f32[1,128], index: 6, kind: input, shape index: {}]   ;;  %s9996_s7 = inlined_call_operand.vmem [shape: f32[32,128], index: 7, kind: input, shape index: {}]   ;;  %s9997_s8 = inlined_call_operand.vmem [shape: f32[32,128], index: 8, kind: input, shape index: {}]   ;;  %s9998_s9 = inlined_call_operand.vmem [shape: f32[1,128], index: 9, kind: input, shape index: {}]   ;;  %s9999_s10 = inlined_call_operand.vmem [shape: f32[32,4], index: 10, kind: input, shape index: {}]   ;;  %s10000_s11 = inlined_call_operand.vmem [shape: f32[1,4], index: 11, kind: input, shape index: {}]   ;;  %s10001_s12 = inlined_call_operand.vmem [shape: f32[8,4], index: 12, kind: output, shape index: {}]  }
   0x1   :  { %s24_s22 = sshll.u32 %s7646_s21, 4  ;;  %s7622_s25 = scalar_lea.hbm %s9989_s0, 128  ;;  %s25_s22 = int_to_ptr.vmem [resolvable:$true] %s24_s22 }
   0x2   :  { %p7623_p0 = scmp.ne.s32.totalorder %s9989_s0, %s7622_s25  ;;  %p7626_p1 = scmp.lt.u32.totalorder %s7622_s25, %s9989_s0 }
   0x4   :  { %p7628_p2 = pnand %p7626_p1, %p7623_p0 }
   0x6   :  { %7631 = shalt.err (!%p7628_p2)
}
   0x7   :  { %s7632_s30 = scalar_lea.vmem %s25_s22, 128  ;;  %p7637_p4 = scmp.lt.s32.totalorder %s25_s22, %s25_s22 }
   0x8   :  { %p7633_p3 = scmp.ne.s32.totalorder %s25_s22, %s7632_s30  ;;  %p7638_p5 = scmp.lt.s32.totalorder %s7632_s30, %s7632_s30 }
   0xa   :  { %p7639_p6 = por %p7638_p5, %p7637_p4 }
   0xc   :  { %p7640_p7 = pnand %p7639_p6, %p7633_p3 }
   0xe   :  { %7643 = shalt.err (!%p7640_p7)
}
   0xf   :  { %27 = dma.hbm_to_vmem [thread:$0]  %s9989_s0, 128, %s25_s22, [#allocation5]  }
  0x10   :  { %7644 = dma.done.wait [#allocation5], 128  }
  0x11   :  { %7645 = vsyncadd [#allocation5], 4294967168  ;;  %v10011_v0 = vmov 0.0   ;;  %vm7648_vm0 = vmmov 0   ;;  %vm66_vm1 = vcmask 1045504   ;;  %vm186_vm2 = vcmask 1044480  }
  0x12   :  { %6255 = vmatprep.subr.mxu0 %v10011_v0  ;;  %6257 = vmatprep.mubr.msk.f32.mxu0 %vm7648_vm0, %v10011_v0  ;;  %vm62_vm3 = vcmask 48128   ;;  %vm161_vm4 = vcmask 39936   ;;  %v54_v1 = vld [vmem:[%s9991_s2] sm:$0x3f]  ;;  %v148_v5 = vld [vmem:[%s9990_s1 + $0x8] sm:$0xff]  ;;  %v149_v6 = vld [vmem:[%s9990_s1 + $0x10] sm:$0xff] }
  0x13   :  { %v53_v2 = vld [vmem:[#allocation4] sm:$0xff]  ;;  %6256 = vmatpush3.msk.msra.mxu0 %vm66_vm1, %v54_v1  ;;  %v10009_v7 = vmov 0.0|0.0   ;;  %v143_v9 = vld [vmem:[%s9994_s5 + $0x8] sm:$0xff]  ;;  %v150_v10 = vld [vmem:[%s9990_s1 + $0x18] sm:$0xff]  ;;  %vm311_vm5 = vcmask 261120   ;;  %vm682_vm6 = vcmask 1041409  }
  0x14   :  { %v141_v3 = vld [vmem:[%s9993_s4] sm:$0x1f]  ;;  %6258 = vmatmul.mubr.msk.f32.vlgmr.msra.gmra.mrb[0].mxu0 %vm62_vm3, %v53_v2  ;;  %6481 = vmatprep.subr.bf16.mxu0 %v10009_v7  ;;  %v152_v13 = vld [vmem:[%s9990_s1 + $0x28] sm:$0xff]  ;;  %v153_v14 = vld [vmem:[%s9990_s1 + $0x30] sm:$0xff]  ;;  %vm685_vm7 = vcmask 1042434   ;;  %vm688_vm8 = vcmask 1043459  }
  0x15   :  { %6260 = vmatprep.subr.msk.mxu1 %vm186_vm2, %v141_v3  ;;  %v147_v4 = vld [vmem:[%s9990_s1] sm:$0xff]  ;;  %6282 = vmatprep.mubr.msk.f32.mxu0 %vm7648_vm0, %v10011_v0  ;;  %v154_v15 = vld [vmem:[%s9990_s1 + $0x38] sm:$0xff]  ;;  %v144_v16 = vld [vmem:[%s9994_s5 + $0x10] sm:$0xff]  ;;  %vm691_vm9 = vcmask 1044484   ;;  %vm694_vm10 = vcmask 1045509   ;;  %vm697_vm11 = vcmask 1046534  }
  0x16   :  { %6261 = vmatpush3.msk.msra.mxu1 %vm186_vm2, %v141_v3  ;;  %6262 = vmatprep.mubr.msk.f32.mxu1 %vm161_vm4, %v147_v4  ;;  %v142_v8 = vld [vmem:[%s9994_s5] sm:$0xff]  ;;  %v145_v17 = vld [vmem:[%s9994_s5 + $0x18] sm:$0xff]  ;;  %s7651_s5 = smov 96   ;;  %vm700_vm12 = vcmask 1047559   ;;  %vm664_vm13 = vcmask 253952   ;;  %vm5972_vm14 = vcmask 31744  }
  0x17   :  { %6263 = vmatmul.mubr.msk.f32.vlgmr.msra.gmra.mrb[0].mxu1 %vm161_vm4, %v148_v5  ;;  %v7763_v11 = vpack.c.bf16 %v143_v9, %v142_v8  ;;  %6493 = vmatprep.subr.bf16.mxu1 %v10009_v7  ;;  %v151_v12 = vld [vmem:[%s9990_s1 + $0x20] sm:$0xff]  ;;  %v7795_v18 = vpack.c.bf16 %v145_v17, %v144_v16 }
  0x18   :  { %6265 = vmatprep.mubr.msk.f32.mxu1 %vm161_vm4, %v149_v6  ;;  %v5979_v19 = vld [vmem:[%s9992_s3] ss:$0 sm:$0xff]  ;;  %s7650_s3 = smov 64  }
  0x19   :  { %6483 = vmatpush3.bf16.msra.mxu0 %v7763_v11  ;;  %6495 = vmatpush3.bf16.msra.mxu1 %v7763_v11  ;;  %v5982_v21 = vld [vmem:[%s9995_s6] ss:$0 sm:$0xff]  ;;  %s7652_s6 = smov 32  }
  0x1a   :  { %6484 = vmatprep.subr.bf16.mxu0 %v10009_v7  ;;  %6496 = vmatprep.subr.bf16.mxu1 %v10009_v7 }
  0x1b   :  { %6266 = vmatmul.mubr.msk.f32.gmra.mrb[2].mxu1 %vm161_vm4, %v150_v10 }
  0x1c   :  { %6268 = vmatprep.mubr.msk.f32.mxu1 %vm161_vm4, %v151_v12 }
  0x1d   :  { %6486 = vmatpush3.bf16.msra.mxu0 %v7795_v18  ;;  %6498 = vmatpush3.bf16.msra.mxu1 %v7795_v18 }
  0x1e   :  { %6487 = vmatprep.subr.bf16.mxu0 %v10009_v7  ;;  %6505 = vmatprep.subr.bf16.mxu1 %v10009_v7 }
  0x1f   :  { %6269 = vmatmul.mubr.msk.f32.gmra.mrb[4].mxu1 %vm161_vm4, %v152_v13 }
  0x20   :  { %6271 = vmatprep.mubr.msk.f32.mxu1 %vm161_vm4, %v153_v14 }
  0x23   :  { %6272 = vmatmul.mubr.msk.f32.gmra.mrb[6].mxu1 %vm161_vm4, %v154_v15 }
  0x24   :  { %6304 = vmatprep.mubr.msk.f32.mxu1 %vm7648_vm0, %v10011_v0 }
  0xe7   :  { %v136_v20 = vpop.f32.mrb[0].mxu0 }
  0xe8   :  { %v137_v22 = vadd.f32 %v5979_v19, %v136_v20  ;;  %v6259_v23 = vpop.f32.mrb[1].mxu0 }
  0xea   :  { %v6264_v24 = vpop.f32.mrb[0].mxu1  ;;  %v7807_v25 = vmax.f32 %v137_v22, 0.0 }
  0xeb   :  { %v262_v26 = vadd.f32 %v6264_v24, %v5982_v21  ;;  %v256_v27 = vpop.f32.mrb[1].mxu1 }
  0xec   :  { %10044 = vst [vmem:[#allocation7_spill] sm:$0xff] %v7807_v25  ;;  %v257_v28 = vadd.f32 %v5982_v21, %v256_v27  ;;  %6283 = vmatmul.mubr.msk.f32.vlgmr.msra.gmra.mrb[2].mxu0 %vm311_vm5, %v7807_v25  ;;  %v10008_v9 = vrot.slane %v7807_v25, 2  ;;  %v10006_v12 = vrot.slane %v7807_v25, 3  ;;  %v10005_v14 = vrot.slane %v7807_v25, 4 }
  0xed   :  { %296 = vst [vmem:[#allocation2 + $0x8] sm:$0xff] %v262_v26  ;;  %6489 = vmatpush3.bf16.msra.mxu0 %v7763_v11  ;;  %6293 = vmatprep.mubr.msk.f32.mxu0 %vm7648_vm0, %v10011_v0  ;;  %v10007_v16 = vrot.slane %v7807_v25, 1  ;;  %v10003_v17 = vrot.slane %v7807_v25, 5  ;;  %v10004_v19 = vrot.slane %v7807_v25, 6  ;;  %v10002_v20 = vrot.slane %v7807_v25, 7 }
  0xee   :  { %295 = vst [vmem:[#allocation2] sm:$0xff] %v257_v28  ;;  %v6267_v29 = vpop.f32.mrb[2].mxu1  ;;  %6490 = vmatprep.subr.bf16.mxu0 %v10009_v7 }
  0xef   :  { %v272_v30 = vadd.f32 %v6267_v29, %v5982_v21  ;;  %v266_v31 = vpop.f32.mrb[3].mxu1 }
  0xf0   :  { %v267_v32 = vadd.f32 %v5982_v21, %v266_v31 }
  0xf1   :  { %298 = vst [vmem:[#allocation2 + $0x18] sm:$0xff] %v272_v30  ;;  %6492 = vmatpush3.bf16.msra.mxu0 %v7795_v18 }
  0xf2   :  { %297 = vst [vmem:[#allocation2 + $0x10] sm:$0xff] %v267_v32  ;;  %v6270_v33 = vpop.f32.mrb[4].mxu1  ;;  %6499 = vmatprep.subr.bf16.mxu0 %v10009_v7 }
  0xf3   :  { %v282_v34 = vadd.f32 %v6270_v33, %v5982_v21  ;;  %v276_v35 = vpop.f32.mrb[5].mxu1 }
  0xf4   :  { %v277_v36 = vadd.f32 %v5982_v21, %v276_v35  ;;  %v304_v55 = vld [vmem:[#allocation2 + $0x8] sm:$0x1] }
  0xf5   :  { %300 = vst [vmem:[#allocation2 + $0x28] sm:$0xff] %v282_v34  ;;  %v303_v41 = vld [vmem:[#allocation2] sm:$0x1] }
  0xf6   :  { %299 = vst [vmem:[#allocation2 + $0x20] sm:$0xff] %v277_v36  ;;  %v6273_v37 = vpop.f32.mrb[6].mxu1 }
  0xf7   :  { %v292_v38 = vadd.f32 %v6273_v37, %v5982_v21  ;;  %v286_v39 = vpop.f32.mrb[7].mxu1 }
  0xf8   :  { %v287_v40 = vadd.f32 %v5982_v21, %v286_v39  ;;  %v306_v43 = vld [vmem:[#allocation2 + $0x18] sm:$0x1] }
  0xf9   :  { %302 = vst [vmem:[#allocation2 + $0x38] sm:$0xff] %v292_v38  ;;  %v305_v59 = vld [vmem:[#allocation2 + $0x10] sm:$0x1] }
  0xfa   :  { %301 = vst [vmem:[#allocation2 + $0x30] sm:$0xff] %v287_v40 }
  0xfc   :  { %v308_v49 = vld [vmem:[#allocation2 + $0x28] sm:$0x1] }
  0xfd   :  { %v307_v63 = vld [vmem:[#allocation2 + $0x20] sm:$0x1] }
 0x100   :  { %v310_v51 = vld [vmem:[#allocation2 + $0x38] sm:$0x1] }
 0x101   :  { %v309_v3 = vld [vmem:[#allocation2 + $0x30] sm:$0x1] }
 0x1bf   :  { %v381_v42 = vpop.f32.mrb[2].mxu0 }
 0x1c0   :  { %v388_v44 = vrot.slane %v381_v42, 3  ;;  %v6284_v45 = vpop.f32.mrb[3].mxu0  ;;  %v401_v46 = vadd.f32 %v381_v42, %v303_v41  ;;  %v390_v48 = vrot.slane %v381_v42, 5  ;;  %v392_v50 = vrot.slane %v381_v42, 7 }
 0x1c1   :  { %v386_v53 = vrot.slane %v381_v42, 1  ;;  %v387_v57 = vrot.slane %v381_v42, 2  ;;  %v389_v61 = vrot.slane %v381_v42, 4  ;;  %v391_v1 = vrot.slane %v381_v42, 6 }
 0x1c2   :  { %v404_v47 = vadd.f32 %v388_v44, %v306_v43  ;;  %6598 = vtanh.f32 %v401_v46  ;;  %v7817_v52 = vadd.f32 %v390_v48, %v308_v49  ;;  %v7819_v54 = vadd.f32 %v392_v50, %v310_v51 }
 0x1c3   :  { %v402_v58 = vadd.f32 %v386_v53, %v304_v55  ;;  %v403_v62 = vadd.f32 %v387_v57, %v305_v59  ;;  %v405_v2 = vadd.f32 %v389_v61, %v307_v63  ;;  %v407_v5 = vadd.f32 %v391_v1, %v309_v3 }
 0x1c4   :  { %6600 = vtanh.f32 %v404_v47  ;;  %v5993_v21 = vmul.f32 -1.442695, %v401_v46  ;;  %v5996_v22 = vmul.f32 -1.442695, %v404_v47  ;;  %v5998_v31 = vmul.f32 -1.442695, %v7817_v52 }
 0x1c5   :  { %6602 = vtanh.f32 %v7817_v52  ;;  %v5994_v24 = vmul.f32 -1.442695, %v402_v58  ;;  %v5995_v28 = vmul.f32 -1.442695, %v403_v62  ;;  %v5997_v30 = vmul.f32 -1.442695, %v405_v2 }
 0x1c6   :  { %6604 = vtanh.f32 %v7819_v54  ;;  %v5999_v32 = vmul.f32 -1.442695, %v407_v5  ;;  %v6000_v34 = vmul.f32 -1.442695, %v7819_v54 }
 0x1c7   :  { %6606 = vtanh.f32 %v402_v58 }
 0x1c8   :  { %6608 = vtanh.f32 %v403_v62 }
 0x1c9   :  { %6610 = vtanh.f32 %v405_v2 }
 0x1ca   :  { %6612 = vtanh.f32 %v407_v5 }
 0x1cb   :  { %6614 = vpow2.f32 %v5993_v21 }
 0x1cc   :  { %v6599_v56 = vpop.eup %6598  ;;  %6616 = vpow2.f32 %v5996_v22 }
 0x1cd   :  { %512 = vrot.lane.b32.xlu1 %v6599_v56, %s7650_s3  ;;  %6618 = vpow2.f32 %v5994_v24 }
 0x1ce   :  { %v6601_v60 = vpop.eup %6600 }
 0x1cf   :  { %v6603_v4 = vpop.eup %6602 }
 0x1d0   :  { %v6605_v6 = vpop.eup %6604 }
 0x1d1   :  { %518 = vrot.lane.b32.xlu1 %v6601_v60, %s7650_s3  ;;  %v6607_v8 = vpop.eup %6606 }
 0x1d2   :  { %514 = vrot.lane.b32.xlu0 %v6607_v8, %s7650_s3  ;;  %v6609_v10 = vpop.eup %6608 }
 0x1d3   :  { %v6611_v13 = vpop.eup %6610 }
 0x1d4   :  { %v6613_v15 = vpop.eup %6612 }
 0x1d5   :  { %522 = vrot.lane.b32.xlu1 %v6603_v4, %s7650_s3  ;;  %v6615_v23 = vpop.eup %6614 }
 0x1d6   :  { %516 = vrot.lane.b32.xlu0 %v6609_v10, %s7650_s3  ;;  %v433_v26 = vadd.f32 1.0, %v6615_v23  ;;  %v6617_v27 = vpop.eup %6616 }
 0x1d7   :  { %v436_v29 = vadd.f32 1.0, %v6617_v27  ;;  %v6619_v33 = vpop.eup %6618 }
 0x1d8   :  { %6620 = vrcp.f32 %v433_v26  ;;  %v434_v36 = vadd.f32 1.0, %v6619_v33 }
 0x1d9   :  { %526 = vrot.lane.b32.xlu1 %v6605_v6, %s7650_s3  ;;  %6622 = vpow2.f32 %v5995_v28 }
 0x1da   :  { %520 = vrot.lane.b32.xlu0 %v6611_v13, %s7650_s3  ;;  %6624 = vrcp.f32 %v436_v29 }
 0x1db   :  { %6626 = vpow2.f32 %v5997_v30 }
 0x1dc   :  { %6628 = vpow2.f32 %v5998_v31 }
 0x1dd   :  { %476 = vrot.lane.b32.xlu1 %v10008_v9, %s7651_s5  ;;  %6630 = vpow2.f32 %v5999_v32 }
 0x1de   :  { %524 = vrot.lane.b32.xlu0 %v6613_v15, %s7650_s3  ;;  %6632 = vpow2.f32 %v6000_v34 }
 0x1df   :  { %6634 = vrcp.f32 %v434_v36 }
 0x1e1   :  { %478 = vrot.lane.b32.xlu1 %v10006_v12, %s7651_s5 }
 0x1e2   :  { %474 = vrot.lane.b32.xlu0 %v10007_v16, %s7651_s5  ;;  %v7855_v35 = vpop.eup %6620 }
 0x1e3   :  { %v6623_v38 = vpop.eup %6622 }
 0x1e4   :  { %v7859_v40 = vpop.eup %6624  ;;  %v435_v42 = vadd.f32 1.0, %v6623_v38 }
 0x1e5   :  { %480 = vrot.lane.b32.xlu1 %v10005_v14, %s7651_s5  ;;  %v6627_v43 = vpop.eup %6626 }
 0x1e6   :  { %472 = vrot.lane.b32.xlu0 %v7807_v25, %s7651_s5  ;;  %v6629_v45 = vpop.eup %6628  ;;  %6636 = vrcp.f32 %v435_v42  ;;  %v437_v46 = vadd.f32 1.0, %v6627_v43 }
 0x1e7   :  { %v6631_v47 = vpop.eup %6630  ;;  %v438_v48 = vadd.f32 1.0, %v6629_v45 }
 0x1e8   :  { %6638 = vrcp.f32 %v437_v46  ;;  %v439_v49 = vadd.f32 1.0, %v6631_v47  ;;  %v6633_v50 = vpop.eup %6632 }
 0x1e9   :  { %482 = vrot.lane.b32.xlu1 %v10003_v17, %s7651_s5  ;;  %v7863_v51 = vpop.eup %6634  ;;  %6640 = vrcp.f32 %v438_v48  ;;  %v440_v54 = vadd.f32 1.0, %v6633_v50 }
 0x1ea   :  { %484 = vrot.lane.b32.xlu0 %v10004_v19, %s7651_s5  ;;  %6642 = vrcp.f32 %v439_v49 }
 0x1eb   :  { %6644 = vrcp.f32 %v440_v54 }
 0x1ee   :  { %486 = vrot.lane.b32.xlu0 %v10002_v20, %s7651_s5 }
 0x1f0   :  { %v7867_v55 = vpop.eup %6636 }
 0x1f2   :  { %v7871_v58 = vpop.eup %6638 }
 0x1f3   :  { %v7874_v62 = vpop.eup %6640 }
 0x1f4   :  { %v7877_v63 = vpop.eup %6642 }
 0x1f5   :  { %v7883_v5 = vpop.eup %6644 }
 0x23f   :  { %v513_v37 = vpop.permute.xlu1 %512 }
 0x240   :  { %v536_v39 = vmul.f32 %v7855_v35, %v513_v37 }
 0x242   :  { %552 = vrot.lane.b32.xlu0 %v536_v39, %s7652_s6 }
 0x243   :  { %v519_v41 = vpop.permute.xlu1 %518 }
 0x244   :  { %v539_v44 = vmul.f32 %v7859_v40, %v519_v41  ;;  %v515_v52 = vpop.permute.xlu0 %514 }
 0x245   :  { %v537_v53 = vmul.f32 %v7863_v51, %v515_v52 }
 0x246   :  { %558 = vrot.lane.b32.xlu1 %v539_v44, %s7652_s6 }
 0x247   :  { %554 = vrot.lane.b32.xlu0 %v537_v53, %s7652_s6  ;;  %v523_v59 = vpop.permute.xlu1 %522 }
 0x248   :  { %v517_v56 = vpop.permute.xlu0 %516  ;;  %v541_v2 = vmul.f32 %v7874_v62, %v523_v59 }
 0x249   :  { %v538_v57 = vmul.f32 %v7867_v55, %v517_v56 }
 0x24b   :  { %556 = vrot.lane.b32.xlu0 %v538_v57, %s7652_s6  ;;  %v527_v4 = vpop.permute.xlu1 %526 }
 0x24c   :  { %v521_v60 = vpop.permute.xlu0 %520  ;;  %v543_v6 = vmul.f32 %v7883_v5, %v527_v4 }
 0x24d   :  { %v540_v61 = vmul.f32 %v7871_v58, %v521_v60 }
 0x24f   :  { %560 = vrot.lane.b32.xlu1 %v540_v61, %s7652_s6  ;;  %v477_v15 = vpop.permute.xlu1 %476 }
 0x250   :  { %v525_v1 = vpop.permute.xlu0 %524  ;;  %v498_v33 = vmul.f32 %v7867_v55, %v477_v15 }
 0x251   :  { %v542_v3 = vmul.f32 %v7877_v63, %v525_v1 }
 0x253   :  { %562 = vrot.lane.b32.xlu1 %v541_v2, %s7652_s6  ;;  %564 = vrot.lane.b32.xlu0 %v542_v3, %s7652_s6  ;;  %v479_v24 = vpop.permute.xlu1 %478 }
 0x254   :  { %v475_v8 = vpop.permute.xlu0 %474  ;;  %v499_v36 = vmul.f32 %v7859_v40, %v479_v24 }
 0x255   :  { %v497_v29 = vmul.f32 %v7863_v51, %v475_v8 }
 0x257   :  { %566 = vrot.lane.b32.xlu1 %v543_v6, %s7652_s6  ;;  %v481_v27 = vpop.permute.xlu1 %480 }
 0x258   :  { %v7887_v10 = vpop.permute.xlu0 %472  ;;  %v500_v41 = vmul.f32 %v7871_v58, %v481_v27 }
 0x259   :  { %v496_v22 = vmul.f32 %v7855_v35, %v7887_v10 }
 0x25b   :  { %v483_v30 = vpop.permute.xlu1 %482 }
 0x25c   :  { %v485_v13 = vpop.permute.xlu0 %484  ;;  %v501_v45 = vmul.f32 %v7874_v62, %v483_v30 }
 0x25d   :  { %v502_v44 = vmul.f32 %v7877_v63, %v485_v13 }
 0x260   :  { %v487_v21 = vpop.permute.xlu0 %486 }
 0x261   :  { %v503_v52 = vmul.f32 %v7883_v5, %v487_v21 }
 0x2b4   :  { %v553_v23 = vpop.permute.xlu0 %552 }
 0x2b5   :  { %v7891_v26 = vadd.f32 %v553_v23, %v496_v22 }
 0x2b7   :  { %6646 = vtanh.f32 %v7891_v26 }
 0x2b8   :  { %v559_v34 = vpop.permute.xlu1 %558 }
 0x2b9   :  { %v555_v31 = vpop.permute.xlu0 %554  ;;  %v7903_v39 = vadd.f32 %v559_v34, %v499_v36 }
 0x2ba   :  { %v7896_v32 = vadd.f32 %v555_v31, %v497_v29 }
 0x2bc   :  { %6648 = vtanh.f32 %v7896_v32 }
 0x2bd   :  { %v557_v37 = vpop.permute.xlu0 %556 }
 0x2be   :  { %v7901_v38 = vadd.f32 %v557_v37, %v498_v33 }
 0x2c0   :  { %6650 = vtanh.f32 %v7901_v38 }
 0x2c1   :  { %v6647_v28 = vpop.eup %6646  ;;  %v561_v42 = vpop.permute.xlu1 %560  ;;  %6652 = vtanh.f32 %v7903_v39 }
 0x2c2   :  { %600 = vrot.lane.b32.xlu0 %v6647_v28, %s7650_s3  ;;  %v7907_v43 = vadd.f32 %v561_v42, %v500_v41 }
 0x2c4   :  { %6654 = vtanh.f32 %v7907_v43 }
 0x2c5   :  { %v563_v46 = vpop.permute.xlu1 %562  ;;  %v565_v47 = vpop.permute.xlu0 %564 }
 0x2c6   :  { %v6649_v48 = vpop.eup %6648  ;;  %v7913_v49 = vadd.f32 %v563_v46, %v501_v45  ;;  %v7915_v50 = vadd.f32 %v565_v47, %v502_v44  ;;  %v673_v46 = vld [vmem:[#allocation2 + $0x1] sm:$0x1] }
 0x2c7   :  { %602 = vrot.lane.b32.xlu0 %v6649_v48, %s7650_s3 }
 0x2c8   :  { %6656 = vtanh.f32 %v7913_v49 }
 0x2c9   :  { %6658 = vtanh.f32 %v7915_v50  ;;  %v567_v53 = vpop.permute.xlu1 %566 }
 0x2ca   :  { %v6651_v54 = vpop.eup %6650  ;;  %v7921_v56 = vadd.f32 %v567_v53, %v503_v52 }
 0x2cb   :  { %604 = vrot.lane.b32.xlu1 %v6651_v54, %s7650_s3  ;;  %v6653_v57 = vpop.eup %6652  ;;  %v674_v54 = vld [vmem:[#allocation2 + $0x9] sm:$0x1] }
 0x2cc   :  { %6660 = vtanh.f32 %v7921_v56 }
 0x2ce   :  { %v6655_v59 = vpop.eup %6654 }
 0x2cf   :  { %608 = vrot.lane.b32.xlu0 %v6655_v59, %s7650_s3  ;;  %606 = vrot.lane.b32.xlu1 %v6653_v57, %s7650_s3  ;;  %v675_v57 = vld [vmem:[#allocation2 + $0x11] sm:$0x1] }
 0x2d2   :  { %v6657_v60 = vpop.eup %6656 }
 0x2d3   :  { %v6659_v61 = vpop.eup %6658  ;;  %610 = vrot.lane.b32.xlu1 %v6657_v60, %s7650_s3 }
 0x2d4   :  { %612 = vrot.lane.b32.xlu0 %v6659_v61, %s7650_s3 }
 0x2d6   :  { %v6661_v1 = vpop.eup %6660 }
 0x2d7   :  { %614 = vrot.lane.b32.xlu1 %v6661_v1, %s7650_s3 }
 0x334   :  { %v601_v2 = vpop.permute.xlu0 %600 }
 0x335   :  { %v7939_v23 = vmul.f32 %v7855_v35, %v601_v2  ;;  %v677_v2 = vld [vmem:[#allocation2 + $0x21] sm:$0x1] }
 0x339   :  { %v603_v3 = vpop.permute.xlu0 %602 }
 0x33a   :  { %v7931_v4 = vmul.f32 %v7863_v51, %v603_v3  ;;  %v676_v3 = vld [vmem:[#allocation2 + $0x19] sm:$0x1] }
 0x33c   :  { %v681_v13 = vrot.slane %v7931_v4, 7 }
 0x33d   :  { %v605_v6 = vpop.permute.xlu1 %604 }
 0x33e   :  { %v7934_v8 = vmul.f32 %v7867_v55, %v605_v6  ;;  %v683_v55 = vsel %vm682_vm6, %v681_v13, %v7939_v23 }
 0x340   :  { %v684_v15 = vrot.slane %v7934_v8, 6 }
 0x341   :  { %v609_v21 = vpop.permute.xlu0 %608  ;;  %v607_v22 = vpop.permute.xlu1 %606 }
 0x342   :  { %v7942_v24 = vmul.f32 %v7859_v40, %v607_v22  ;;  %v7945_v51 = vmul.f32 %v7871_v58, %v609_v21  ;;  %v686_v28 = vsel %vm685_vm7, %v684_v15, %v683_v55  ;;  %v679_v55 = vld [vmem:[#allocation2 + $0x31] sm:$0x1] }
 0x344   :  { %v687_v27 = vrot.slane %v7942_v24, 5  ;;  %v690_v40 = vrot.slane %v7945_v51, 4 }
 0x345   :  { %v611_v29 = vpop.permute.xlu1 %610 }
 0x346   :  { %v689_v30 = vsel %vm688_vm8, %v687_v27, %v686_v28  ;;  %v613_v35 = vpop.permute.xlu0 %612  ;;  %v7953_v31 = vmul.f32 %v7874_v62, %v611_v29  ;;  %v678_v27 = vld [vmem:[#allocation2 + $0x29] sm:$0x1] }
 0x347   :  { %v7957_v58 = vmul.f32 %v7877_v63, %v613_v35  ;;  %v692_v36 = vsel %vm691_vm9, %v690_v40, %v689_v30  ;;  %v680_v35 = vld [vmem:[#allocation2 + $0x39] sm:$0x1] }
 0x348   :  { %10045 = vst [vmem:[#allocation8_spill] sm:$0xff] %v7953_v31  ;;  %v693_v33 = vrot.slane %v7953_v31, 3 }
 0x349   :  { %10046 = vst [vmem:[#allocation9_spill] sm:$0xff] %v7957_v58  ;;  %v615_v34 = vpop.permute.xlu1 %614  ;;  %v696_v62 = vrot.slane %v7957_v58, 2 }
 0x34a   :  { %v7962_v37 = vmul.f32 %v7883_v5, %v615_v34  ;;  %v695_v41 = vsel %vm694_vm10, %v693_v33, %v692_v36 }
 0x34b   :  { %v698_v63 = vsel %vm697_vm11, %v696_v62, %v695_v41 }
 0x34c   :  { %10047 = vst [vmem:[#allocation10_spill] sm:$0xff] %v7962_v37  ;;  %v699_v42 = vrot.slane %v7962_v37, 1 }
 0x34e   :  { %v701_v44 = vsel %vm700_vm12, %v699_v42, %v698_v63 }
 0x34f   :  { %702 = vrot.lane.b32.xlu0 %v701_v44, %s7652_s6 }
 0x3c1   :  { %v703_v45 = vpop.permute.xlu0 %702 }
 0x3c2   :  { %6294 = vmatmul.mubr.msk.f32.vlgmr.msra.gmra.mrb[4].mxu0 %vm311_vm5, %v703_v45 }
 0x3c3   :  { %6501 = vmatpush3.bf16.msra.mxu0 %v7763_v11  ;;  %6315 = vmatprep.mubr.msk.f32.mxu0 %vm7648_vm0, %v10011_v0 }
 0x3c4   :  { %6502 = vmatprep.subr.bf16.mxu0 %v10009_v7 }
 0x3c7   :  { %6504 = vmatpush3.bf16.msra.mxu0 %v7795_v18 }
 0x3c8   :  { %6511 = vmatprep.subr.bf16.mxu0 %v10009_v7 }
 0x495   :  { %v772_v5 = vpop.f32.mrb[4].mxu0 }
 0x496   :  { %v6295_v47 = vpop.f32.mrb[5].mxu0  ;;  %v792_v48 = vadd.f32 %v772_v5, %v673_v46  ;;  %v777_v52 = vrot.slane %v772_v5, 1  ;;  %v778_v53 = vrot.slane %v772_v5, 2  ;;  %v780_v59 = vrot.slane %v772_v5, 4 }
 0x497   :  { %v779_v61 = vrot.slane %v772_v5, 3  ;;  %v782_v6 = vrot.slane %v772_v5, 6  ;;  %v781_v21 = vrot.slane %v772_v5, 5  ;;  %v783_v29 = vrot.slane %v772_v5, 7 }
 0x498   :  { %6662 = vtanh.f32 %v792_v48  ;;  %v793_v60 = vadd.f32 %v777_v52, %v674_v54  ;;  %v794_v1 = vadd.f32 %v778_v53, %v675_v57  ;;  %v796_v13 = vadd.f32 %v780_v59, %v677_v2 }
 0x499   :  { %v795_v22 = vadd.f32 %v779_v61, %v676_v3  ;;  %v798_v28 = vadd.f32 %v782_v6, %v679_v55  ;;  %v797_v30 = vadd.f32 %v781_v21, %v678_v27  ;;  %v799_v40 = vadd.f32 %v783_v29, %v680_v35 }
 0x49a   :  { %6664 = vtanh.f32 %v793_v60  ;;  %v6002_v44 = vmul.f32 -1.442695, %v792_v48  ;;  %v6003_v45 = vmul.f32 -1.442695, %v793_v60  ;;  %v6004_v5 = vmul.f32 -1.442695, %v794_v1 }
 0x49b   :  { %6666 = vtanh.f32 %v794_v1  ;;  %v6006_v46 = vmul.f32 -1.442695, %v796_v13  ;;  %v6005_v52 = vmul.f32 -1.442695, %v795_v22  ;;  %v6008_v53 = vmul.f32 -1.442695, %v798_v28 }
 0x49c   :  { %6668 = vtanh.f32 %v796_v13  ;;  %v6007_v57 = vmul.f32 -1.442695, %v797_v30  ;;  %v6009_v59 = vmul.f32 -1.442695, %v799_v40 }
 0x49d   :  { %6670 = vtanh.f32 %v795_v22 }
 0x49e   :  { %6672 = vtanh.f32 %v798_v28 }
 0x49f   :  { %6674 = vtanh.f32 %v797_v30 }
 0x4a0   :  { %6676 = vtanh.f32 %v799_v40 }
 0x4a1   :  { %6678 = vpow2.f32 %v6002_v44 }
 0x4a2   :  { %v6663_v15 = vpop.eup %6662  ;;  %6680 = vpow2.f32 %v6003_v45 }
 0x4a3   :  { %872 = vrot.lane.b32.xlu1 %v6663_v15, %s7650_s3  ;;  %6682 = vpow2.f32 %v6004_v5 }
 0x4a4   :  { %v6665_v33 = vpop.eup %6664  ;;  %6684 = vpow2.f32 %v6006_v46 }
 0x4a5   :  { %v6667_v34 = vpop.eup %6666  ;;  %6686 = vpow2.f32 %v6005_v52 }
 0x4a6   :  { %876 = vrot.lane.b32.xlu0 %v6667_v34, %s7650_s3  ;;  %v6669_v36 = vpop.eup %6668  ;;  %6688 = vpow2.f32 %v6008_v53 }
 0x4a7   :  { %874 = vrot.lane.b32.xlu1 %v6665_v33, %s7650_s3  ;;  %v6671_v41 = vpop.eup %6670 }
 0x4a8   :  { %v6673_v62 = vpop.eup %6672 }
 0x4a9   :  { %v6675_v42 = vpop.eup %6674 }
 0x4aa   :  { %878 = vrot.lane.b32.xlu0 %v6671_v41, %s7650_s3  ;;  %v6677_v63 = vpop.eup %6676 }
 0x4ab   :  { %880 = vrot.lane.b32.xlu1 %v6669_v36, %s7650_s3  ;;  %v6679_v47 = vpop.eup %6678 }
 0x4ac   :  { %v824_v54 = vadd.f32 1.0, %v6679_v47  ;;  %v6681_v61 = vpop.eup %6680 }
 0x4ad   :  { %v6683_v2 = vpop.eup %6682  ;;  %v825_v48 = vadd.f32 1.0, %v6681_v61 }
 0x4ae   :  { %882 = vrot.lane.b32.xlu0 %v6675_v42, %s7650_s3  ;;  %6690 = vrcp.f32 %v824_v54  ;;  %v6685_v60 = vpop.eup %6684  ;;  %v826_v1 = vadd.f32 1.0, %v6683_v2 }
 0x4af   :  { %884 = vrot.lane.b32.xlu1 %v6673_v62, %s7650_s3  ;;  %6692 = vpow2.f32 %v6007_v57  ;;  %v6687_v3 = vpop.eup %6686  ;;  %v828_v13 = vadd.f32 1.0, %v6685_v60 }
 0x4b0   :  { %6694 = vpow2.f32 %v6009_v59  ;;  %v6689_v6 = vpop.eup %6688  ;;  %v827_v22 = vadd.f32 1.0, %v6687_v3 }
 0x4b1   :  { %6696 = vrcp.f32 %v825_v48  ;;  %v830_v28 = vadd.f32 1.0, %v6689_v6 }
 0x4b2   :  { %886 = vrot.lane.b32.xlu0 %v6677_v63, %s7650_s3  ;;  %6698 = vrcp.f32 %v826_v1 }
 0x4b3   :  { %6700 = vrcp.f32 %v828_v13 }
 0x4b4   :  { %6702 = vrcp.f32 %v827_v22 }
 0x4b5   :  { %6704 = vrcp.f32 %v830_v28 }
 0x4b8   :  { %v7985_v15 = vpop.eup %6690 }
 0x4b9   :  { %v6693_v55 = vpop.eup %6692  ;;  %v856_v60 = vmul.f32 %v7985_v15, %v7891_v26 }
 0x4ba   :  { %v829_v29 = vadd.f32 1.0, %v6693_v55  ;;  %v6695_v30 = vpop.eup %6694 }
 0x4bb   :  { %v831_v35 = vadd.f32 1.0, %v6695_v30  ;;  %v7989_v40 = vpop.eup %6696 }
 0x4bc   :  { %6706 = vrcp.f32 %v829_v29  ;;  %v7991_v34 = vpop.eup %6698  ;;  %v857_v6 = vmul.f32 %v7989_v40, %v7896_v32 }
 0x4bd   :  { %6708 = vrcp.f32 %v831_v35  ;;  %v7996_v42 = vpop.eup %6700  ;;  %v858_v13 = vmul.f32 %v7991_v34, %v7901_v38 }
 0x4be   :  { %v7999_v44 = vpop.eup %6702  ;;  %v860_v26 = vmul.f32 %v7996_v42, %v7907_v43 }
 0x4bf   :  { %v8004_v47 = vpop.eup %6704  ;;  %v859_v32 = vmul.f32 %v7999_v44, %v7903_v39 }
 0x4c6   :  { %v8007_v53 = vpop.eup %6706 }
 0x4c7   :  { %v8013_v61 = vpop.eup %6708  ;;  %v861_v43 = vmul.f32 %v8007_v53, %v7913_v49 }
 0x515   :  { %v873_v21 = vpop.permute.xlu1 %872 }
 0x516   :  { %v896_v27 = vmul.f32 %v7985_v15, %v873_v21 }
 0x518   :  { %912 = vrot.lane.b32.xlu1 %v896_v27, %s7652_s6  ;;  %v877_v36 = vpop.permute.xlu0 %876 }
 0x519   :  { %v875_v33 = vpop.permute.xlu1 %874  ;;  %v898_v62 = vmul.f32 %v7991_v34, %v877_v36 }
 0x51a   :  { %v897_v41 = vmul.f32 %v7989_v40, %v875_v33  ;;  %v862_v33 = vmul.f32 %v8004_v47, %v7915_v50 }
 0x51b   :  { %916 = vrot.lane.b32.xlu0 %v898_v62, %s7652_s6 }
 0x51c   :  { %914 = vrot.lane.b32.xlu1 %v897_v41, %s7652_s6  ;;  %v879_v45 = vpop.permute.xlu0 %878 }
 0x51d   :  { %v881_v63 = vpop.permute.xlu1 %880  ;;  %v899_v46 = vmul.f32 %v7999_v44, %v879_v45 }
 0x51e   :  { %v900_v5 = vmul.f32 %v7996_v42, %v881_v63  ;;  %v863_v63 = vmul.f32 %v8013_v61, %v7921_v56 }
 0x51f   :  { %918 = vrot.lane.b32.xlu0 %v899_v46, %s7652_s6 }
 0x520   :  { %920 = vrot.lane.b32.xlu1 %v900_v5, %s7652_s6  ;;  %v883_v54 = vpop.permute.xlu0 %882 }
 0x521   :  { %v885_v52 = vpop.permute.xlu1 %884  ;;  %v901_v59 = vmul.f32 %v8007_v53, %v883_v54 }
 0x522   :  { %v902_v57 = vmul.f32 %v8004_v47, %v885_v52 }
 0x523   :  { %922 = vrot.lane.b32.xlu0 %v901_v59, %s7652_s6 }
 0x524   :  { %924 = vrot.lane.b32.xlu1 %v902_v57, %s7652_s6  ;;  %v887_v2 = vpop.permute.xlu0 %886 }
 0x525   :  { %v903_v48 = vmul.f32 %v8013_v61, %v887_v2 }
 0x527   :  { %926 = vrot.lane.b32.xlu0 %v903_v48, %s7652_s6 }
 0x58a   :  { %v913_v1 = vpop.permute.xlu1 %912 }
 0x58b   :  { %v8019_v3 = vadd.f32 %v913_v1, %v856_v60 }
 0x58d   :  { %6710 = vtanh.f32 %v8019_v3  ;;  %v917_v22 = vpop.permute.xlu0 %916 }
 0x58e   :  { %v915_v21 = vpop.permute.xlu1 %914  ;;  %v8028_v27 = vadd.f32 %v917_v22, %v858_v13 }
 0x58f   :  { %v8026_v55 = vadd.f32 %v915_v21, %v857_v6 }
 0x591   :  { %6712 = vtanh.f32 %v8026_v55  ;;  %v919_v30 = vpop.permute.xlu0 %918 }
 0x592   :  { %6714 = vtanh.f32 %v8028_v27  ;;  %v921_v29 = vpop.permute.xlu1 %920  ;;  %v8039_v35 = vadd.f32 %v919_v30, %v859_v32 }
 0x593   :  { %v8036_v38 = vadd.f32 %v921_v29, %v860_v26 }
 0x595   :  { %6716 = vtanh.f32 %v8036_v38  ;;  %v923_v39 = vpop.permute.xlu0 %922 }
 0x596   :  { %6718 = vtanh.f32 %v8039_v35  ;;  %v925_v36 = vpop.permute.xlu1 %924  ;;  %v8049_v62 = vadd.f32 %v923_v39, %v861_v43 }
 0x597   :  { %v6711_v28 = vpop.eup %6710  ;;  %v8047_v41 = vadd.f32 %v925_v36, %v862_v33 }
 0x598   :  { %960 = vrot.lane.b32.xlu1 %v6711_v28, %s7650_s3 }
 0x599   :  { %6720 = vtanh.f32 %v8047_v41  ;;  %v927_v50 = vpop.permute.xlu0 %926 }
 0x59a   :  { %6722 = vtanh.f32 %v8049_v62  ;;  %v8055_v46 = vadd.f32 %v927_v50, %v863_v63 }
 0x59b   :  { %v6713_v45 = vpop.eup %6712 }
 0x59c   :  { %v6715_v5 = vpop.eup %6714  ;;  %962 = vrot.lane.b32.xlu1 %v6713_v45, %s7650_s3  ;;  %6724 = vtanh.f32 %v8055_v46 }
 0x59d   :  { %964 = vrot.lane.b32.xlu0 %v6715_v5, %s7650_s3 }
 0x59f   :  { %v6717_v49 = vpop.eup %6716 }
 0x5a0   :  { %v6719_v52 = vpop.eup %6718  ;;  %968 = vrot.lane.b32.xlu1 %v6717_v49, %s7650_s3 }
 0x5a1   :  { %966 = vrot.lane.b32.xlu0 %v6719_v52, %s7650_s3 }
 0x5a3   :  { %v6721_v54 = vpop.eup %6720 }
 0x5a4   :  { %v6723_v57 = vpop.eup %6722  ;;  %972 = vrot.lane.b32.xlu1 %v6721_v54, %s7650_s3  ;;  %v1032_v54 = vld [vmem:[#allocation2 + $0x2] sm:$0x1] }
 0x5a5   :  { %970 = vrot.lane.b32.xlu0 %v6723_v57, %s7650_s3 }
 0x5a6   :  { %v6725_v56 = vpop.eup %6724 }
 0x5a9   :  { %974 = vrot.lane.b32.xlu0 %v6725_v56, %s7650_s3 }
 0x60a   :  { %v961_v59 = vpop.permute.xlu1 %960 }
 0x60b   :  { %v8072_v6 = vmul.f32 %v7985_v15, %v961_v59 }
 0x60e   :  { %v963_v2 = vpop.permute.xlu1 %962 }
 0x60f   :  { %v965_v48 = vpop.permute.xlu0 %964  ;;  %v8066_v60 = vmul.f32 %v7989_v40, %v963_v2 }
 0x610   :  { %v8069_v1 = vmul.f32 %v7991_v34, %v965_v48  ;;  %v1033_v48 = vld [vmem:[#allocation2 + $0xa] sm:$0x1] }
 0x611   :  { %v1040_v13 = vrot.slane %v8066_v60, 7 }
 0x612   :  { %v969_v21 = vpop.permute.xlu1 %968  ;;  %v1042_v22 = vrot.slane %v8069_v1, 6 }
 0x613   :  { %v1041_v26 = vsel %vm682_vm6, %v1040_v13, %v8072_v6  ;;  %v967_v28 = vpop.permute.xlu0 %966  ;;  %v8079_v32 = vmul.f32 %v7996_v42, %v969_v21  ;;  %v1034_v13 = vld [vmem:[#allocation2 + $0x12] sm:$0x1] }
 0x614   :  { %v8082_v40 = vmul.f32 %v7999_v44, %v967_v28  ;;  %v1043_v34 = vsel %vm685_vm7, %v1042_v22, %v1041_v26 }
 0x615   :  { %v1046_v15 = vrot.slane %v8079_v32, 4 }
 0x616   :  { %v1044_v29 = vrot.slane %v8082_v40, 5  ;;  %v973_v30 = vpop.permute.xlu1 %972 }
 0x617   :  { %v971_v33 = vpop.permute.xlu0 %970  ;;  %v8088_v43 = vmul.f32 %v8004_v47, %v973_v30 }
 0x618   :  { %v1045_v36 = vsel %vm688_vm8, %v1044_v29, %v1043_v34  ;;  %v8092_v39 = vmul.f32 %v8007_v53, %v971_v33  ;;  %v1036_v34 = vld [vmem:[#allocation2 + $0x22] sm:$0x1] }
 0x619   :  { %10048 = vst [vmem:[#allocation11_spill] sm:$0xff] %v8088_v43  ;;  %v1047_v42 = vsel %vm691_vm9, %v1046_v15, %v1045_v36  ;;  %v1050_v44 = vrot.slane %v8088_v43, 2  ;;  %v1035_v15 = vld [vmem:[#allocation2 + $0x1a] sm:$0x1]  ;;  %v2444_v43 = vld [vmem:[#allocation2 + $0x26] sm:$0x1] }
 0x61a   :  { %10049 = vst [vmem:[#allocation12_spill] sm:$0xff] %v8092_v39  ;;  %v1048_v63 = vrot.slane %v8092_v39, 3 }
 0x61b   :  { %v975_v45 = vpop.permute.xlu0 %974 }
 0x61c   :  { %v8098_v50 = vmul.f32 %v8013_v61, %v975_v45  ;;  %v1049_v5 = vsel %vm694_vm10, %v1048_v63, %v1047_v42  ;;  %v1037_v63 = vld [vmem:[#allocation2 + $0x2a] sm:$0x1] }
 0x61d   :  { %v1051_v47 = vsel %vm697_vm11, %v1050_v44, %v1049_v5  ;;  %v1038_v44 = vld [vmem:[#allocation2 + $0x32] sm:$0x1] }
 0x61e   :  { %10050 = vst [vmem:[#allocation13_spill] sm:$0xff] %v8098_v50  ;;  %v1052_v49 = vrot.slane %v8098_v50, 1 }
 0x620   :  { %v1053_v52 = vsel %vm700_vm12, %v1052_v49, %v1051_v47  ;;  %v1039_v49 = vld [vmem:[#allocation2 + $0x3a] sm:$0x1] }
 0x621   :  { %1054 = vrot.lane.b32.xlu1 %v1053_v52, %s7652_s6 }
 0x693   :  { %v1055_v53 = vpop.permute.xlu1 %1054 }
 0x694   :  { %6305 = vmatmul.mubr.msk.f32.vlgmr.msra.gmra.mrb[8].mxu1 %vm311_vm5, %v1055_v53 }
 0x695   :  { %6507 = vmatpush3.bf16.msra.mxu1 %v7763_v11  ;;  %6326 = vmatprep.mubr.msk.f32.mxu1 %vm7648_vm0, %v10011_v0 }
 0x696   :  { %6508 = vmatprep.subr.bf16.mxu1 %v10009_v7 }
 0x699   :  { %6510 = vmatpush3.bf16.msra.mxu1 %v7795_v18 }
 0x69a   :  { %6517 = vmatprep.subr.bf16.mxu1 %v10009_v7 }
 0x767   :  { %v1124_v61 = vpop.f32.mrb[8].mxu1 }
 0x768   :  { %v6306_v57 = vpop.f32.mrb[9].mxu1  ;;  %v1144_v56 = vadd.f32 %v1124_v61, %v1032_v54  ;;  %v1129_v59 = vrot.slane %v1124_v61, 1  ;;  %v1130_v2 = vrot.slane %v1124_v61, 2  ;;  %v1132_v21 = vrot.slane %v1124_v61, 4 }
 0x769   :  { %v1131_v26 = vrot.slane %v1124_v61, 3  ;;  %v1134_v29 = vrot.slane %v1124_v61, 6  ;;  %v1133_v36 = vrot.slane %v1124_v61, 5  ;;  %v1135_v5 = vrot.slane %v1124_v61, 7 }
 0x76a   :  { %6726 = vtanh.f32 %v1144_v56  ;;  %v1145_v22 = vadd.f32 %v1129_v59, %v1033_v48  ;;  %v1146_v28 = vadd.f32 %v1130_v2, %v1034_v13  ;;  %v1148_v30 = vadd.f32 %v1132_v21, %v1036_v34 }
 0x76b   :  { %v1147_v42 = vadd.f32 %v1131_v26, %v1035_v15  ;;  %v1150_v45 = vadd.f32 %v1134_v29, %v1038_v44  ;;  %v1149_v47 = vadd.f32 %v1133_v36, %v1037_v63  ;;  %v1151_v52 = vadd.f32 %v1135_v5, %v1039_v49 }
 0x76c   :  { %6728 = vtanh.f32 %v1145_v22  ;;  %v6011_v13 = vmul.f32 -1.442695, %v1144_v56  ;;  %v6012_v21 = vmul.f32 -1.442695, %v1145_v22  ;;  %v6013_v26 = vmul.f32 -1.442695, %v1146_v28 }
 0x76d   :  { %6730 = vtanh.f32 %v1146_v28  ;;  %v6015_v34 = vmul.f32 -1.442695, %v1148_v30  ;;  %v6014_v29 = vmul.f32 -1.442695, %v1147_v42  ;;  %v6016_v44 = vmul.f32 -1.442695, %v1149_v47 }
 0x76e   :  { %6732 = vtanh.f32 %v1148_v30  ;;  %v6018_v63 = vmul.f32 -1.442695, %v1151_v52 }
 0x76f   :  { %6734 = vtanh.f32 %v1147_v42 }
 0x770   :  { %6736 = vtanh.f32 %v1150_v45 }
 0x771   :  { %6738 = vtanh.f32 %v1149_v47 }
 0x772   :  { %6740 = vtanh.f32 %v1151_v52 }
 0x773   :  { %6742 = vpow2.f32 %v6011_v13 }
 0x774   :  { %v6727_v33 = vpop.eup %6726  ;;  %6744 = vpow2.f32 %v6012_v21 }
 0x775   :  { %1224 = vrot.lane.b32.xlu0 %v6727_v33, %s7650_s3  ;;  %6746 = vpow2.f32 %v6013_v26  ;;  %v6017_v33 = vmul.f32 -1.442695, %v1150_v45 }
 0x776   :  { %v6729_v53 = vpop.eup %6728  ;;  %6748 = vpow2.f32 %v6015_v34 }
 0x777   :  { %v6731_v54 = vpop.eup %6730  ;;  %6750 = vpow2.f32 %v6014_v29 }
 0x778   :  { %1228 = vrot.lane.b32.xlu1 %v6731_v54, %s7650_s3  ;;  %v6733_v57 = vpop.eup %6732  ;;  %6752 = vpow2.f32 %v6017_v33 }
 0x779   :  { %1226 = vrot.lane.b32.xlu0 %v6729_v53, %s7650_s3  ;;  %v6735_v59 = vpop.eup %6734 }
 0x77a   :  { %v6737_v61 = vpop.eup %6736 }
 0x77b   :  { %v6739_v2 = vpop.eup %6738 }
 0x77c   :  { %1230 = vrot.lane.b32.xlu1 %v6735_v59, %s7650_s3  ;;  %v6741_v48 = vpop.eup %6740 }
 0x77d   :  { %1232 = vrot.lane.b32.xlu0 %v6733_v57, %s7650_s3  ;;  %v6743_v15 = vpop.eup %6742 }
 0x77e   :  { %v1176_v36 = vadd.f32 1.0, %v6743_v15  ;;  %v6745_v5 = vpop.eup %6744 }
 0x77f   :  { %v6747_v49 = vpop.eup %6746  ;;  %v1177_v56 = vadd.f32 1.0, %v6745_v5 }
 0x780   :  { %1234 = vrot.lane.b32.xlu1 %v6739_v2, %s7650_s3  ;;  %6754 = vrcp.f32 %v1176_v36  ;;  %v6749_v22 = vpop.eup %6748  ;;  %v1178_v28 = vadd.f32 1.0, %v6747_v49 }
 0x781   :  { %1236 = vrot.lane.b32.xlu0 %v6737_v61, %s7650_s3  ;;  %6756 = vpow2.f32 %v6016_v44  ;;  %v6751_v53 = vpop.eup %6750  ;;  %v1180_v54 = vadd.f32 1.0, %v6749_v22 }
 0x782   :  { %6758 = vpow2.f32 %v6018_v63  ;;  %v6753_v30 = vpop.eup %6752  ;;  %v1179_v57 = vadd.f32 1.0, %v6751_v53 }
 0x783   :  { %6760 = vrcp.f32 %v1177_v56  ;;  %v1182_v52 = vadd.f32 1.0, %v6753_v30 }
 0x784   :  { %1238 = vrot.lane.b32.xlu1 %v6741_v48, %s7650_s3  ;;  %6762 = vrcp.f32 %v1178_v28 }
 0x785   :  { %6764 = vrcp.f32 %v1180_v54 }
 0x786   :  { %6766 = vrcp.f32 %v1179_v57 }
 0x787   :  { %6768 = vrcp.f32 %v1182_v52 }
 0x78a   :  { %v8120_v42 = vpop.eup %6754 }
 0x78b   :  { %v6757_v47 = vpop.eup %6756 }
 0x78c   :  { %v1181_v61 = vadd.f32 1.0, %v6757_v47  ;;  %v6759_v2 = vpop.eup %6758 }
 0x78d   :  { %v1183_v48 = vadd.f32 1.0, %v6759_v2  ;;  %v8124_v13 = vpop.eup %6760 }
 0x78e   :  { %6770 = vrcp.f32 %v1181_v61  ;;  %v8126_v26 = vpop.eup %6762  ;;  %v1209_v2 = vmul.f32 %v8124_v13, %v8026_v55 }
 0x78f   :  { %6772 = vrcp.f32 %v1183_v48  ;;  %v8131_v33 = vpop.eup %6764  ;;  %v1210_v48 = vmul.f32 %v8126_v26, %v8028_v27 }
 0x790   :  { %v8134_v44 = vpop.eup %6766 }
 0x791   :  { %v8139_v56 = vpop.eup %6768  ;;  %v1211_v55 = vmul.f32 %v8134_v44, %v8039_v35 }
 0x798   :  { %v8142_v28 = vpop.eup %6770 }
 0x7e7   :  { %v1225_v45 = vpop.permute.xlu0 %1224 }
 0x7e8   :  { %v1248_v59 = vmul.f32 %v8120_v42, %v1225_v45  ;;  %v8148_v45 = vpop.eup %6772 }
 0x7ea   :  { %1264 = vrot.lane.b32.xlu0 %v1248_v59, %s7652_s6  ;;  %v1229_v34 = vpop.permute.xlu1 %1228  ;;  %v1208_v59 = vmul.f32 %v8120_v42, %v8019_v3  ;;  %v1212_v3 = vmul.f32 %v8131_v33, %v8036_v38  ;;  %v1213_v38 = vmul.f32 %v8142_v28, %v8049_v62 }
 0x7eb   :  { %v1227_v21 = vpop.permute.xlu0 %1226  ;;  %v1250_v29 = vmul.f32 %v8126_v26, %v1229_v34 }
 0x7ec   :  { %v1249_v15 = vmul.f32 %v8124_v13, %v1227_v21 }
 0x7ed   :  { %1268 = vrot.lane.b32.xlu1 %v1250_v29, %s7652_s6 }
 0x7ee   :  { %1266 = vrot.lane.b32.xlu0 %v1249_v15, %s7652_s6  ;;  %v1231_v63 = vpop.permute.xlu1 %1230 }
 0x7ef   :  { %v1233_v36 = vpop.permute.xlu0 %1232  ;;  %v1251_v49 = vmul.f32 %v8134_v44, %v1231_v63 }
 0x7f0   :  { %v1252_v5 = vmul.f32 %v8131_v33, %v1233_v36 }
 0x7f1   :  { %1270 = vrot.lane.b32.xlu1 %v1251_v49, %s7652_s6 }
 0x7f2   :  { %1272 = vrot.lane.b32.xlu0 %v1252_v5, %s7652_s6  ;;  %v1235_v53 = vpop.permute.xlu1 %1234 }
 0x7f3   :  { %v1237_v22 = vpop.permute.xlu0 %1236  ;;  %v1253_v54 = vmul.f32 %v8142_v28, %v1235_v53 }
 0x7f4   :  { %v1254_v30 = vmul.f32 %v8139_v56, %v1237_v22  ;;  %v1214_v22 = vmul.f32 %v8139_v56, %v8047_v41 }
 0x7f5   :  { %1274 = vrot.lane.b32.xlu1 %v1253_v54, %s7652_s6 }
 0x7f6   :  { %1276 = vrot.lane.b32.xlu0 %v1254_v30, %s7652_s6  ;;  %v1239_v57 = vpop.permute.xlu1 %1238 }
 0x7f7   :  { %v1255_v47 = vmul.f32 %v8148_v45, %v1239_v57  ;;  %v1215_v57 = vmul.f32 %v8148_v45, %v8055_v46 }
 0x7f9   :  { %1278 = vrot.lane.b32.xlu1 %v1255_v47, %s7652_s6 }
 0x85c   :  { %v1265_v52 = vpop.permute.xlu0 %1264 }
 0x85d   :  { %v8154_v61 = vadd.f32 %v1265_v52, %v1208_v59 }
 0x85f   :  { %6774 = vtanh.f32 %v8154_v61  ;;  %v1269_v34 = vpop.permute.xlu1 %1268 }
 0x860   :  { %v1267_v21 = vpop.permute.xlu0 %1266  ;;  %v8163_v29 = vadd.f32 %v1269_v34, %v1210_v48 }
 0x861   :  { %v8161_v15 = vadd.f32 %v1267_v21, %v1209_v2 }
 0x863   :  { %6776 = vtanh.f32 %v8161_v15  ;;  %v1271_v5 = vpop.permute.xlu1 %1270 }
 0x864   :  { %6778 = vtanh.f32 %v8163_v29  ;;  %v1273_v63 = vpop.permute.xlu0 %1272  ;;  %v8174_v49 = vadd.f32 %v1271_v5, %v1211_v55 }
 0x865   :  { %v8171_v27 = vadd.f32 %v1273_v63, %v1212_v3 }
 0x867   :  { %6780 = vtanh.f32 %v8171_v27  ;;  %v1275_v35 = vpop.permute.xlu1 %1274 }
 0x868   :  { %6782 = vtanh.f32 %v8174_v49  ;;  %v1277_v53 = vpop.permute.xlu0 %1276  ;;  %v8184_v54 = vadd.f32 %v1275_v35, %v1213_v38 }
 0x869   :  { %v6775_v36 = vpop.eup %6774  ;;  %v8182_v30 = vadd.f32 %v1277_v53, %v1214_v22 }
 0x86a   :  { %1312 = vrot.lane.b32.xlu0 %v6775_v36, %s7650_s3 }
 0x86b   :  { %6784 = vtanh.f32 %v8182_v30  ;;  %v1279_v41 = vpop.permute.xlu1 %1278 }
 0x86c   :  { %6786 = vtanh.f32 %v8184_v54  ;;  %v8190_v52 = vadd.f32 %v1279_v41, %v1215_v57 }
 0x86d   :  { %v6777_v47 = vpop.eup %6776 }
 0x86e   :  { %v6779_v59 = vpop.eup %6778  ;;  %1314 = vrot.lane.b32.xlu0 %v6777_v47, %s7650_s3  ;;  %6788 = vtanh.f32 %v8190_v52 }
 0x86f   :  { %1316 = vrot.lane.b32.xlu1 %v6779_v59, %s7650_s3 }
 0x871   :  { %v6781_v62 = vpop.eup %6780 }
 0x872   :  { %v6783_v2 = vpop.eup %6782  ;;  %1320 = vrot.lane.b32.xlu0 %v6781_v62, %s7650_s3 }
 0x873   :  { %1318 = vrot.lane.b32.xlu1 %v6783_v2, %s7650_s3 }
 0x875   :  { %v6785_v48 = vpop.eup %6784 }
 0x876   :  { %v6787_v21 = vpop.eup %6786  ;;  %1324 = vrot.lane.b32.xlu0 %v6785_v48, %s7650_s3 }
 0x877   :  { %1322 = vrot.lane.b32.xlu1 %v6787_v21, %s7650_s3 }
 0x878   :  { %v6789_v46 = vpop.eup %6788 }
 0x87b   :  { %1326 = vrot.lane.b32.xlu1 %v6789_v46, %s7650_s3 }
 0x8dc   :  { %v1313_v34 = vpop.permute.xlu0 %1312 }
 0x8dd   :  { %v8207_v5 = vmul.f32 %v8120_v42, %v1313_v34 }
 0x8e0   :  { %v1315_v3 = vpop.permute.xlu0 %1314 }
 0x8e1   :  { %v1317_v36 = vpop.permute.xlu1 %1316  ;;  %v8201_v55 = vmul.f32 %v8124_v13, %v1315_v3 }
 0x8e2   :  { %v8204_v63 = vmul.f32 %v8126_v26, %v1317_v36 }
 0x8e3   :  { %v1392_v22 = vrot.slane %v8201_v55, 7 }
 0x8e4   :  { %v1321_v38 = vpop.permute.xlu0 %1320  ;;  %v1394_v53 = vrot.slane %v8204_v63, 6 }
 0x8e5   :  { %v1393_v35 = vsel %vm682_vm6, %v1392_v22, %v8207_v5  ;;  %v1319_v57 = vpop.permute.xlu1 %1318  ;;  %v8214_v47 = vmul.f32 %v8131_v33, %v1321_v38 }
 0x8e6   :  { %v8217_v13 = vmul.f32 %v8134_v44, %v1319_v57  ;;  %v1395_v26 = vsel %vm685_vm7, %v1394_v53, %v1393_v35  ;;  %v1384_v53 = vld [vmem:[#allocation2 + $0x3] sm:$0x1] }
 0x8e7   :  { %v1398_v42 = vrot.slane %v8214_v47, 4 }
 0x8e8   :  { %v1396_v41 = vrot.slane %v8217_v13, 5  ;;  %v1325_v59 = vpop.permute.xlu0 %1324 }
 0x8e9   :  { %v1323_v62 = vpop.permute.xlu1 %1322  ;;  %v8223_v2 = vmul.f32 %v8139_v56, %v1325_v59  ;;  %v1386_v59 = vld [vmem:[#allocation2 + $0x13] sm:$0x1] }
 0x8ea   :  { %v1397_v48 = vsel %vm688_vm8, %v1396_v41, %v1395_v26  ;;  %v8227_v21 = vmul.f32 %v8142_v28, %v1323_v62  ;;  %v1385_v41 = vld [vmem:[#allocation2 + $0xb] sm:$0x1] }
 0x8eb   :  { %10051 = vst [vmem:[#allocation14_spill] sm:$0xff] %v8223_v2  ;;  %v1399_v33 = vsel %vm691_vm9, %v1398_v42, %v1397_v48  ;;  %v1402_v44 = vrot.slane %v8223_v2, 2 }
 0x8ec   :  { %10052 = vst [vmem:[#allocation15_spill] sm:$0xff] %v8227_v21  ;;  %v1400_v46 = vrot.slane %v8227_v21, 3 }
 0x8ed   :  { %v1327_v34 = vpop.permute.xlu1 %1326 }
 0x8ee   :  { %v8233_v3 = vmul.f32 %v8148_v45, %v1327_v34  ;;  %v1401_v36 = vsel %vm694_vm10, %v1400_v46, %v1399_v33  ;;  %v1388_v46 = vld [vmem:[#allocation2 + $0x23] sm:$0x1]  ;;  %v1387_v34 = vld [vmem:[#allocation2 + $0x1b] sm:$0x1] }
 0x8ef   :  { %v1403_v56 = vsel %vm697_vm11, %v1402_v44, %v1401_v36 }
 0x8f0   :  { %10053 = vst [vmem:[#allocation16_spill] sm:$0xff] %v8233_v3  ;;  %v1404_v22 = vrot.slane %v8233_v3, 1 }
 0x8f2   :  { %v1405_v38 = vsel %vm700_vm12, %v1404_v22, %v1403_v56 }
 0x8f3   :  { %1406 = vrot.lane.b32.xlu0 %v1405_v38, %s7652_s6 }
 0x965   :  { %v1407_v28 = vpop.permute.xlu0 %1406 }
 0x966   :  { %6316 = vmatmul.mubr.msk.f32.vlgmr.msra.gmra.mrb[6].mxu0 %vm311_vm5, %v1407_v28 }
 0x967   :  { %6513 = vmatpush3.bf16.msra.mxu0 %v7763_v11  ;;  %6337 = vmatprep.mubr.msk.f32.mxu0 %vm7648_vm0, %v10011_v0 }
 0x968   :  { %6514 = vmatprep.subr.bf16.mxu0 %v10009_v7 }
 0x96b   :  { %6516 = vmatpush3.bf16.msra.mxu0 %v7795_v18 }
 0x96c   :  { %6523 = vmatprep.subr.bf16.mxu0 %v10009_v7 }
 0xa39   :  { %v1476_v45 = vpop.f32.mrb[6].mxu0 }
 0xa3a   :  { %v6317_v35 = vpop.f32.mrb[7].mxu0  ;;  %v1496_v57 = vadd.f32 %v1476_v45, %v1384_v53  ;;  %v1481_v26 = vrot.slane %v1476_v45, 1  ;;  %v1482_v42 = vrot.slane %v1476_v45, 2  ;;  %v1484_v62 = vrot.slane %v1476_v45, 4  ;;  %v1390_v53 = vld [vmem:[#allocation2 + $0x33] sm:$0x1] }
 0xa3b   :  { %v1483_v33 = vrot.slane %v1476_v45, 3  ;;  %v1486_v36 = vrot.slane %v1476_v45, 6  ;;  %v1485_v38 = vrot.slane %v1476_v45, 5  ;;  %v1389_v35 = vld [vmem:[#allocation2 + $0x2b] sm:$0x1]  ;;  %v1487_v17 = vrot.slane %v1476_v45, 7 }
 0xa3c   :  { %6790 = vtanh.f32 %v1496_v57  ;;  %v1497_v48 = vadd.f32 %v1481_v26, %v1385_v41  ;;  %v1498_v44 = vadd.f32 %v1482_v42, %v1386_v59  ;;  %v1500_v56 = vadd.f32 %v1484_v62, %v1388_v46  ;;  %v1391_v26 = vld [vmem:[#allocation2 + $0x3b] sm:$0x1] }
 0xa3d   :  { %v1499_v28 = vadd.f32 %v1483_v33, %v1387_v34  ;;  %v1502_v20 = vadd.f32 %v1486_v36, %v1390_v53  ;;  %v1501_v19 = vadd.f32 %v1485_v38, %v1389_v35  ;;  %v1503_v42 = vadd.f32 %v1487_v17, %v1391_v26 }
 0xa3e   :  { %6792 = vtanh.f32 %v1497_v48  ;;  %v6020_v34 = vmul.f32 -1.442695, %v1496_v57  ;;  %v6021_v36 = vmul.f32 -1.442695, %v1497_v48  ;;  %v6024_v38 = vmul.f32 -1.442695, %v1500_v56 }
 0xa3f   :  { %6794 = vtanh.f32 %v1498_v44  ;;  %v6023_v35 = vmul.f32 -1.442695, %v1499_v28  ;;  %v6026_v26 = vmul.f32 -1.442695, %v1502_v20 }
 0xa40   :  { %6796 = vtanh.f32 %v1500_v56 }
 0xa41   :  { %6798 = vtanh.f32 %v1499_v28 }
 0xa42   :  { %6800 = vtanh.f32 %v1502_v20 }
 0xa43   :  { %6802 = vtanh.f32 %v1501_v19 }
 0xa44   :  { %6804 = vtanh.f32 %v1503_v42 }
 0xa45   :  { %6806 = vpow2.f32 %v6020_v34 }
 0xa46   :  { %v6791_v22 = vpop.eup %6790  ;;  %6808 = vpow2.f32 %v6021_v36 }
 0xa47   :  { %1576 = vrot.lane.b32.xlu1 %v6791_v22, %s7650_s3  ;;  %v6022_v22 = vmul.f32 -1.442695, %v1498_v44 }
 0xa48   :  { %v6793_v41 = vpop.eup %6792 }
 0xa49   :  { %v6795_v59 = vpop.eup %6794  ;;  %6810 = vpow2.f32 %v6022_v22 }
 0xa4a   :  { %1580 = vrot.lane.b32.xlu0 %v6795_v59, %s7650_s3  ;;  %v6797_v62 = vpop.eup %6796  ;;  %6812 = vpow2.f32 %v6024_v38  ;;  %v6025_v59 = vmul.f32 -1.442695, %v1501_v19 }
 0xa4b   :  { %1578 = vrot.lane.b32.xlu1 %v6793_v41, %s7650_s3  ;;  %v6799_v33 = vpop.eup %6798  ;;  %6814 = vpow2.f32 %v6023_v35 }
 0xa4c   :  { %v6801_v45 = vpop.eup %6800  ;;  %6816 = vpow2.f32 %v6026_v26 }
 0xa4d   :  { %v6803_v46 = vpop.eup %6802 }
 0xa4e   :  { %1582 = vrot.lane.b32.xlu0 %v6799_v33, %s7650_s3  ;;  %v6805_v17 = vpop.eup %6804 }
 0xa4f   :  { %1584 = vrot.lane.b32.xlu1 %v6797_v62, %s7650_s3  ;;  %v6807_v53 = vpop.eup %6806  ;;  %v6027_v62 = vmul.f32 -1.442695, %v1503_v42 }
 0xa50   :  { %v1528_v41 = vadd.f32 1.0, %v6807_v53  ;;  %v6809_v33 = vpop.eup %6808 }
 0xa51   :  { %v1529_v57 = vadd.f32 1.0, %v6809_v33 }
 0xa52   :  { %1586 = vrot.lane.b32.xlu0 %v6803_v46, %s7650_s3  ;;  %6818 = vrcp.f32 %v1528_v41 }
 0xa53   :  { %1588 = vrot.lane.b32.xlu1 %v6801_v45, %s7650_s3  ;;  %6820 = vpow2.f32 %v6025_v59  ;;  %v6811_v45 = vpop.eup %6810 }
 0xa54   :  { %6822 = vpow2.f32 %v6027_v62  ;;  %v6813_v48 = vpop.eup %6812  ;;  %v1530_v44 = vadd.f32 1.0, %v6811_v45 }
 0xa55   :  { %v6815_v46 = vpop.eup %6814  ;;  %6824 = vrcp.f32 %v1529_v57 }
 0xa56   :  { %1590 = vrot.lane.b32.xlu0 %v6805_v17, %s7650_s3  ;;  %v6817_v56 = vpop.eup %6816  ;;  %v1532_v17 = vadd.f32 1.0, %v6813_v48  ;;  %6826 = vrcp.f32 %v1530_v44  ;;  %v1531_v34 = vadd.f32 1.0, %v6815_v46 }
 0xa57   :  { %v1534_v42 = vadd.f32 1.0, %v6817_v56 }
 0xa58   :  { %6828 = vrcp.f32 %v1532_v17 }
 0xa59   :  { %6830 = vrcp.f32 %v1531_v34 }
 0xa5a   :  { %6832 = vrcp.f32 %v1534_v42 }
 0xa5c   :  { %v8255_v28 = vpop.eup %6818 }
 0xa5d   :  { %v6821_v19 = vpop.eup %6820 }
 0xa5e   :  { %v1533_v22 = vadd.f32 1.0, %v6821_v19  ;;  %v6823_v38 = vpop.eup %6822 }
 0xa5f   :  { %v1535_v53 = vadd.f32 1.0, %v6823_v38  ;;  %v8259_v35 = vpop.eup %6824 }
 0xa60   :  { %6834 = vrcp.f32 %v1533_v22  ;;  %v8261_v41 = vpop.eup %6826 }
 0xa61   :  { %6836 = vrcp.f32 %v1535_v53 }
 0xa62   :  { %v8266_v45 = vpop.eup %6828 }
 0xa63   :  { %v8269_v48 = vpop.eup %6830 }
 0xa64   :  { %v8274_v17 = vpop.eup %6832 }
 0xa6a   :  { %v8277_v34 = vpop.eup %6834 }
 0xa6b   :  { %v8283_v22 = vpop.eup %6836 }
 0xab9   :  { %v1577_v20 = vpop.permute.xlu1 %1576 }
 0xaba   :  { %v1600_v36 = vmul.f32 %v8255_v28, %v1577_v20 }
 0xabc   :  { %1616 = vrot.lane.b32.xlu1 %v1600_v36, %s7652_s6  ;;  %v1581_v59 = vpop.permute.xlu0 %1580 }
 0xabd   :  { %v1579_v26 = vpop.permute.xlu1 %1578  ;;  %v1602_v33 = vmul.f32 %v8261_v41, %v1581_v59 }
 0xabe   :  { %v1601_v62 = vmul.f32 %v8259_v35, %v1579_v26  ;;  %v1560_v26 = vmul.f32 %v8255_v28, %v8154_v61  ;;  %v1564_v61 = vmul.f32 %v8266_v45, %v8171_v27  ;;  %v1565_v27 = vmul.f32 %v8277_v34, %v8184_v54 }
 0xabf   :  { %1620 = vrot.lane.b32.xlu0 %v1602_v33, %s7652_s6  ;;  %v1561_v33 = vmul.f32 %v8259_v35, %v8161_v15  ;;  %v1563_v15 = vmul.f32 %v8269_v48, %v8174_v49 }
 0xac0   :  { %1618 = vrot.lane.b32.xlu1 %v1601_v62, %s7652_s6  ;;  %v1583_v44 = vpop.permute.xlu0 %1582 }
 0xac1   :  { %v1585_v57 = vpop.permute.xlu1 %1584  ;;  %v1603_v56 = vmul.f32 %v8269_v48, %v1583_v44 }
 0xac2   :  { %v1604_v46 = vmul.f32 %v8266_v45, %v1585_v57  ;;  %v1562_v57 = vmul.f32 %v8261_v41, %v8163_v29 }
 0xac3   :  { %1622 = vrot.lane.b32.xlu0 %v1603_v56, %s7652_s6 }
 0xac4   :  { %1624 = vrot.lane.b32.xlu1 %v1604_v46, %s7652_s6  ;;  %v1587_v19 = vpop.permute.xlu0 %1586 }
 0xac5   :  { %v1589_v20 = vpop.permute.xlu1 %1588  ;;  %v1605_v42 = vmul.f32 %v8277_v34, %v1587_v19 }
 0xac6   :  { %v1606_v36 = vmul.f32 %v8274_v17, %v1589_v20 }
 0xac7   :  { %1626 = vrot.lane.b32.xlu0 %v1605_v42, %s7652_s6 }
 0xac8   :  { %1628 = vrot.lane.b32.xlu1 %v1606_v36, %s7652_s6  ;;  %v1591_v38 = vpop.permute.xlu0 %1590 }
 0xac9   :  { %v1607_v53 = vmul.f32 %v8283_v22, %v1591_v38 }
 0xacb   :  { %1630 = vrot.lane.b32.xlu0 %v1607_v53, %s7652_s6  ;;  %v1566_v53 = vmul.f32 %v8274_v17, %v8182_v30 }
 0xb2e   :  { %v1617_v59 = vpop.permute.xlu1 %1616 }
 0xb2f   :  { %v8289_v62 = vadd.f32 %v1617_v59, %v1560_v26 }
 0xb31   :  { %6838 = vtanh.f32 %v8289_v62  ;;  %v1621_v46 = vpop.permute.xlu0 %1620 }
 0xb32   :  { %v1619_v44 = vpop.permute.xlu1 %1618  ;;  %v8298_v20 = vadd.f32 %v1621_v46, %v1562_v57  ;;  %v1567_v57 = vmul.f32 %v8283_v22, %v8190_v52 }
 0xb33   :  { %v8296_v56 = vadd.f32 %v1619_v44, %v1561_v33 }
 0xb35   :  { %6840 = vtanh.f32 %v8296_v56  ;;  %v1623_v42 = vpop.permute.xlu0 %1622 }
 0xb36   :  { %6842 = vtanh.f32 %v8298_v20  ;;  %v1625_v36 = vpop.permute.xlu1 %1624  ;;  %v8309_v38 = vadd.f32 %v1623_v42, %v1563_v15 }
 0xb37   :  { %v8306_v29 = vadd.f32 %v1625_v36, %v1564_v61 }
 0xb39   :  { %6844 = vtanh.f32 %v8306_v29  ;;  %v1627_v49 = vpop.permute.xlu0 %1626 }
 0xb3a   :  { %6846 = vtanh.f32 %v8309_v38  ;;  %v1629_v26 = vpop.permute.xlu1 %1628  ;;  %v8319_v33 = vadd.f32 %v1627_v49, %v1565_v27 }
 0xb3b   :  { %v6839_v19 = vpop.eup %6838  ;;  %v8317_v59 = vadd.f32 %v1629_v26, %v1566_v53 }
 0xb3c   :  { %1664 = vrot.lane.b32.xlu1 %v6839_v19, %s7650_s3 }
 0xb3d   :  { %6848 = vtanh.f32 %v8317_v59  ;;  %v1631_v30 = vpop.permute.xlu0 %1630 }
 0xb3e   :  { %6850 = vtanh.f32 %v8319_v33  ;;  %v8325_v61 = vadd.f32 %v1631_v30, %v1567_v57 }
 0xb3f   :  { %v6841_v44 = vpop.eup %6840 }
 0xb40   :  { %v6843_v46 = vpop.eup %6842  ;;  %1666 = vrot.lane.b32.xlu1 %v6841_v44, %s7650_s3  ;;  %6852 = vtanh.f32 %v8325_v61 }
 0xb41   :  { %1668 = vrot.lane.b32.xlu0 %v6843_v46, %s7650_s3 }
 0xb43   :  { %v6845_v54 = vpop.eup %6844 }
 0xb44   :  { %v6847_v19 = vpop.eup %6846  ;;  %1672 = vrot.lane.b32.xlu1 %v6845_v54, %s7650_s3 }
 0xb45   :  { %1670 = vrot.lane.b32.xlu0 %v6847_v19, %s7650_s3 }
 0xb47   :  { %v6849_v15 = vpop.eup %6848 }
 0xb48   :  { %v6851_v36 = vpop.eup %6850  ;;  %1676 = vrot.lane.b32.xlu1 %v6849_v15, %s7650_s3 }
 0xb49   :  { %1674 = vrot.lane.b32.xlu0 %v6851_v36, %s7650_s3 }
 0xb4a   :  { %v6853_v52 = vpop.eup %6852 }
 0xb4d   :  { %1678 = vrot.lane.b32.xlu0 %v6853_v52, %s7650_s3 }
 0xbae   :  { %v1665_v42 = vpop.permute.xlu1 %1664 }
 0xbaf   :  { %v8342_v57 = vmul.f32 %v8255_v28, %v1665_v42 }
 0xbb2   :  { %v1667_v53 = vpop.permute.xlu1 %1666 }
 0xbb3   :  { %v1669_v27 = vpop.permute.xlu0 %1668  ;;  %v8336_v26 = vmul.f32 %v8259_v35, %v1667_v53 }
 0xbb4   :  { %v8339_v49 = vmul.f32 %v8261_v41, %v1669_v27 }
 0xbb5   :  { %v1744_v44 = vrot.slane %v8336_v26, 7 }
 0xbb6   :  { %v1673_v30 = vpop.permute.xlu1 %1672  ;;  %v1746_v46 = vrot.slane %v8339_v49, 6 }
 0xbb7   :  { %v1745_v54 = vsel %vm682_vm6, %v1744_v44, %v8342_v57  ;;  %v1671_v19 = vpop.permute.xlu0 %1670  ;;  %v8349_v15 = vmul.f32 %v8266_v45, %v1673_v30 }
 0xbb8   :  { %v8352_v35 = vmul.f32 %v8269_v48, %v1671_v19  ;;  %v1747_v41 = vsel %vm685_vm7, %v1746_v46, %v1745_v54 }
 0xbb9   :  { %v1750_v28 = vrot.slane %v8349_v15, 4 }
 0xbba   :  { %v1748_v36 = vrot.slane %v8352_v35, 5  ;;  %v1677_v52 = vpop.permute.xlu1 %1676 }
 0xbbb   :  { %v1675_v42 = vpop.permute.xlu0 %1674  ;;  %v8358_v53 = vmul.f32 %v8274_v17, %v1677_v52 }
 0xbbc   :  { %v1749_v27 = vsel %vm688_vm8, %v1748_v36, %v1747_v41  ;;  %v8362_v44 = vmul.f32 %v8277_v34, %v1675_v42 }
 0xbbd   :  { %10054 = vst [vmem:[#allocation17_spill] sm:$0xff] %v8358_v53  ;;  %v1751_v45 = vsel %vm691_vm9, %v1750_v28, %v1749_v27  ;;  %v1754_v48 = vrot.slane %v8358_v53, 2  ;;  %v1736_v28 = vld [vmem:[#allocation2 + $0x4] sm:$0x1] }
 0xbbe   :  { %10055 = vst [vmem:[#allocation18_spill] sm:$0xff] %v8362_v44  ;;  %v1752_v30 = vrot.slane %v8362_v44, 3 }
 0xbbf   :  { %v1679_v46 = vpop.permute.xlu0 %1678 }
 0xbc0   :  { %v8368_v54 = vmul.f32 %v8283_v22, %v1679_v46  ;;  %v1753_v19 = vsel %vm694_vm10, %v1752_v30, %v1751_v45  ;;  %v1738_v30 = vld [vmem:[#allocation2 + $0x14] sm:$0x1] }
 0xbc1   :  { %v1755_v17 = vsel %vm697_vm11, %v1754_v48, %v1753_v19  ;;  %v1737_v48 = vld [vmem:[#allocation2 + $0xc] sm:$0x1] }
 0xbc2   :  { %10056 = vst [vmem:[#allocation19_spill] sm:$0xff] %v8368_v54  ;;  %v1756_v52 = vrot.slane %v8368_v54, 1 }
 0xbc4   :  { %v1757_v41 = vsel %vm700_vm12, %v1756_v52, %v1755_v17 }
 0xbc5   :  { %1758 = vrot.lane.b32.xlu1 %v1757_v41, %s7652_s6  ;;  %v1740_v41 = vld [vmem:[#allocation2 + $0x24] sm:$0x1] }
 0xc37   :  { %v1759_v34 = vpop.permute.xlu1 %1758 }
 0xc38   :  { %6327 = vmatmul.mubr.msk.f32.vlgmr.msra.gmra.mrb[10].mxu1 %vm311_vm5, %v1759_v34  ;;  %v1739_v34 = vld [vmem:[#allocation2 + $0x1c] sm:$0x1] }
 0xc39   :  { %6519 = vmatpush3.bf16.msra.mxu1 %v7763_v11  ;;  %6348 = vmatprep.mubr.msk.f32.mxu1 %vm7648_vm0, %v10011_v0 }
 0xc3a   :  { %6520 = vmatprep.subr.bf16.mxu1 %v10009_v7 }
 0xc3d   :  { %6522 = vmatpush3.bf16.msra.mxu1 %v7795_v18 }
 0xd0b   :  { %v1828_v22 = vpop.f32.mrb[10].mxu1 }
 0xd0c   :  { %v6328_v36 = vpop.f32.mrb[11].mxu1  ;;  %v1848_v42 = vadd.f32 %v1828_v22, %v1736_v28  ;;  %v1833_v27 = vrot.slane %v1828_v22, 1  ;;  %v1834_v45 = vrot.slane %v1828_v22, 2  ;;  %v1836_v46 = vrot.slane %v1828_v22, 4  ;;  %v1742_v28 = vld [vmem:[#allocation2 + $0x34] sm:$0x1] }
 0xd0d   :  { %v1835_v17 = vrot.slane %v1828_v22, 3  ;;  %v1838_v14 = vrot.slane %v1828_v22, 6  ;;  %v1837_v9 = vrot.slane %v1828_v22, 5  ;;  %v1741_v36 = vld [vmem:[#allocation2 + $0x2c] sm:$0x1]  ;;  %v1839_v25 = vrot.slane %v1828_v22, 7 }
 0xd0e   :  { %6854 = vtanh.f32 %v1848_v42  ;;  %v1849_v19 = vadd.f32 %v1833_v27, %v1737_v48  ;;  %v1850_v52 = vadd.f32 %v1834_v45, %v1738_v30  ;;  %v1852_v12 = vadd.f32 %v1836_v46, %v1740_v41  ;;  %v1743_v27 = vld [vmem:[#allocation2 + $0x3c] sm:$0x1] }
 0xd0f   :  { %v1851_v7 = vadd.f32 %v1835_v17, %v1739_v34  ;;  %v1854_v0 = vadd.f32 %v1838_v14, %v1742_v28  ;;  %v1853_v3 = vadd.f32 %v1837_v9, %v1741_v36  ;;  %v1855_v45 = vadd.f32 %v1839_v25, %v1743_v27 }
 0xd10   :  { %6856 = vtanh.f32 %v1849_v19  ;;  %v6029_v22 = vmul.f32 -1.442695, %v1848_v42  ;;  %v6030_v17 = vmul.f32 -1.442695, %v1849_v19  ;;  %v6031_v41 = vmul.f32 -1.442695, %v1850_v52 }
 0xd11   :  { %6858 = vtanh.f32 %v1850_v52  ;;  %v6033_v34 = vmul.f32 -1.442695, %v1852_v12  ;;  %v6032_v36 = vmul.f32 -1.442695, %v1851_v7  ;;  %v6035_v27 = vmul.f32 -1.442695, %v1854_v0 }
 0xd12   :  { %6860 = vtanh.f32 %v1852_v12 }
 0xd13   :  { %6862 = vtanh.f32 %v1851_v7 }
 0xd14   :  { %6864 = vtanh.f32 %v1854_v0 }
 0xd15   :  { %6866 = vtanh.f32 %v1853_v3 }
 0xd16   :  { %6868 = vtanh.f32 %v1855_v45 }
 0xd17   :  { %6870 = vpow2.f32 %v6029_v22 }
 0xd18   :  { %v6855_v16 = vpop.eup %6854  ;;  %6872 = vpow2.f32 %v6030_v17 }
 0xd19   :  { %1928 = vrot.lane.b32.xlu0 %v6855_v16, %s7650_s3  ;;  %6874 = vpow2.f32 %v6031_v41 }
 0xd1a   :  { %v6857_v48 = vpop.eup %6856  ;;  %6876 = vpow2.f32 %v6033_v34 }
 0xd1b   :  { %v6859_v30 = vpop.eup %6858  ;;  %6878 = vpow2.f32 %v6032_v36 }
 0xd1c   :  { %1932 = vrot.lane.b32.xlu1 %v6859_v30, %s7650_s3  ;;  %v6861_v46 = vpop.eup %6860  ;;  %v6034_v30 = vmul.f32 -1.442695, %v1853_v3  ;;  %6880 = vpow2.f32 %v6035_v27 }
 0xd1d   :  { %1930 = vrot.lane.b32.xlu0 %v6857_v48, %s7650_s3  ;;  %v6863_v16 = vpop.eup %6862 }
 0xd1e   :  { %v6865_v14 = vpop.eup %6864 }
 0xd1f   :  { %v6867_v9 = vpop.eup %6866 }
 0xd20   :  { %1934 = vrot.lane.b32.xlu1 %v6863_v16, %s7650_s3  ;;  %v6869_v25 = vpop.eup %6868 }
 0xd21   :  { %1936 = vrot.lane.b32.xlu0 %v6861_v46, %s7650_s3  ;;  %v6871_v28 = vpop.eup %6870  ;;  %v6036_v46 = vmul.f32 -1.442695, %v1855_v45 }
 0xd22   :  { %v1880_v48 = vadd.f32 1.0, %v6871_v28  ;;  %v6873_v16 = vpop.eup %6872 }
 0xd23   :  { %v1881_v42 = vadd.f32 1.0, %v6873_v16 }
 0xd24   :  { %1938 = vrot.lane.b32.xlu1 %v6867_v9, %s7650_s3  ;;  %6882 = vrcp.f32 %v1880_v48 }
 0xd25   :  { %1940 = vrot.lane.b32.xlu0 %v6865_v14, %s7650_s3  ;;  %6884 = vpow2.f32 %v6034_v30  ;;  %v6875_v14 = vpop.eup %6874 }
 0xd26   :  { %6886 = vpow2.f32 %v6036_v46  ;;  %v6877_v19 = vpop.eup %6876  ;;  %v1882_v52 = vadd.f32 1.0, %v6875_v14 }
 0xd27   :  { %v6879_v9 = vpop.eup %6878  ;;  %6888 = vrcp.f32 %v1881_v42 }
 0xd28   :  { %1942 = vrot.lane.b32.xlu1 %v6869_v25, %s7650_s3  ;;  %v6881_v12 = vpop.eup %6880  ;;  %v1884_v25 = vadd.f32 1.0, %v6877_v19  ;;  %6890 = vrcp.f32 %v1882_v52  ;;  %v1883_v22 = vadd.f32 1.0, %v6879_v9 }
 0xd29   :  { %v1886_v45 = vadd.f32 1.0, %v6881_v12 }
 0xd2a   :  { %6892 = vrcp.f32 %v1884_v25 }
 0xd2b   :  { %6894 = vrcp.f32 %v1883_v22 }
 0xd2c   :  { %6896 = vrcp.f32 %v1886_v45 }
 0xd2e   :  { %v8389_v7 = vpop.eup %6882 }
 0xd2f   :  { %v6885_v3 = vpop.eup %6884 }
 0xd30   :  { %v1885_v41 = vadd.f32 1.0, %v6885_v3  ;;  %v6887_v34 = vpop.eup %6886 }
 0xd31   :  { %v1887_v28 = vadd.f32 1.0, %v6887_v34  ;;  %v8393_v36 = vpop.eup %6888 }
 0xd32   :  { %6898 = vrcp.f32 %v1885_v41  ;;  %v8395_v48 = vpop.eup %6890 }
 0xd33   :  { %6900 = vrcp.f32 %v1887_v28 }
 0xd34   :  { %v8400_v14 = vpop.eup %6892 }
 0xd35   :  { %v8403_v19 = vpop.eup %6894 }
 0xd36   :  { %v8408_v25 = vpop.eup %6896 }
 0xd3c   :  { %v8411_v22 = vpop.eup %6898 }
 0xd3d   :  { %v8417_v41 = vpop.eup %6900 }
 0xd8b   :  { %v1929_v0 = vpop.permute.xlu0 %1928 }
 0xd8c   :  { %v1952_v17 = vmul.f32 %v8389_v7, %v1929_v0 }
 0xd8e   :  { %1968 = vrot.lane.b32.xlu0 %v1952_v17, %s7652_s6  ;;  %v1933_v30 = vpop.permute.xlu1 %1932 }
 0xd8f   :  { %v1931_v27 = vpop.permute.xlu0 %1930  ;;  %v1954_v16 = vmul.f32 %v8395_v48, %v1933_v30 }
 0xd90   :  { %v1953_v46 = vmul.f32 %v8393_v36, %v1931_v27  ;;  %v1912_v27 = vmul.f32 %v8389_v7, %v8289_v62  ;;  %v1916_v62 = vmul.f32 %v8400_v14, %v8306_v29  ;;  %v1917_v29 = vmul.f32 %v8411_v22, %v8319_v33 }
 0xd91   :  { %1972 = vrot.lane.b32.xlu1 %v1954_v16, %s7652_s6  ;;  %v1913_v16 = vmul.f32 %v8393_v36, %v8296_v56  ;;  %v1915_v56 = vmul.f32 %v8403_v19, %v8309_v38 }
 0xd92   :  { %1970 = vrot.lane.b32.xlu0 %v1953_v46, %s7652_s6  ;;  %v1935_v52 = vpop.permute.xlu1 %1934 }
 0xd93   :  { %v1937_v42 = vpop.permute.xlu0 %1936  ;;  %v1955_v12 = vmul.f32 %v8403_v19, %v1935_v52 }
 0xd94   :  { %v1956_v9 = vmul.f32 %v8400_v14, %v1937_v42  ;;  %v1914_v42 = vmul.f32 %v8395_v48, %v8298_v20 }
 0xd95   :  { %1974 = vrot.lane.b32.xlu1 %v1955_v12, %s7652_s6 }
 0xd96   :  { %1976 = vrot.lane.b32.xlu0 %v1956_v9, %s7652_s6  ;;  %v1939_v3 = vpop.permute.xlu1 %1938 }
 0xd97   :  { %v1941_v0 = vpop.permute.xlu0 %1940  ;;  %v1957_v45 = vmul.f32 %v8411_v22, %v1939_v3 }
 0xd98   :  { %v1958_v17 = vmul.f32 %v8408_v25, %v1941_v0 }
 0xd99   :  { %1978 = vrot.lane.b32.xlu1 %v1957_v45, %s7652_s6 }
 0xd9a   :  { %1980 = vrot.lane.b32.xlu0 %v1958_v17, %s7652_s6  ;;  %v1943_v34 = vpop.permute.xlu1 %1942 }
 0xd9b   :  { %v1959_v28 = vmul.f32 %v8417_v41, %v1943_v34 }
 0xd9d   :  { %1982 = vrot.lane.b32.xlu1 %v1959_v28, %s7652_s6  ;;  %v1918_v28 = vmul.f32 %v8408_v25, %v8317_v59 }
 0xe00   :  { %v1969_v30 = vpop.permute.xlu0 %1968 }
 0xe01   :  { %v8423_v46 = vadd.f32 %v1969_v30, %v1912_v27 }
 0xe03   :  { %6902 = vtanh.f32 %v8423_v46  ;;  %v1973_v9 = vpop.permute.xlu1 %1972 }
 0xe04   :  { %v1971_v52 = vpop.permute.xlu0 %1970  ;;  %v8432_v0 = vadd.f32 %v1973_v9, %v1914_v42  ;;  %v1919_v42 = vmul.f32 %v8417_v41, %v8325_v61 }
 0xe05   :  { %v8430_v12 = vadd.f32 %v1971_v52, %v1913_v16 }
 0xe07   :  { %6904 = vtanh.f32 %v8430_v12  ;;  %v1975_v45 = vpop.permute.xlu1 %1974 }
 0xe08   :  { %6906 = vtanh.f32 %v8432_v0  ;;  %v1977_v17 = vpop.permute.xlu0 %1976  ;;  %v8443_v34 = vadd.f32 %v1975_v45, %v1915_v56 }
 0xe09   :  { %v8440_v20 = vadd.f32 %v1977_v17, %v1916_v62 }
 0xe0b   :  { %6908 = vtanh.f32 %v8440_v20  ;;  %v1979_v38 = vpop.permute.xlu1 %1978 }
 0xe0c   :  { %6910 = vtanh.f32 %v8443_v34  ;;  %v1981_v27 = vpop.permute.xlu0 %1980  ;;  %v8453_v16 = vadd.f32 %v1979_v38, %v1917_v29 }
 0xe0d   :  { %v6903_v3 = vpop.eup %6902  ;;  %v8451_v30 = vadd.f32 %v1981_v27, %v1918_v28 }
 0xe0e   :  { %2016 = vrot.lane.b32.xlu0 %v6903_v3, %s7650_s3 }
 0xe0f   :  { %6912 = vtanh.f32 %v8451_v30  ;;  %v1983_v59 = vpop.permute.xlu1 %1982 }
 0xe10   :  { %6914 = vtanh.f32 %v8453_v16  ;;  %v8459_v62 = vadd.f32 %v1983_v59, %v1919_v42 }
 0xe11   :  { %v6905_v52 = vpop.eup %6904 }
 0xe12   :  { %v6907_v9 = vpop.eup %6906  ;;  %2018 = vrot.lane.b32.xlu0 %v6905_v52, %s7650_s3  ;;  %6916 = vtanh.f32 %v8459_v62 }
 0xe13   :  { %2020 = vrot.lane.b32.xlu1 %v6907_v9, %s7650_s3 }
 0xe15   :  { %v6909_v33 = vpop.eup %6908 }
 0xe16   :  { %v6911_v3 = vpop.eup %6910  ;;  %2024 = vrot.lane.b32.xlu0 %v6909_v33, %s7650_s3 }
 0xe17   :  { %2022 = vrot.lane.b32.xlu1 %v6911_v3, %s7650_s3 }
 0xe19   :  { %v6913_v56 = vpop.eup %6912 }
 0xe1a   :  { %v6915_v17 = vpop.eup %6914  ;;  %2028 = vrot.lane.b32.xlu0 %v6913_v56, %s7650_s3 }
 0xe1b   :  { %2026 = vrot.lane.b32.xlu1 %v6915_v17, %s7650_s3 }
 0xe1c   :  { %v6917_v61 = vpop.eup %6916 }
 0xe1f   :  { %2030 = vrot.lane.b32.xlu1 %v6917_v61, %s7650_s3 }
 0xe80   :  { %v2017_v45 = vpop.permute.xlu0 %2016 }
 0xe81   :  { %v8476_v42 = vmul.f32 %v8389_v7, %v2017_v45 }
 0xe84   :  { %v2019_v28 = vpop.permute.xlu0 %2018 }
 0xe85   :  { %v2021_v29 = vpop.permute.xlu1 %2020  ;;  %v8470_v27 = vmul.f32 %v8393_v36, %v2019_v28 }
 0xe86   :  { %v8473_v38 = vmul.f32 %v8395_v48, %v2021_v29 }
 0xe87   :  { %v2096_v52 = vrot.slane %v8470_v27, 7 }
 0xe88   :  { %v2025_v59 = vpop.permute.xlu0 %2024  ;;  %v2098_v9 = vrot.slane %v8473_v38, 6 }
 0xe89   :  { %v2097_v33 = vsel %vm682_vm6, %v2096_v52, %v8476_v42  ;;  %v2023_v3 = vpop.permute.xlu1 %2022  ;;  %v8483_v56 = vmul.f32 %v8400_v14, %v2025_v59 }
 0xe8a   :  { %v8486_v36 = vmul.f32 %v8403_v19, %v2023_v3  ;;  %v2099_v48 = vsel %vm685_vm7, %v2098_v9, %v2097_v33 }
 0xe8b   :  { %v2102_v7 = vrot.slane %v8483_v56, 4 }
 0xe8c   :  { %v2100_v17 = vrot.slane %v8486_v36, 5  ;;  %v2029_v61 = vpop.permute.xlu0 %2028 }
 0xe8d   :  { %v2027_v45 = vpop.permute.xlu1 %2026  ;;  %v8492_v28 = vmul.f32 %v8408_v25, %v2029_v61 }
 0xe8e   :  { %v2101_v29 = vsel %vm688_vm8, %v2100_v17, %v2099_v48  ;;  %v8496_v52 = vmul.f32 %v8411_v22, %v2027_v45  ;;  %v2088_v45 = vld [vmem:[#allocation2 + $0x5] sm:$0x1] }
 0xe8f   :  { %10057 = vst [vmem:[#allocation20_spill] sm:$0xff] %v8492_v28  ;;  %v2103_v14 = vsel %vm691_vm9, %v2102_v7, %v2101_v29  ;;  %v2106_v19 = vrot.slane %v8492_v28, 2  ;;  %v10060_v7 = vmov 0.0  }
 0xe90   :  { %10058 = vst [vmem:[#allocation21_spill] sm:$0xff] %v8496_v52  ;;  %v2104_v59 = vrot.slane %v8496_v52, 3 }
 0xe91   :  { %v2031_v9 = vpop.permute.xlu1 %2030 }
 0xe92   :  { %v8502_v33 = vmul.f32 %v8417_v41, %v2031_v9  ;;  %v2105_v3 = vsel %vm694_vm10, %v2104_v59, %v2103_v14  ;;  %v10061_v41 = vmov 0.0|0.0   ;;  %v2089_v9 = vld [vmem:[#allocation2 + $0xd] sm:$0x1] }
 0xe93   :  { %v2107_v25 = vsel %vm697_vm11, %v2106_v19, %v2105_v3  ;;  %v2090_v3 = vld [vmem:[#allocation2 + $0x15] sm:$0x1] }
 0xe94   :  { %10059 = vst [vmem:[#allocation22_spill] sm:$0xff] %v8502_v33  ;;  %v2108_v61 = vrot.slane %v8502_v33, 1  ;;  %v2091_v33 = vld [vmem:[#allocation2 + $0x1d] sm:$0x1] }
 0xe96   :  { %v2109_v48 = vsel %vm700_vm12, %v2108_v61, %v2107_v25 }
 0xe97   :  { %2110 = vrot.lane.b32.xlu0 %v2109_v48, %s7652_s6 }
 0xf09   :  { %v2111_v22 = vpop.permute.xlu0 %2110 }
 0xf0a   :  { %6338 = vmatmul.mubr.msk.f32.vlgmr.msra.gmra.mrb[8].mxu0 %vm311_vm5, %v2111_v22  ;;  %v2092_v22 = vld [vmem:[#allocation2 + $0x25] sm:$0x1] }
 0xf0b   :  { %6525 = vmatpush3.bf16.msra.mxu0 %v7763_v11  ;;  %6359 = vmatprep.mubr.msk.f32.mxu0 %vm7648_vm0, %v10060_v7 }
 0xf0c   :  { %6526 = vmatprep.subr.bf16.mxu0 %v10061_v41 }
 0xf0f   :  { %6528 = vmatpush3.bf16.msra.mxu0 %v7795_v18 }
 0xf10   :  { %6537 = vmatprep.subr.bf16.mxu0 %v10061_v41 }
 0xfdd   :  { %v2180_v17 = vpop.f32.mrb[8].mxu0 }
 0xfde   :  { %v6339_v29 = vpop.f32.mrb[9].mxu0  ;;  %v2200_v14 = vadd.f32 %v2180_v17, %v2088_v45  ;;  %v2185_v19 = vrot.slane %v2180_v17, 1  ;;  %v2186_v59 = vrot.slane %v2180_v17, 2  ;;  %v2188_v25 = vrot.slane %v2180_v17, 4  ;;  %v2094_v45 = vld [vmem:[#allocation2 + $0x35] sm:$0x1] }
 0xfdf   :  { %v2187_v61 = vrot.slane %v2180_v17, 3  ;;  %v2190_v37 = vrot.slane %v2180_v17, 6  ;;  %v2189_v28 = vrot.slane %v2180_v17, 5  ;;  %v2093_v29 = vld [vmem:[#allocation2 + $0x2d] sm:$0x1]  ;;  %v2191_v58 = vrot.slane %v2180_v17, 7 }
 0xfe0   :  { %6918 = vtanh.f32 %v2200_v14  ;;  %v2201_v11 = vadd.f32 %v2185_v19, %v2089_v9  ;;  %v2202_v48 = vadd.f32 %v2186_v59, %v2090_v3  ;;  %v2204_v54 = vadd.f32 %v2188_v25, %v2092_v22  ;;  %v2095_v19 = vld [vmem:[#allocation2 + $0x3d] sm:$0x1] }
 0xfe1   :  { %v2203_v50 = vadd.f32 %v2187_v61, %v2091_v33  ;;  %v2206_v2 = vadd.f32 %v2190_v37, %v2094_v45  ;;  %v2205_v53 = vadd.f32 %v2189_v28, %v2093_v29  ;;  %v2207_v59 = vadd.f32 %v2191_v58, %v2095_v19 }
 0xfe2   :  { %6920 = vtanh.f32 %v2201_v11  ;;  %v6038_v17 = vmul.f32 -1.442695, %v2200_v14  ;;  %v6039_v61 = vmul.f32 -1.442695, %v2201_v11  ;;  %v6040_v22 = vmul.f32 -1.442695, %v2202_v48 }
 0xfe3   :  { %6922 = vtanh.f32 %v2202_v48  ;;  %v6041_v29 = vmul.f32 -1.442695, %v2203_v50  ;;  %v6044_v19 = vmul.f32 -1.442695, %v2206_v2 }
 0xfe4   :  { %6924 = vtanh.f32 %v2204_v54 }
 0xfe5   :  { %6926 = vtanh.f32 %v2203_v50 }
 0xfe6   :  { %6928 = vtanh.f32 %v2206_v2 }
 0xfe7   :  { %6930 = vtanh.f32 %v2205_v53 }
 0xfe8   :  { %6932 = vtanh.f32 %v2207_v59 }
 0xfe9   :  { %6934 = vpow2.f32 %v6038_v17 }
 0xfea   :  { %v6919_v18 = vpop.eup %6918  ;;  %6936 = vpow2.f32 %v6039_v61 }
 0xfeb   :  { %2280 = vrot.lane.b32.xlu1 %v6919_v18, %s7650_s3  ;;  %v6042_v18 = vmul.f32 -1.442695, %v2204_v54  ;;  %6938 = vpow2.f32 %v6040_v22 }
 0xfec   :  { %v6921_v9 = vpop.eup %6920 }
 0xfed   :  { %v6923_v3 = vpop.eup %6922  ;;  %6940 = vpow2.f32 %v6042_v18 }
 0xfee   :  { %2284 = vrot.lane.b32.xlu0 %v6923_v3, %s7650_s3  ;;  %v6925_v33 = vpop.eup %6924  ;;  %6942 = vpow2.f32 %v6041_v29  ;;  %v6043_v3 = vmul.f32 -1.442695, %v2205_v53 }
 0xfef   :  { %2282 = vrot.lane.b32.xlu1 %v6921_v9, %s7650_s3  ;;  %v6927_v25 = vpop.eup %6926  ;;  %6944 = vpow2.f32 %v6044_v19 }
 0xff0   :  { %v6929_v37 = vpop.eup %6928 }
 0xff1   :  { %v6931_v28 = vpop.eup %6930 }
 0xff2   :  { %2286 = vrot.lane.b32.xlu0 %v6927_v25, %s7650_s3  ;;  %v6933_v58 = vpop.eup %6932 }
 0xff3   :  { %2288 = vrot.lane.b32.xlu1 %v6925_v33, %s7650_s3  ;;  %v6935_v45 = vpop.eup %6934  ;;  %v6045_v33 = vmul.f32 -1.442695, %v2207_v59 }
 0xff4   :  { %v2232_v9 = vadd.f32 1.0, %v6935_v45  ;;  %v6937_v25 = vpop.eup %6936 }
 0xff5   :  { %v2233_v14 = vadd.f32 1.0, %v6937_v25 }
 0xff6   :  { %2290 = vrot.lane.b32.xlu0 %v6931_v28, %s7650_s3  ;;  %6946 = vrcp.f32 %v2232_v9 }
 0xff7   :  { %2292 = vrot.lane.b32.xlu1 %v6929_v37, %s7650_s3  ;;  %6948 = vpow2.f32 %v6043_v3  ;;  %v6939_v37 = vpop.eup %6938 }
 0xff8   :  { %6950 = vpow2.f32 %v6045_v33  ;;  %v6941_v11 = vpop.eup %6940  ;;  %v2234_v48 = vadd.f32 1.0, %v6939_v37 }
 0xff9   :  { %v6943_v28 = vpop.eup %6942  ;;  %6952 = vrcp.f32 %v2233_v14 }
 0xffa   :  { %2294 = vrot.lane.b32.xlu0 %v6933_v58, %s7650_s3  ;;  %v6945_v54 = vpop.eup %6944  ;;  %v2236_v58 = vadd.f32 1.0, %v6941_v11  ;;  %6954 = vrcp.f32 %v2234_v48  ;;  %v2235_v17 = vadd.f32 1.0, %v6943_v28 }
 0xffb   :  { %v2238_v59 = vadd.f32 1.0, %v6945_v54 }
 0xffc   :  { %6956 = vrcp.f32 %v2236_v58 }
 0xffd   :  { %6958 = vrcp.f32 %v2235_v17 }
 0xffe   :  { %6960 = vrcp.f32 %v2238_v59 }
0x1000   :  { %v8524_v50 = vpop.eup %6946 }
0x1001   :  { %v6949_v53 = vpop.eup %6948 }
0x1002   :  { %v2237_v22 = vadd.f32 1.0, %v6949_v53  ;;  %v6951_v18 = vpop.eup %6950 }
0x1003   :  { %v2239_v45 = vadd.f32 1.0, %v6951_v18  ;;  %v8528_v29 = vpop.eup %6952 }
0x1004   :  { %6962 = vrcp.f32 %v2237_v22  ;;  %v8530_v9 = vpop.eup %6954 }
0x1005   :  { %6964 = vrcp.f32 %v2239_v45 }
0x1006   :  { %v8535_v37 = vpop.eup %6956 }
0x1007   :  { %v8538_v11 = vpop.eup %6958 }
0x1008   :  { %v8543_v58 = vpop.eup %6960 }
0x100e   :  { %v8546_v17 = vpop.eup %6962 }
0x100f   :  { %v8552_v22 = vpop.eup %6964 }
0x105d   :  { %v2281_v2 = vpop.permute.xlu1 %2280 }
0x105e   :  { %v2304_v61 = vmul.f32 %v8524_v50, %v2281_v2 }
0x1060   :  { %2320 = vrot.lane.b32.xlu1 %v2304_v61, %s7652_s6  ;;  %v2285_v3 = vpop.permute.xlu0 %2284 }
0x1061   :  { %v2283_v19 = vpop.permute.xlu1 %2282  ;;  %v2306_v25 = vmul.f32 %v8530_v9, %v2285_v3 }
0x1062   :  { %v2305_v33 = vmul.f32 %v8528_v29, %v2283_v19  ;;  %v2264_v19 = vmul.f32 %v8524_v50, %v8423_v46  ;;  %v2268_v46 = vmul.f32 %v8535_v37, %v8440_v20  ;;  %v2269_v20 = vmul.f32 %v8546_v17, %v8453_v16 }
0x1063   :  { %2324 = vrot.lane.b32.xlu0 %v2306_v25, %s7652_s6  ;;  %v2265_v25 = vmul.f32 %v8528_v29, %v8430_v12  ;;  %v2267_v12 = vmul.f32 %v8538_v11, %v8443_v34 }
0x1064   :  { %2322 = vrot.lane.b32.xlu1 %v2305_v33, %s7652_s6  ;;  %v2287_v48 = vpop.permute.xlu0 %2286 }
0x1065   :  { %v2289_v14 = vpop.permute.xlu1 %2288  ;;  %v2307_v54 = vmul.f32 %v8538_v11, %v2287_v48 }
0x1066   :  { %v2308_v28 = vmul.f32 %v8535_v37, %v2289_v14  ;;  %v2266_v14 = vmul.f32 %v8530_v9, %v8432_v0 }
0x1067   :  { %2326 = vrot.lane.b32.xlu0 %v2307_v54, %s7652_s6 }
0x1068   :  { %2328 = vrot.lane.b32.xlu1 %v2308_v28, %s7652_s6  ;;  %v2291_v53 = vpop.permute.xlu0 %2290 }
0x1069   :  { %v2293_v2 = vpop.permute.xlu1 %2292  ;;  %v2309_v59 = vmul.f32 %v8546_v17, %v2291_v53 }
0x106a   :  { %v2310_v61 = vmul.f32 %v8543_v58, %v2293_v2 }
0x106b   :  { %2330 = vrot.lane.b32.xlu0 %v2309_v59, %s7652_s6 }
0x106c   :  { %2332 = vrot.lane.b32.xlu1 %v2310_v61, %s7652_s6  ;;  %v2295_v18 = vpop.permute.xlu0 %2294 }
0x106d   :  { %v2311_v45 = vmul.f32 %v8552_v22, %v2295_v18 }
0x106f   :  { %2334 = vrot.lane.b32.xlu0 %v2311_v45, %s7652_s6  ;;  %v2270_v45 = vmul.f32 %v8543_v58, %v8451_v30 }
0x10d2   :  { %v2321_v3 = vpop.permute.xlu1 %2320 }
0x10d3   :  { %v8558_v33 = vadd.f32 %v2321_v3, %v2264_v19 }
0x10d5   :  { %6966 = vtanh.f32 %v8558_v33  ;;  %v2325_v28 = vpop.permute.xlu0 %2324 }
0x10d6   :  { %v2323_v48 = vpop.permute.xlu1 %2322  ;;  %v8567_v2 = vadd.f32 %v2325_v28, %v2266_v14  ;;  %v2271_v14 = vmul.f32 %v8552_v22, %v8459_v62 }
0x10d7   :  { %v8565_v54 = vadd.f32 %v2323_v48, %v2265_v25 }
0x10d9   :  { %6968 = vtanh.f32 %v8565_v54  ;;  %v2327_v59 = vpop.permute.xlu0 %2326 }
0x10da   :  { %6970 = vtanh.f32 %v8567_v2  ;;  %v2329_v61 = vpop.permute.xlu1 %2328  ;;  %v8578_v18 = vadd.f32 %v2327_v59, %v2267_v12 }
0x10db   :  { %v8575_v0 = vadd.f32 %v2329_v61, %v2268_v46 }
0x10dd   :  { %6972 = vtanh.f32 %v8575_v0  ;;  %v2331_v34 = vpop.permute.xlu0 %2330 }
0x10de   :  { %6974 = vtanh.f32 %v8578_v18  ;;  %v2333_v19 = vpop.permute.xlu1 %2332  ;;  %v8588_v25 = vadd.f32 %v2331_v34, %v2269_v20 }
0x10df   :  { %v6967_v53 = vpop.eup %6966  ;;  %v8586_v3 = vadd.f32 %v2333_v19, %v2270_v45 }
0x10e0   :  { %2368 = vrot.lane.b32.xlu1 %v6967_v53, %s7650_s3 }
0x10e1   :  { %6976 = vtanh.f32 %v8586_v3  ;;  %v2335_v30 = vpop.permute.xlu0 %2334 }
0x10e2   :  { %6978 = vtanh.f32 %v8588_v25  ;;  %v8594_v46 = vadd.f32 %v2335_v30, %v2271_v14 }
0x10e3   :  { %v6969_v48 = vpop.eup %6968 }
0x10e4   :  { %v6971_v28 = vpop.eup %6970  ;;  %2370 = vrot.lane.b32.xlu1 %v6969_v48, %s7650_s3  ;;  %6980 = vtanh.f32 %v8594_v46 }
0x10e5   :  { %2372 = vrot.lane.b32.xlu0 %v6971_v28, %s7650_s3 }
0x10e7   :  { %v6973_v16 = vpop.eup %6972 }
0x10e8   :  { %v6975_v53 = vpop.eup %6974  ;;  %2376 = vrot.lane.b32.xlu1 %v6973_v16, %s7650_s3 }
0x10e9   :  { %2374 = vrot.lane.b32.xlu0 %v6975_v53, %s7650_s3 }
0x10eb   :  { %v6977_v12 = vpop.eup %6976 }
0x10ec   :  { %v6979_v61 = vpop.eup %6978  ;;  %2380 = vrot.lane.b32.xlu1 %v6977_v12, %s7650_s3 }
0x10ed   :  { %2378 = vrot.lane.b32.xlu0 %v6979_v61, %s7650_s3 }
0x10ee   :  { %v6981_v62 = vpop.eup %6980 }
0x10f1   :  { %2382 = vrot.lane.b32.xlu0 %v6981_v62, %s7650_s3 }
0x1152   :  { %v2369_v59 = vpop.permute.xlu1 %2368 }
0x1153   :  { %v8611_v14 = vmul.f32 %v8524_v50, %v2369_v59 }
0x1156   :  { %v2371_v45 = vpop.permute.xlu1 %2370 }
0x1157   :  { %v2373_v20 = vpop.permute.xlu0 %2372  ;;  %v8605_v19 = vmul.f32 %v8528_v29, %v2371_v45 }
0x1158   :  { %v8608_v34 = vmul.f32 %v8530_v9, %v2373_v20 }
0x1159   :  { %v2448_v48 = vrot.slane %v8605_v19, 7 }
0x115a   :  { %v2377_v30 = vpop.permute.xlu1 %2376  ;;  %v2450_v28 = vrot.slane %v8608_v34, 6 }
0x115b   :  { %v2449_v16 = vsel %vm682_vm6, %v2448_v48, %v8611_v14  ;;  %v2375_v53 = vpop.permute.xlu0 %2374  ;;  %v8618_v12 = vmul.f32 %v8535_v37, %v2377_v30 }
0x115c   :  { %v8621_v29 = vmul.f32 %v8538_v11, %v2375_v53  ;;  %v2451_v9 = vsel %vm685_vm7, %v2450_v28, %v2449_v16 }
0x115d   :  { %v2454_v50 = vrot.slane %v8618_v12, 4 }
0x115e   :  { %v2452_v61 = vrot.slane %v8621_v29, 5  ;;  %v2381_v62 = vpop.permute.xlu1 %2380 }
0x115f   :  { %v2379_v59 = vpop.permute.xlu0 %2378  ;;  %v8627_v45 = vmul.f32 %v8543_v58, %v2381_v62 }
0x1160   :  { %v2453_v20 = vsel %vm688_vm8, %v2452_v61, %v2451_v9  ;;  %v8631_v48 = vmul.f32 %v8546_v17, %v2379_v59  ;;  %v2440_v61 = vld [vmem:[#allocation2 + $0x6] sm:$0x1] }
0x1161   :  { %10062 = vst [vmem:[#allocation23_spill] sm:$0xff] %v8627_v45  ;;  %v2455_v37 = vsel %vm691_vm9, %v2454_v50, %v2453_v20  ;;  %v2458_v11 = vrot.slane %v8627_v45, 2  ;;  %v2441_v45 = vld [vmem:[#allocation2 + $0xe] sm:$0x1] }
0x1162   :  { %10063 = vst [vmem:[#allocation24_spill] sm:$0xff] %v8631_v48  ;;  %v2456_v30 = vrot.slane %v8631_v48, 3 }
0x1163   :  { %v2383_v28 = vpop.permute.xlu0 %2382 }
0x1164   :  { %v8637_v16 = vmul.f32 %v8552_v22, %v2383_v28  ;;  %v2457_v53 = vsel %vm694_vm10, %v2456_v30, %v2455_v37  ;;  %v2442_v37 = vld [vmem:[#allocation2 + $0x16] sm:$0x1] }
0x1165   :  { %v2459_v58 = vsel %vm697_vm11, %v2458_v11, %v2457_v53 }
0x1166   :  { %10064 = vst [vmem:[#allocation25_spill] sm:$0xff] %v8637_v16  ;;  %v2460_v62 = vrot.slane %v8637_v16, 1 }
0x1168   :  { %v2461_v9 = vsel %vm700_vm12, %v2460_v62, %v2459_v58  ;;  %v2443_v58 = vld [vmem:[#allocation2 + $0x1e] sm:$0x1] }
0x1169   :  { %2462 = vrot.lane.b32.xlu1 %v2461_v9, %s7652_s6 }
0x11db   :  { %v2463_v17 = vpop.permute.xlu1 %2462 }
0x11dc   :  { %6349 = vmatmul.mubr.msk.f32.vlgmr.msra.gmra.mrb[12].mxu1 %vm311_vm5, %v2463_v17 }
0x12af   :  { %v2532_v50 = vpop.f32.mrb[12].mxu1 }
0x12b0   :  { %v6350_v59 = vpop.f32.mrb[13].mxu1  ;;  %v2552_v20 = vadd.f32 %v2532_v50, %v2440_v61  ;;  %v2537_v22 = vrot.slane %v2532_v50, 1  ;;  %v2538_v28 = vrot.slane %v2532_v50, 2  ;;  %v2540_v30 = vrot.slane %v2532_v50, 4  ;;  %v2446_v61 = vld [vmem:[#allocation2 + $0x36] sm:$0x1] }
0x12b1   :  { %v2539_v53 = vrot.slane %v2532_v50, 3  ;;  %v2542_v62 = vrot.slane %v2532_v50, 6  ;;  %v2541_v17 = vrot.slane %v2532_v50, 5  ;;  %v2445_v59 = vld [vmem:[#allocation2 + $0x2e] sm:$0x1]  ;;  %v2543_v31 = vrot.slane %v2532_v50, 7 }
0x12b2   :  { %6982 = vtanh.f32 %v2552_v20  ;;  %v2553_v11 = vadd.f32 %v2537_v22, %v2441_v45  ;;  %v2554_v16 = vadd.f32 %v2538_v28, %v2442_v37  ;;  %v2556_v9 = vadd.f32 %v2540_v30, %v2444_v43  ;;  %v2447_v45 = vld [vmem:[#allocation2 + $0x3e] sm:$0x1] }
0x12b3   :  { %v2555_v48 = vadd.f32 %v2539_v53, %v2443_v58  ;;  %v2558_v21 = vadd.f32 %v2542_v62, %v2446_v61  ;;  %v2557_v44 = vadd.f32 %v2541_v17, %v2445_v59  ;;  %v2559_v22 = vadd.f32 %v2543_v31, %v2447_v45 }
0x12b4   :  { %6984 = vtanh.f32 %v2553_v11  ;;  %v6047_v53 = vmul.f32 -1.442695, %v2552_v20  ;;  %v6048_v58 = vmul.f32 -1.442695, %v2553_v11  ;;  %v6049_v62 = vmul.f32 -1.442695, %v2554_v16 }
0x12b5   :  { %6986 = vtanh.f32 %v2554_v16  ;;  %v6051_v17 = vmul.f32 -1.442695, %v2556_v9  ;;  %v6050_v59 = vmul.f32 -1.442695, %v2555_v48  ;;  %v6053_v45 = vmul.f32 -1.442695, %v2558_v21 }
0x12b6   :  { %6988 = vtanh.f32 %v2556_v9 }
0x12b7   :  { %6990 = vtanh.f32 %v2555_v48 }
0x12b8   :  { %6992 = vtanh.f32 %v2558_v21 }
0x12b9   :  { %6994 = vtanh.f32 %v2557_v44 }
0x12ba   :  { %6996 = vtanh.f32 %v2559_v22 }
0x12bb   :  { %6998 = vpow2.f32 %v6047_v53 }
0x12bc   :  { %v6983_v52 = vpop.eup %6982  ;;  %7000 = vpow2.f32 %v6048_v58 }
0x12bd   :  { %2632 = vrot.lane.b32.xlu0 %v6983_v52, %s7650_s3  ;;  %7002 = vpow2.f32 %v6049_v62 }
0x12be   :  { %v6985_v28 = vpop.eup %6984  ;;  %7004 = vpow2.f32 %v6051_v17 }
0x12bf   :  { %v6987_v43 = vpop.eup %6986  ;;  %7006 = vpow2.f32 %v6050_v59 }
0x12c0   :  { %2636 = vrot.lane.b32.xlu1 %v6987_v43, %s7650_s3  ;;  %v6989_v37 = vpop.eup %6988  ;;  %v6052_v43 = vmul.f32 -1.442695, %v2557_v44  ;;  %7008 = vpow2.f32 %v6053_v45 }
0x12c1   :  { %2634 = vrot.lane.b32.xlu0 %v6985_v28, %s7650_s3  ;;  %v6991_v52 = vpop.eup %6990 }
0x12c2   :  { %v6993_v50 = vpop.eup %6992 }
0x12c3   :  { %v6995_v30 = vpop.eup %6994 }
0x12c4   :  { %2638 = vrot.lane.b32.xlu1 %v6991_v52, %s7650_s3  ;;  %v6997_v31 = vpop.eup %6996 }
0x12c5   :  { %2640 = vrot.lane.b32.xlu0 %v6989_v37, %s7650_s3  ;;  %v6999_v61 = vpop.eup %6998  ;;  %v6054_v37 = vmul.f32 -1.442695, %v2559_v22 }
0x12c6   :  { %v2584_v28 = vadd.f32 1.0, %v6999_v61  ;;  %v7001_v52 = vpop.eup %7000 }
0x12c7   :  { %v2585_v20 = vadd.f32 1.0, %v7001_v52 }
0x12c8   :  { %2642 = vrot.lane.b32.xlu1 %v6995_v30, %s7650_s3  ;;  %7010 = vrcp.f32 %v2584_v28 }
0x12c9   :  { %2644 = vrot.lane.b32.xlu0 %v6993_v50, %s7650_s3  ;;  %7012 = vpow2.f32 %v6052_v43  ;;  %v7003_v50 = vpop.eup %7002 }
0x12ca   :  { %7014 = vpow2.f32 %v6054_v37  ;;  %v7005_v11 = vpop.eup %7004  ;;  %v2586_v16 = vadd.f32 1.0, %v7003_v50 }
0x12cb   :  { %v7007_v30 = vpop.eup %7006  ;;  %7016 = vrcp.f32 %v2585_v20 }
0x12cc   :  { %2646 = vrot.lane.b32.xlu1 %v6997_v31, %s7650_s3  ;;  %v7009_v9 = vpop.eup %7008  ;;  %v2588_v31 = vadd.f32 1.0, %v7005_v11  ;;  %7018 = vrcp.f32 %v2586_v16  ;;  %v2587_v53 = vadd.f32 1.0, %v7007_v30 }
0x12cd   :  { %v2590_v22 = vadd.f32 1.0, %v7009_v9 }
0x12ce   :  { %7020 = vrcp.f32 %v2588_v31 }
0x12cf   :  { %7022 = vrcp.f32 %v2587_v53 }
0x12d0   :  { %7024 = vrcp.f32 %v2590_v22 }
0x12d2   :  { %v8653_v48 = vpop.eup %7010 }
0x12d3   :  { %v7013_v44 = vpop.eup %7012 }
0x12d4   :  { %v2589_v62 = vadd.f32 1.0, %v7013_v44  ;;  %v7015_v17 = vpop.eup %7014 }
0x12d5   :  { %v2591_v61 = vadd.f32 1.0, %v7015_v17  ;;  %v8657_v59 = vpop.eup %7016 }
0x12d6   :  { %7026 = vrcp.f32 %v2589_v62  ;;  %v8659_v28 = vpop.eup %7018 }
0x12d7   :  { %7028 = vrcp.f32 %v2591_v61 }
0x12d8   :  { %v8664_v50 = vpop.eup %7020 }
0x12d9   :  { %v8667_v11 = vpop.eup %7022 }
0x12da   :  { %v8672_v31 = vpop.eup %7024 }
0x12e0   :  { %v8675_v53 = vpop.eup %7026 }
0x12e1   :  { %v8681_v62 = vpop.eup %7028 }
0x132f   :  { %v2633_v21 = vpop.permute.xlu0 %2632 }
0x1330   :  { %v2656_v58 = vmul.f32 %v8653_v48, %v2633_v21 }
0x1332   :  { %2672 = vrot.lane.b32.xlu0 %v2656_v58, %s7652_s6  ;;  %v2637_v43 = vpop.permute.xlu1 %2636 }
0x1333   :  { %v2635_v45 = vpop.permute.xlu0 %2634  ;;  %v2658_v52 = vmul.f32 %v8659_v28, %v2637_v43 }
0x1334   :  { %v2657_v37 = vmul.f32 %v8657_v59, %v2635_v45  ;;  %v2616_v45 = vmul.f32 %v8653_v48, %v8558_v33  ;;  %v2620_v33 = vmul.f32 %v8664_v50, %v8575_v0  ;;  %v2621_v0 = vmul.f32 %v8675_v53, %v8588_v25 }
0x1335   :  { %2676 = vrot.lane.b32.xlu1 %v2658_v52, %s7652_s6  ;;  %v2617_v52 = vmul.f32 %v8657_v59, %v8565_v54  ;;  %v2619_v54 = vmul.f32 %v8667_v11, %v8578_v18 }
0x1336   :  { %2674 = vrot.lane.b32.xlu0 %v2657_v37, %s7652_s6  ;;  %v2639_v16 = vpop.permute.xlu1 %2638 }
0x1337   :  { %v2641_v20 = vpop.permute.xlu0 %2640  ;;  %v2659_v9 = vmul.f32 %v8667_v11, %v2639_v16 }
0x1338   :  { %v2660_v30 = vmul.f32 %v8664_v50, %v2641_v20  ;;  %v2618_v20 = vmul.f32 %v8659_v28, %v8567_v2 }
0x1339   :  { %2678 = vrot.lane.b32.xlu1 %v2659_v9, %s7652_s6 }
0x133a   :  { %2680 = vrot.lane.b32.xlu0 %v2660_v30, %s7652_s6  ;;  %v2643_v44 = vpop.permute.xlu1 %2642 }
0x133b   :  { %v2645_v21 = vpop.permute.xlu0 %2644  ;;  %v2661_v22 = vmul.f32 %v8675_v53, %v2643_v44 }
0x133c   :  { %v2662_v58 = vmul.f32 %v8672_v31, %v2645_v21 }
0x133d   :  { %2682 = vrot.lane.b32.xlu1 %v2661_v22, %s7652_s6 }
0x133e   :  { %2684 = vrot.lane.b32.xlu0 %v2662_v58, %s7652_s6  ;;  %v2647_v17 = vpop.permute.xlu1 %2646 }
0x133f   :  { %v2663_v61 = vmul.f32 %v8681_v62, %v2647_v17 }
0x1341   :  { %2686 = vrot.lane.b32.xlu1 %v2663_v61, %s7652_s6  ;;  %v2622_v61 = vmul.f32 %v8672_v31, %v8586_v3 }
0x13a4   :  { %v2673_v43 = vpop.permute.xlu0 %2672 }
0x13a5   :  { %v8687_v37 = vadd.f32 %v2673_v43, %v2616_v45 }
0x13a7   :  { %7030 = vtanh.f32 %v8687_v37  ;;  %v2677_v30 = vpop.permute.xlu1 %2676 }
0x13a8   :  { %v2675_v16 = vpop.permute.xlu0 %2674  ;;  %v8696_v21 = vadd.f32 %v2677_v30, %v2618_v20  ;;  %v2623_v20 = vmul.f32 %v8681_v62, %v8594_v46 }
0x13a9   :  { %v8694_v9 = vadd.f32 %v2675_v16, %v2617_v52 }
0x13ab   :  { %7032 = vtanh.f32 %v8694_v9  ;;  %v2679_v22 = vpop.permute.xlu1 %2678 }
0x13ac   :  { %7034 = vtanh.f32 %v8696_v21  ;;  %v2681_v58 = vpop.permute.xlu0 %2680  ;;  %v8707_v17 = vadd.f32 %v2679_v22, %v2619_v54 }
0x13ad   :  { %v8704_v2 = vadd.f32 %v2681_v58, %v2620_v33 }
0x13af   :  { %7036 = vtanh.f32 %v8704_v2  ;;  %v2683_v18 = vpop.permute.xlu1 %2682 }
0x13b0   :  { %7038 = vtanh.f32 %v8707_v17  ;;  %v2685_v45 = vpop.permute.xlu0 %2684  ;;  %v8717_v52 = vadd.f32 %v2683_v18, %v2621_v0 }
0x13b1   :  { %v7031_v44 = vpop.eup %7030  ;;  %v8715_v43 = vadd.f32 %v2685_v45, %v2622_v61 }
0x13b2   :  { %2720 = vrot.lane.b32.xlu0 %v7031_v44, %s7650_s3 }
0x13b3   :  { %7040 = vtanh.f32 %v8715_v43  ;;  %v2687_v3 = vpop.permute.xlu1 %2686 }
0x13b4   :  { %7042 = vtanh.f32 %v8717_v52  ;;  %v8723_v33 = vadd.f32 %v2687_v3, %v2623_v20 }
0x13b5   :  { %v7033_v16 = vpop.eup %7032 }
0x13b6   :  { %v7035_v30 = vpop.eup %7034  ;;  %2722 = vrot.lane.b32.xlu0 %v7033_v16, %s7650_s3  ;;  %7044 = vtanh.f32 %v8723_v33 }
0x13b7   :  { %2724 = vrot.lane.b32.xlu1 %v7035_v30, %s7650_s3 }
0x13b9   :  { %v7037_v25 = vpop.eup %7036 }
0x13ba   :  { %v7039_v44 = vpop.eup %7038  ;;  %2728 = vrot.lane.b32.xlu0 %v7037_v25, %s7650_s3 }
0x13bb   :  { %2726 = vrot.lane.b32.xlu1 %v7039_v44, %s7650_s3 }
0x13bd   :  { %v7041_v54 = vpop.eup %7040 }
0x13be   :  { %v7043_v58 = vpop.eup %7042  ;;  %2732 = vrot.lane.b32.xlu0 %v7041_v54, %s7650_s3 }
0x13bf   :  { %2730 = vrot.lane.b32.xlu1 %v7043_v58, %s7650_s3 }
0x13c0   :  { %v7045_v46 = vpop.eup %7044 }
0x13c3   :  { %2734 = vrot.lane.b32.xlu1 %v7045_v46, %s7650_s3 }
0x1424   :  { %v2721_v22 = vpop.permute.xlu0 %2720 }
0x1425   :  { %v8740_v20 = vmul.f32 %v8653_v48, %v2721_v22 }
0x1428   :  { %v2723_v61 = vpop.permute.xlu0 %2722 }
0x1429   :  { %v2725_v0 = vpop.permute.xlu1 %2724  ;;  %v8734_v45 = vmul.f32 %v8657_v59, %v2723_v61 }
0x142a   :  { %v8737_v18 = vmul.f32 %v8659_v28, %v2725_v0 }
0x142b   :  { %v2800_v16 = vrot.slane %v8734_v45, 7 }
0x142c   :  { %v2729_v3 = vpop.permute.xlu0 %2728  ;;  %v2802_v30 = vrot.slane %v8737_v18, 6 }
0x142d   :  { %v2801_v25 = vsel %vm682_vm6, %v2800_v16, %v8740_v20  ;;  %v2727_v44 = vpop.permute.xlu1 %2726  ;;  %v8747_v54 = vmul.f32 %v8664_v50, %v2729_v3 }
0x142e   :  { %v8750_v59 = vmul.f32 %v8667_v11, %v2727_v44  ;;  %v2803_v28 = vsel %vm685_vm7, %v2802_v30, %v2801_v25 }
0x142f   :  { %10065 = vst [vmem:[#allocation26_spill] sm:$0xff] %v8747_v54  ;;  %v2806_v48 = vrot.slane %v8747_v54, 4 }
0x1430   :  { %v2804_v58 = vrot.slane %v8750_v59, 5  ;;  %v2733_v46 = vpop.permute.xlu0 %2732 }
0x1431   :  { %v2731_v22 = vpop.permute.xlu1 %2730  ;;  %v8756_v61 = vmul.f32 %v8672_v31, %v2733_v46 }
0x1432   :  { %v2805_v0 = vsel %vm688_vm8, %v2804_v58, %v2803_v28  ;;  %v8760_v16 = vmul.f32 %v8675_v53, %v2731_v22  ;;  %v3148_v53 = vld [vmem:[%s9997_s8] sm:$0xff]  ;;  %v3150_v58 = vld [vmem:[%s9997_s8 + $0x10] sm:$0xff]  ;;  %v3151_v22 = vld [vmem:[%s9997_s8 + $0x18] sm:$0xff] }
0x1433   :  { %10066 = vst [vmem:[#allocation27_spill] sm:$0xff] %v8756_v61  ;;  %v2807_v50 = vsel %vm691_vm9, %v2806_v48, %v2805_v0  ;;  %v2810_v11 = vrot.slane %v8756_v61, 2  ;;  %v3149_v48 = vld [vmem:[%s9997_s8 + $0x8] sm:$0xff] }
0x1434   :  { %10067 = vst [vmem:[#allocation28_spill] sm:$0xff] %v8760_v16  ;;  %v2808_v3 = vrot.slane %v8760_v16, 3  ;;  %v2797_v16 = vld [vmem:[#allocation2 + $0x2f] sm:$0x1] }
0x1435   :  { %v2735_v30 = vpop.permute.xlu1 %2734 }
0x1436   :  { %v8766_v25 = vmul.f32 %v8681_v62, %v2735_v30  ;;  %v2809_v44 = vsel %vm694_vm10, %v2808_v3, %v2807_v50  ;;  %v8779_v62 = vpack.c.bf16 %v3149_v48, %v3148_v53  ;;  %v8789_v50 = vpack.c.bf16 %v3151_v22, %v3150_v58  ;;  %v2792_v3 = vld [vmem:[#allocation2 + $0x7] sm:$0x1]  ;;  %v2794_v48 = vld [vmem:[#allocation2 + $0x17] sm:$0x1] }
0x1437   :  { %v2811_v31 = vsel %vm697_vm11, %v2810_v11, %v2809_v44 }
0x1438   :  { %10068 = vst [vmem:[#allocation29_spill] sm:$0xff] %v8766_v25  ;;  %v2812_v46 = vrot.slane %v8766_v25, 1  ;;  %10069 = vst [vmem:[#allocation30_spill] sm:$0xff] %v8779_v62 }
0x1439   :  { %10070 = vst [vmem:[#allocation31_spill] sm:$0xff] %v8789_v50 }
0x143a   :  { %v2813_v28 = vsel %vm700_vm12, %v2812_v46, %v2811_v31 }
0x143b   :  { %2814 = vrot.lane.b32.xlu0 %v2813_v28, %s7652_s6 }
0x14ad   :  { %v2815_v0 = vpop.permute.xlu0 %2814 }
0x14ae   :  { %6360 = vmatmul.mubr.msk.f32.vlgmr.msra.gmra.mrb[10].mxu0 %vm311_vm5, %v2815_v0 }
0x14af   :  { %6539 = vmatpush3.bf16.msra.mxu0 %v8779_v62  ;;  %6390 = vmatprep.mubr.msk.f32.mxu0 %vm7648_vm0, %v10060_v7 }
0x14b0   :  { %6540 = vmatprep.subr.bf16.mxu0 %v10061_v41 }
0x14b3   :  { %6542 = vmatpush3.bf16.msra.mxu0 %v8789_v50 }
0x14b4   :  { %6543 = vmatprep.subr.bf16.mxu0 %v10061_v41 }
0x14b6   :  { %6391 = vmatmul.mubr.msk.f32.vlgmr.msra.gmra.mrb[12].mxu0 %vm311_vm5, %v7887_v10  ;;  %v2793_v10 = vld [vmem:[#allocation2 + $0xf] sm:$0x1] }
0x14b7   :  { %6545 = vmatpush3.bf16.msra.mxu0 %v8779_v62  ;;  %6401 = vmatprep.mubr.msk.f32.mxu0 %vm7648_vm0, %v10060_v7  ;;  %v2795_v62 = vld [vmem:[#allocation2 + $0x1f] sm:$0x1] }
0x14b8   :  { %6546 = vmatprep.subr.bf16.mxu0 %v10061_v41 }
0x14bb   :  { %6548 = vmatpush3.bf16.msra.mxu0 %v8789_v50  ;;  %v2796_v50 = vld [vmem:[#allocation2 + $0x27] sm:$0x1] }
0x14bc   :  { %6555 = vmatprep.subr.bf16.mxu0 %v10061_v41 }
0x1581   :  { %v2884_v11 = vpop.f32.mrb[10].mxu0 }
0x1582   :  { %v6361_v30 = vpop.f32.mrb[11].mxu0  ;;  %v2904_v44 = vadd.f32 %v2884_v11, %v2792_v3  ;;  %v2889_v31 = vrot.slane %v2884_v11, 1  ;;  %v2890_v46 = vrot.slane %v2884_v11, 2  ;;  %v2891_v58 = vrot.slane %v2884_v11, 3 }
0x1583   :  { %v2892_v0 = vrot.slane %v2884_v11, 4  ;;  %v2893_v25 = vrot.slane %v2884_v11, 5  ;;  %v2894_v30 = vrot.slane %v2884_v11, 6  ;;  %v2895_v54 = vrot.slane %v2884_v11, 7 }
0x1584   :  { %7046 = vtanh.f32 %v2904_v44  ;;  %v2905_v22 = vadd.f32 %v2889_v31, %v2793_v10  ;;  %v2906_v7 = vadd.f32 %v2890_v46, %v2794_v48  ;;  %v2907_v41 = vadd.f32 %v2891_v58, %v2795_v62  ;;  %v2799_v31 = vld [vmem:[#allocation2 + $0x3f] sm:$0x1] }
0x1585   :  { %v2908_v3 = vadd.f32 %v2892_v0, %v2796_v50  ;;  %v2911_v46 = vadd.f32 %v2895_v54, %v2799_v31  ;;  %v6056_v11 = vmul.f32 -1.442695, %v2904_v44 }
0x1586   :  { %7048 = vtanh.f32 %v2905_v22  ;;  %v6058_v48 = vmul.f32 -1.442695, %v2906_v7 }
0x1587   :  { %7050 = vtanh.f32 %v2906_v7 }
0x1588   :  { %7052 = vtanh.f32 %v2907_v41 }
0x1589   :  { %v8804_v28 = vpop.f32.mrb[12].mxu0  ;;  %7054 = vtanh.f32 %v2908_v3 }
0x158a   :  { %10071 = vst [vmem:[#allocation32_spill] sm:$0xff] %v8804_v28  ;;  %v6392_v53 = vpop.f32.mrb[13].mxu0  ;;  %v2798_v28 = vld [vmem:[#allocation2 + $0x37] sm:$0x1] }
0x158b   :  { %v2909_v53 = vadd.f32 %v2893_v25, %v2797_v16  ;;  %v2910_v39 = vadd.f32 %v2894_v30, %v2798_v28  ;;  %v6057_v28 = vmul.f32 -1.442695, %v2905_v22  ;;  %v6063_v30 = vmul.f32 -1.442695, %v2911_v46 }
0x158d   :  { %7056 = vtanh.f32 %v2909_v53  ;;  %v6061_v0 = vmul.f32 -1.442695, %v2909_v53 }
0x158e   :  { %v7047_v61 = vpop.eup %7046  ;;  %7058 = vtanh.f32 %v2910_v39 }
0x158f   :  { %2984 = vrot.lane.b32.xlu1 %v7047_v61, %s7650_s3  ;;  %7060 = vtanh.f32 %v2911_v46 }
0x1590   :  { %v7049_v10 = vpop.eup %7048  ;;  %7062 = vpow2.f32 %v6056_v11 }
0x1591   :  { %v7051_v62 = vpop.eup %7050  ;;  %2986 = vrot.lane.b32.xlu0 %v7049_v10, %s7650_s3  ;;  %7064 = vpow2.f32 %v6057_v28 }
0x1592   :  { %v7053_v50 = vpop.eup %7052  ;;  %7066 = vpow2.f32 %v6058_v48 }
0x1593   :  { %2988 = vrot.lane.b32.xlu1 %v7051_v62, %s7650_s3  ;;  %v7055_v61 = vpop.eup %7054 }
0x1595   :  { %2990 = vrot.lane.b32.xlu0 %v7053_v50, %s7650_s3 }
0x1597   :  { %2992 = vrot.lane.b32.xlu1 %v7055_v61, %s7650_s3  ;;  %v7057_v16 = vpop.eup %7056 }
0x1598   :  { %v7059_v25 = vpop.eup %7058 }
0x1599   :  { %2994 = vrot.lane.b32.xlu0 %v7057_v16, %s7650_s3  ;;  %v7061_v54 = vpop.eup %7060 }
0x159a   :  { %v7063_v58 = vpop.eup %7062 }
0x159b   :  { %2996 = vrot.lane.b32.xlu1 %v7059_v25, %s7650_s3 }
0x159d   :  { %2998 = vrot.lane.b32.xlu0 %v7061_v54, %s7650_s3 }
0x159f   :  { %640 = vrot.lane.b32.xlu1 %v7939_v23, %s7652_s6  ;;  %v6059_v23 = vmul.f32 -1.442695, %v2907_v41 }
0x15a1   :  { %1000 = vrot.lane.b32.xlu0 %v8072_v6, %s7652_s6  ;;  %v6060_v6 = vmul.f32 -1.442695, %v2908_v3  ;;  %7068 = vpow2.f32 %v6059_v23 }
0x15a3   :  { %1352 = vrot.lane.b32.xlu1 %v8207_v5, %s7652_s6  ;;  %v2936_v5 = vadd.f32 1.0, %v7063_v58  ;;  %7070 = vpow2.f32 %v6060_v6 }
0x15a4   :  { %7072 = vpow2.f32 %v6061_v0 }
0x15a5   :  { %1704 = vrot.lane.b32.xlu0 %v8342_v57, %s7652_s6  ;;  %v6062_v57 = vmul.f32 -1.442695, %v2910_v39  ;;  %7074 = vrcp.f32 %v2936_v5 }
0x15a7   :  { %2056 = vrot.lane.b32.xlu1 %v8476_v42, %s7652_s6  ;;  %7076 = vpow2.f32 %v6062_v57  ;;  %v7065_v42 = vpop.eup %7064 }
0x15a8   :  { %7078 = vpow2.f32 %v6063_v30  ;;  %v2937_v44 = vadd.f32 1.0, %v7065_v42 }
0x15a9   :  { %2408 = vrot.lane.b32.xlu0 %v8611_v14, %s7652_s6  ;;  %v7067_v14 = vpop.eup %7066 }
0x15aa   :  { %v2938_v7 = vadd.f32 1.0, %v7067_v14  ;;  %7080 = vrcp.f32 %v2937_v44 }
0x15ab   :  { %v7069_v22 = vpop.eup %7068 }
0x15ac   :  { %v2939_v10 = vadd.f32 1.0, %v7069_v22  ;;  %7082 = vrcp.f32 %v2938_v7 }
0x15ad   :  { %v7071_v31 = vpop.eup %7070 }
0x15ae   :  { %v7073_v41 = vpop.eup %7072  ;;  %v2940_v62 = vadd.f32 1.0, %v7071_v31  ;;  %7084 = vrcp.f32 %v2939_v10 }
0x15af   :  { %v8826_v3 = vpop.eup %7074  ;;  %v2941_v50 = vadd.f32 1.0, %v7073_v41 }
0x15b0   :  { %7086 = vrcp.f32 %v2940_v62 }
0x15b1   :  { %v7077_v39 = vpop.eup %7076  ;;  %7088 = vrcp.f32 %v2941_v50 }
0x15b2   :  { %v7079_v61 = vpop.eup %7078  ;;  %v2942_v16 = vadd.f32 1.0, %v7077_v39 }
0x15b3   :  { %v2943_v25 = vadd.f32 1.0, %v7079_v61 }
0x15b4   :  { %7090 = vrcp.f32 %v2942_v16  ;;  %v8830_v54 = vpop.eup %7080 }
0x15b5   :  { %7092 = vrcp.f32 %v2943_v25 }
0x15b6   :  { %v8832_v28 = vpop.eup %7082 }
0x15b8   :  { %v8837_v6 = vpop.eup %7084 }
0x15ba   :  { %v8840_v5 = vpop.eup %7086 }
0x15bb   :  { %v8845_v14 = vpop.eup %7088 }
0x15be   :  { %v8848_v22 = vpop.eup %7090 }
0x15bf   :  { %v8853_v10 = vpop.eup %7092 }
0x1601   :  { %v2985_v53 = vpop.permute.xlu1 %2984 }
0x1602   :  { %v3008_v46 = vmul.f32 %v8826_v3, %v2985_v53 }
0x1603   :  { %v2987_v11 = vpop.permute.xlu0 %2986 }
0x1604   :  { %3024 = vrot.lane.b32.xlu1 %v3008_v46, %s7652_s6  ;;  %v3009_v48 = vmul.f32 %v8830_v54, %v2987_v11 }
0x1605   :  { %v2989_v23 = vpop.permute.xlu1 %2988 }
0x1606   :  { %v3010_v58 = vmul.f32 %v8832_v28, %v2989_v23  ;;  %3026 = vrot.lane.b32.xlu0 %v3009_v48, %s7652_s6 }
0x1607   :  { %v2991_v0 = vpop.permute.xlu0 %2990 }
0x1608   :  { %3028 = vrot.lane.b32.xlu1 %v3010_v58, %s7652_s6  ;;  %v3011_v57 = vmul.f32 %v8837_v6, %v2991_v0 }
0x1609   :  { %v2993_v30 = vpop.permute.xlu1 %2992 }
0x160a   :  { %v3012_v42 = vmul.f32 %v8840_v5, %v2993_v30  ;;  %3030 = vrot.lane.b32.xlu0 %v3011_v57, %s7652_s6 }
0x160b   :  { %v2995_v44 = vpop.permute.xlu0 %2994 }
0x160c   :  { %3032 = vrot.lane.b32.xlu1 %v3012_v42, %s7652_s6  ;;  %v3013_v7 = vmul.f32 %v8845_v14, %v2995_v44  ;;  %v2975_v44 = vmul.f32 %v8853_v10, %v8723_v33 }
0x160d   :  { %v2997_v31 = vpop.permute.xlu1 %2996 }
0x160e   :  { %v3014_v41 = vmul.f32 %v8848_v22, %v2997_v31  ;;  %3034 = vrot.lane.b32.xlu0 %v3013_v7, %s7652_s6 }
0x160f   :  { %v2999_v53 = vpop.permute.xlu0 %2998 }
0x1610   :  { %3036 = vrot.lane.b32.xlu1 %v3014_v41, %s7652_s6  ;;  %v3015_v62 = vmul.f32 %v8853_v10, %v2999_v53  ;;  %v10073_v41 = vld [vmem:[#allocation26_spill] sm:$0xff] }
0x1611   :  { %v641_v39 = vpop.permute.xlu1 %640 }
0x1612   :  { %665 = vst.msk [vmem:[#allocation3] sm:$0x1] %vm664_vm13, %v641_v39  ;;  %3038 = vrot.lane.b32.xlu0 %v3015_v62, %s7652_s6  ;;  %v10075_v62 = vld [vmem:[#allocation8_spill] sm:$0xff] }
0x1613   :  { %v1001_v46 = vpop.permute.xlu0 %1000 }
0x1614   :  { %2760 = vrot.lane.b32.xlu1 %v8740_v20, %s7652_s6  ;;  %1024 = vst.msk [vmem:[#allocation3 + $0x1] sm:$0x1] %vm664_vm13, %v1001_v46 }
0x1615   :  { %v1353_v50 = vpop.permute.xlu1 %1352 }
0x1616   :  { %1376 = vst.msk [vmem:[#allocation3 + $0x2] sm:$0x1] %vm664_vm13, %v1353_v50  ;;  %1002 = vrot.lane.b32.xlu0 %v8066_v60, %s7652_s6 }
0x1617   :  { %v1705_v61 = vpop.permute.xlu0 %1704 }
0x1618   :  { %642 = vrot.lane.b32.xlu1 %v7931_v4, %s7652_s6  ;;  %1728 = vst.msk [vmem:[#allocation3 + $0x3] sm:$0x1] %vm664_vm13, %v1705_v61  ;;  %v2968_v4 = vmul.f32 %v8826_v3, %v8687_v37  ;;  %v2974_v37 = vmul.f32 %v8848_v22, %v8715_v43  ;;  %v10076_v61 = vld [vmem:[#allocation15_spill] sm:$0xff] }
0x1619   :  { %v2057_v16 = vpop.permute.xlu1 %2056 }
0x161a   :  { %2080 = vst.msk [vmem:[#allocation3 + $0x4] sm:$0x1] %vm664_vm13, %v2057_v16  ;;  %1706 = vrot.lane.b32.xlu0 %v8336_v26, %s7652_s6  ;;  %v2971_v26 = vmul.f32 %v8837_v6, %v8707_v17 }
0x161b   :  { %v2409_v20 = vpop.permute.xlu0 %2408 }
0x161c   :  { %1354 = vrot.lane.b32.xlu1 %v8201_v55, %s7652_s6  ;;  %2432 = vst.msk [vmem:[#allocation3 + $0x5] sm:$0x1] %vm664_vm13, %v2409_v20 }
0x161e   :  { %2410 = vrot.lane.b32.xlu0 %v8605_v19, %s7652_s6 }
0x1620   :  { %2058 = vrot.lane.b32.xlu1 %v8470_v27, %s7652_s6  ;;  %v2972_v27 = vmul.f32 %v8840_v5, %v8704_v2 }
0x1622   :  { %1004 = vrot.lane.b32.xlu0 %v8069_v1, %s7652_s6  ;;  %v2969_v1 = vmul.f32 %v8830_v54, %v8694_v9 }
0x1624   :  { %2762 = vrot.lane.b32.xlu1 %v8734_v45, %s7652_s6 }
0x1626   :  { %1708 = vrot.lane.b32.xlu0 %v8339_v49, %s7652_s6 }
0x1628   :  { %644 = vrot.lane.b32.xlu1 %v7934_v8, %s7652_s6 }
0x162a   :  { %2412 = vrot.lane.b32.xlu0 %v8608_v34, %s7652_s6  ;;  %v2973_v34 = vmul.f32 %v8845_v14, %v8717_v52 }
0x162c   :  { %1356 = vrot.lane.b32.xlu1 %v8204_v63, %s7652_s6 }
0x162e   :  { %1006 = vrot.lane.b32.xlu0 %v8082_v40, %s7652_s6 }
0x1630   :  { %2060 = vrot.lane.b32.xlu1 %v8473_v38, %s7652_s6 }
0x1632   :  { %1710 = vrot.lane.b32.xlu0 %v8352_v35, %s7652_s6 }
0x1634   :  { %2764 = vrot.lane.b32.xlu1 %v8737_v18, %s7652_s6 }
0x1636   :  { %2414 = vrot.lane.b32.xlu0 %v8621_v29, %s7652_s6 }
0x1638   :  { %646 = vrot.lane.b32.xlu1 %v7942_v24, %s7652_s6  ;;  %v2970_v24 = vmul.f32 %v8832_v28, %v8696_v21 }
0x163c   :  { %1358 = vrot.lane.b32.xlu1 %v8217_v13, %s7652_s6 }
0x1640   :  { %2062 = vrot.lane.b32.xlu1 %v8486_v36, %s7652_s6 }
0x1644   :  { %2766 = vrot.lane.b32.xlu1 %v8750_v59, %s7652_s6 }
0x1676   :  { %v3025_v8 = vpop.permute.xlu1 %3024 }
0x1677   :  { %v3048_v60 = vadd.f32 %v3025_v8, %v2968_v4  ;;  %v10077_v4 = vld [vmem:[#allocation24_spill] sm:$0xff]  ;;  %v10078_v8 = vld [vmem:[#allocation21_spill] sm:$0xff] }
0x1678   :  { %v3027_v40 = vpop.permute.xlu0 %3026 }
0x1679   :  { %7094 = vtanh.f32 %v3048_v60  ;;  %v3049_v55 = vadd.f32 %v3027_v40, %v2969_v1  ;;  %v10079_v1 = vld [vmem:[#allocation11_spill] sm:$0xff]  ;;  %v10080_v40 = vld [vmem:[#allocation28_spill] sm:$0xff] }
0x167a   :  { %v3029_v63 = vpop.permute.xlu1 %3028 }
0x167b   :  { %v3050_v13 = vadd.f32 %v3029_v63, %v2970_v24  ;;  %7096 = vtanh.f32 %v3049_v55  ;;  %v10081_v55 = vld [vmem:[#allocation17_spill] sm:$0xff] }
0x167c   :  { %v3031_v35 = vpop.permute.xlu0 %3030  ;;  %v10082_v63 = vld [vmem:[#allocation9_spill] sm:$0xff] }
0x167d   :  { %7098 = vtanh.f32 %v3050_v13  ;;  %v3051_v38 = vadd.f32 %v3031_v35, %v2971_v26  ;;  %v10083_v26 = vld [vmem:[#allocation23_spill] sm:$0xff]  ;;  %v10085_v35 = vld [vmem:[#allocation13_spill] sm:$0xff] }
0x167e   :  { %v3033_v36 = vpop.permute.xlu1 %3032 }
0x167f   :  { %v3052_v19 = vadd.f32 %v3033_v36, %v2972_v27  ;;  %7100 = vtanh.f32 %v3051_v38  ;;  %v10086_v27 = vld [vmem:[#allocation20_spill] sm:$0xff]  ;;  %v10087_v38 = vld [vmem:[#allocation19_spill] sm:$0xff] }
0x1680   :  { %v3035_v29 = vpop.permute.xlu0 %3034  ;;  %v10088_v36 = vld [vmem:[#allocation27_spill] sm:$0xff] }
0x1681   :  { %7102 = vtanh.f32 %v3052_v19  ;;  %v3053_v9 = vadd.f32 %v3035_v29, %v2973_v34  ;;  %v10089_v19 = vld [vmem:[#allocation25_spill] sm:$0xff]  ;;  %v10090_v34 = vld [vmem:[#allocation10_spill] sm:$0xff]  ;;  %v10091_v29 = vld [vmem:[#allocation16_spill] sm:$0xff] }
0x1682   :  { %v3037_v21 = vpop.permute.xlu1 %3036 }
0x1683   :  { %v7095_v49 = vpop.eup %7094  ;;  %v3054_v17 = vadd.f32 %v3037_v21, %v2974_v37  ;;  %7104 = vtanh.f32 %v3053_v9  ;;  %v10092_v37 = vld [vmem:[#allocation22_spill] sm:$0xff]  ;;  %v10093_v9 = vld [vmem:[#allocation29_spill] sm:$0xff] }
0x1684   :  { %3072 = vrot.lane.b32.xlu1 %v7095_v49, %s7650_s3  ;;  %v3039_v2 = vpop.permute.xlu0 %3038  ;;  %v10084_v49 = vld [vmem:[#allocation14_spill] sm:$0xff] }
0x1685   :  { %7106 = vtanh.f32 %v3054_v17  ;;  %v7097_v45 = vpop.eup %7096  ;;  %v3055_v31 = vadd.f32 %v3039_v2, %v2975_v44  ;;  %v3144_v21 = vld [vmem:[%s9996_s7] sm:$0xff]  ;;  %v3145_v17 = vld [vmem:[%s9996_s7 + $0x8] sm:$0xff] }
0x1686   :  { %v2761_v18 = vpop.permute.xlu1 %2760  ;;  %3074 = vrot.lane.b32.xlu0 %v7097_v45, %s7650_s3  ;;  %v6529_v45 = vpack.c.bf16 %v3145_v17, %v3144_v21 }
0x1687   :  { %v7099_v59 = vpop.eup %7098  ;;  %2784 = vst.msk [vmem:[#allocation3 + $0x6] sm:$0x1] %vm664_vm13, %v2761_v18  ;;  %7108 = vtanh.f32 %v3055_v31 }
0x1688   :  { %3076 = vrot.lane.b32.xlu1 %v7099_v59, %s7650_s3  ;;  %v1003_v52 = vpop.permute.xlu0 %1002  ;;  %6530 = vmatprep.subr.bf16.mxu1 %v6529_v45  ;;  %v3146_v59 = vld [vmem:[%s9996_s7 + $0x10] sm:$0xff] }
0x1689   :  { %v7101_v25 = vpop.eup %7100  ;;  %1025 = vst.msk [vmem:[#allocation3 + $0x9] sm:$0x1] %vm664_vm13, %v1003_v52  ;;  %6532 = vmatpush3.bf16.msra.mxu1 %v6529_v45  ;;  %v3147_v52 = vld [vmem:[%s9996_s7 + $0x18] sm:$0xff] }
0x168a   :  { %v643_v43 = vpop.permute.xlu1 %642  ;;  %3078 = vrot.lane.b32.xlu0 %v7101_v25, %s7650_s3  ;;  %v6533_v25 = vpack.c.bf16 %v3147_v52, %v3146_v59  ;;  %v10097_v59 = vmov 0.0   ;;  %v6064_v52 = vld [vmem:[%s9998_s9] ss:$0 sm:$0xff] }
0x168b   :  { %v7103_v11 = vpop.eup %7102  ;;  %666 = vst.msk [vmem:[#allocation3 + $0x8] sm:$0x1] %vm664_vm13, %v643_v43  ;;  %v10094_v43 = vmov 0.0|0.0  }
0x168c   :  { %3080 = vrot.lane.b32.xlu1 %v7103_v11, %s7650_s3  ;;  %v1707_v48 = vpop.permute.xlu0 %1706  ;;  %6534 = vmatprep.subr.bf16.mxu1 %v6533_v25 }
0x168d   :  { %v7105_v23 = vpop.eup %7104  ;;  %1729 = vst.msk [vmem:[#allocation3 + $0xb] sm:$0x1] %vm664_vm13, %v1707_v48  ;;  %6536 = vmatpush3.bf16.msra.mxu1 %v6533_v25 }
0x168e   :  { %v1355_v58 = vpop.permute.xlu1 %1354  ;;  %3082 = vrot.lane.b32.xlu0 %v7105_v23, %s7650_s3  ;;  %6549 = vmatprep.subr.bf16.mxu1 %v10094_v43 }
0x168f   :  { %v7107_v0 = vpop.eup %7106  ;;  %1377 = vst.msk [vmem:[#allocation3 + $0xa] sm:$0x1] %vm664_vm13, %v1355_v58 }
0x1690   :  { %3084 = vrot.lane.b32.xlu1 %v7107_v0, %s7650_s3  ;;  %v2411_v57 = vpop.permute.xlu0 %2410 }
0x1691   :  { %2433 = vst.msk [vmem:[#allocation3 + $0xd] sm:$0x1] %vm664_vm13, %v2411_v57  ;;  %v7109_v46 = vpop.eup %7108 }
0x1692   :  { %v2059_v30 = vpop.permute.xlu1 %2058  ;;  %1008 = vrot.lane.b32.xlu0 %v8079_v32, %s7652_s6 }
0x1693   :  { %2081 = vst.msk [vmem:[#allocation3 + $0xc] sm:$0x1] %vm664_vm13, %v2059_v30 }
0x1694   :  { %648 = vrot.lane.b32.xlu1 %v7945_v51, %s7652_s6  ;;  %v1005_v42 = vpop.permute.xlu0 %1004 }
0x1695   :  { %1026 = vst.msk [vmem:[#allocation3 + $0x11] sm:$0x1] %vm664_vm13, %v1005_v42 }
0x1696   :  { %v2763_v7 = vpop.permute.xlu1 %2762  ;;  %1712 = vrot.lane.b32.xlu0 %v8349_v15, %s7652_s6 }
0x1697   :  { %2785 = vst.msk [vmem:[#allocation3 + $0xe] sm:$0x1] %vm664_vm13, %v2763_v7 }
0x1698   :  { %1360 = vrot.lane.b32.xlu1 %v8214_v47, %s7652_s6  ;;  %v1709_v32 = vpop.permute.xlu0 %1708  ;;  %v10072_v47 = vld [vmem:[#allocation12_spill] sm:$0xff] }
0x1699   :  { %1730 = vst.msk [vmem:[#allocation3 + $0x13] sm:$0x1] %vm664_vm13, %v1709_v32 }
0x169a   :  { %v645_v51 = vpop.permute.xlu1 %644  ;;  %2416 = vrot.lane.b32.xlu0 %v8618_v12, %s7652_s6 }
0x169b   :  { %667 = vst.msk [vmem:[#allocation3 + $0x10] sm:$0x1] %vm664_vm13, %v645_v51 }
0x169c   :  { %2064 = vrot.lane.b32.xlu1 %v8483_v56, %s7652_s6  ;;  %v2413_v33 = vpop.permute.xlu0 %2412  ;;  %v10074_v56 = vld [vmem:[#allocation18_spill] sm:$0xff] }
0x169d   :  { %2434 = vst.msk [vmem:[#allocation3 + $0x15] sm:$0x1] %vm664_vm13, %v2413_v33 }
0x169e   :  { %v1357_v15 = vpop.permute.xlu1 %1356  ;;  %1010 = vrot.lane.b32.xlu0 %v10072_v47, %s7652_s6 }
0x169f   :  { %1378 = vst.msk [vmem:[#allocation3 + $0x12] sm:$0x1] %vm664_vm13, %v1357_v15 }
0x16a0   :  { %2768 = vrot.lane.b32.xlu1 %v10073_v41, %s7652_s6  ;;  %v1007_v53 = vpop.permute.xlu0 %1006 }
0x16a1   :  { %1027 = vst.msk [vmem:[#allocation3 + $0x19] sm:$0x1] %vm664_vm13, %v1007_v53 }
0x16a2   :  { %v2061_v12 = vpop.permute.xlu1 %2060  ;;  %1714 = vrot.lane.b32.xlu0 %v10074_v56, %s7652_s6 }
0x16a3   :  { %2082 = vst.msk [vmem:[#allocation3 + $0x14] sm:$0x1] %vm664_vm13, %v2061_v12 }
0x16a4   :  { %650 = vrot.lane.b32.xlu1 %v10075_v62, %s7652_s6  ;;  %v1711_v39 = vpop.permute.xlu0 %1710 }
0x16a5   :  { %1731 = vst.msk [vmem:[#allocation3 + $0x1b] sm:$0x1] %vm664_vm13, %v1711_v39 }
0x16a6   :  { %v2765_v50 = vpop.permute.xlu1 %2764  ;;  %3086 = vrot.lane.b32.xlu0 %v7109_v46, %s7650_s3 }
0x16a7   :  { %2786 = vst.msk [vmem:[#allocation3 + $0x16] sm:$0x1] %vm664_vm13, %v2765_v50 }
0x16a8   :  { %1362 = vrot.lane.b32.xlu1 %v10076_v61, %s7652_s6  ;;  %v2415_v16 = vpop.permute.xlu0 %2414 }
0x16a9   :  { %2435 = vst.msk [vmem:[#allocation3 + $0x1d] sm:$0x1] %vm664_vm13, %v2415_v16 }
0x16aa   :  { %v647_v20 = vpop.permute.xlu1 %646  ;;  %2418 = vrot.lane.b32.xlu0 %v10077_v4, %s7652_s6 }
0x16ab   :  { %668 = vst.msk [vmem:[#allocation3 + $0x18] sm:$0x1] %vm664_vm13, %v647_v20 }
0x16ac   :  { %2066 = vrot.lane.b32.xlu1 %v10078_v8, %s7652_s6 }
0x16ae   :  { %v1359_v60 = vpop.permute.xlu1 %1358  ;;  %1012 = vrot.lane.b32.xlu0 %v10079_v1, %s7652_s6 }
0x16af   :  { %1379 = vst.msk [vmem:[#allocation3 + $0x1a] sm:$0x1] %vm664_vm13, %v1359_v60 }
0x16b0   :  { %2770 = vrot.lane.b32.xlu1 %v10080_v40, %s7652_s6 }
0x16b2   :  { %v2063_v24 = vpop.permute.xlu1 %2062  ;;  %1716 = vrot.lane.b32.xlu0 %v10081_v55, %s7652_s6 }
0x16b3   :  { %2083 = vst.msk [vmem:[#allocation3 + $0x1c] sm:$0x1] %vm664_vm13, %v2063_v24 }
0x16b4   :  { %652 = vrot.lane.b32.xlu1 %v10082_v63, %s7652_s6 }
0x16b6   :  { %v2767_v13 = vpop.permute.xlu1 %2766  ;;  %2420 = vrot.lane.b32.xlu0 %v10083_v26, %s7652_s6 }
0x16b7   :  { %2787 = vst.msk [vmem:[#allocation3 + $0x1e] sm:$0x1] %vm664_vm13, %v2767_v13 }
0x16b8   :  { %1364 = vrot.lane.b32.xlu1 %v10084_v49, %s7652_s6 }
0x16ba   :  { %1014 = vrot.lane.b32.xlu0 %v10085_v35, %s7652_s6 }
0x16bc   :  { %2068 = vrot.lane.b32.xlu1 %v10086_v27, %s7652_s6 }
0x16be   :  { %1718 = vrot.lane.b32.xlu0 %v10087_v38, %s7652_s6  ;;  %v10095_v38 = vld [vmem:[#allocation30_spill] sm:$0xff] }
0x16c0   :  { %2772 = vrot.lane.b32.xlu1 %v10088_v36, %s7652_s6 }
0x16c2   :  { %2422 = vrot.lane.b32.xlu0 %v10089_v19, %s7652_s6 }
0x16c4   :  { %654 = vrot.lane.b32.xlu1 %v10090_v34, %s7652_s6  ;;  %v10096_v34 = vld [vmem:[#allocation31_spill] sm:$0xff] }
0x16c8   :  { %1366 = vrot.lane.b32.xlu1 %v10091_v29, %s7652_s6 }
0x16cc   :  { %2070 = vrot.lane.b32.xlu1 %v10092_v37, %s7652_s6 }
0x16d0   :  { %2774 = vrot.lane.b32.xlu1 %v10093_v9, %s7652_s6 }
0x16f6   :  { %v3073_v2 = vpop.permute.xlu1 %3072 }
0x16f7   :  { %v3096_v18 = vmul.f32 %v8826_v3, %v3073_v2 }
0x16f8   :  { %v3075_v11 = vpop.permute.xlu0 %3074 }
0x16f9   :  { %3112 = vrot.lane.b32.xlu0 %v3096_v18, %s7652_s6  ;;  %v3097_v3 = vmul.f32 %v8830_v54, %v3075_v11 }
0x16fa   :  { %v3077_v48 = vpop.permute.xlu1 %3076 }
0x16fb   :  { %v3098_v58 = vmul.f32 %v8832_v28, %v3077_v48 }
0x16fc   :  { %v3079_v23 = vpop.permute.xlu0 %3078 }
0x16fd   :  { %3114 = vrot.lane.b32.xlu0 %v3097_v3, %s7652_s6  ;;  %v3099_v30 = vmul.f32 %v8837_v6, %v3079_v23 }
0x16fe   :  { %v3081_v0 = vpop.permute.xlu1 %3080 }
0x16ff   :  { %v3100_v7 = vmul.f32 %v8840_v5, %v3081_v0 }
0x1700   :  { %v3083_v57 = vpop.permute.xlu0 %3082 }
0x1701   :  { %3116 = vrot.lane.b32.xlu0 %v3098_v58, %s7652_s6  ;;  %v3101_v31 = vmul.f32 %v8845_v14, %v3083_v57  ;;  %v10098_v58 = vld [vmem:[#allocation32_spill] sm:$0xff] }
0x1702   :  { %v3085_v42 = vpop.permute.xlu1 %3084  ;;  %v3385_v0 = vrot.slane %v10098_v58, 1 }
0x1703   :  { %v3102_v5 = vmul.f32 %v8848_v22, %v3085_v42 }
0x1704   :  { %v1009_v44 = vpop.permute.xlu0 %1008 }
0x1705   :  { %3118 = vrot.lane.b32.xlu0 %v3099_v30, %s7652_s6  ;;  %1028 = vst.msk [vmem:[#allocation3 + $0x21] sm:$0x1] %vm664_vm13, %v1009_v44 }
0x1706   :  { %v649_v54 = vpop.permute.xlu1 %648 }
0x1707   :  { %669 = vst.msk [vmem:[#allocation3 + $0x20] sm:$0x1] %vm664_vm13, %v649_v54 }
0x1708   :  { %v1713_v28 = vpop.permute.xlu0 %1712 }
0x1709   :  { %3120 = vrot.lane.b32.xlu0 %v3100_v7, %s7652_s6  ;;  %1732 = vst.msk [vmem:[#allocation3 + $0x23] sm:$0x1] %vm664_vm13, %v1713_v28 }
0x170a   :  { %v1361_v32 = vpop.permute.xlu1 %1360 }
0x170b   :  { %1380 = vst.msk [vmem:[#allocation3 + $0x22] sm:$0x1] %vm664_vm13, %v1361_v32  ;;  %v3387_v32 = vrot.slane %v10098_v58, 3 }
0x170c   :  { %v2417_v6 = vpop.permute.xlu0 %2416 }
0x170d   :  { %3122 = vrot.lane.b32.xlu0 %v3101_v31, %s7652_s6  ;;  %2436 = vst.msk [vmem:[#allocation3 + $0x25] sm:$0x1] %vm664_vm13, %v2417_v6 }
0x170e   :  { %v2065_v51 = vpop.permute.xlu1 %2064 }
0x170f   :  { %2084 = vst.msk [vmem:[#allocation3 + $0x24] sm:$0x1] %vm664_vm13, %v2065_v51 }
0x1710   :  { %v1011_v33 = vpop.permute.xlu0 %1010 }
0x1711   :  { %3124 = vrot.lane.b32.xlu0 %v3102_v5, %s7652_s6  ;;  %1029 = vst.msk [vmem:[#allocation3 + $0x29] sm:$0x1] %vm664_vm13, %v1011_v33 }
0x1712   :  { %v2769_v14 = vpop.permute.xlu1 %2768 }
0x1713   :  { %2788 = vst.msk [vmem:[#allocation3 + $0x26] sm:$0x1] %vm664_vm13, %v2769_v14  ;;  %v3386_v14 = vrot.slane %v10098_v58, 2 }
0x1714   :  { %v1715_v15 = vpop.permute.xlu0 %1714 }
0x1715   :  { %1733 = vst.msk [vmem:[#allocation3 + $0x2b] sm:$0x1] %vm664_vm13, %v1715_v15 }
0x1716   :  { %v651_v47 = vpop.permute.xlu1 %650 }
0x1717   :  { %670 = vst.msk [vmem:[#allocation3 + $0x28] sm:$0x1] %vm664_vm13, %v651_v47 }
0x1718   :  { %v3087_v22 = vpop.permute.xlu0 %3086 }
0x1719   :  { %v3103_v41 = vmul.f32 %v8853_v10, %v3087_v22 }
0x171a   :  { %v1363_v53 = vpop.permute.xlu1 %1362 }
0x171b   :  { %1381 = vst.msk [vmem:[#allocation3 + $0x2a] sm:$0x1] %vm664_vm13, %v1363_v53  ;;  %3126 = vrot.lane.b32.xlu0 %v3103_v41, %s7652_s6  ;;  %v3389_v53 = vrot.slane %v10098_v58, 5 }
0x171c   :  { %v2419_v12 = vpop.permute.xlu0 %2418 }
0x171d   :  { %2437 = vst.msk [vmem:[#allocation3 + $0x2d] sm:$0x1] %vm664_vm13, %v2419_v12  ;;  %v3388_v12 = vrot.slane %v10098_v58, 4 }
0x171e   :  { %v2067_v56 = vpop.permute.xlu1 %2066 }
0x171f   :  { %2085 = vst.msk [vmem:[#allocation3 + $0x2c] sm:$0x1] %vm664_vm13, %v2067_v56 }
0x1720   :  { %v1013_v62 = vpop.permute.xlu0 %1012 }
0x1721   :  { %1030 = vst.msk [vmem:[#allocation3 + $0x31] sm:$0x1] %vm664_vm13, %v1013_v62 }
0x1722   :  { %v2771_v39 = vpop.permute.xlu1 %2770 }
0x1723   :  { %2789 = vst.msk [vmem:[#allocation3 + $0x2e] sm:$0x1] %vm664_vm13, %v2771_v39 }
0x1724   :  { %v1717_v46 = vpop.permute.xlu0 %1716 }
0x1725   :  { %1734 = vst.msk [vmem:[#allocation3 + $0x33] sm:$0x1] %vm664_vm13, %v1717_v46 }
0x1726   :  { %v653_v10 = vpop.permute.xlu1 %652 }
0x1727   :  { %671 = vst.msk [vmem:[#allocation3 + $0x30] sm:$0x1] %vm664_vm13, %v653_v10 }
0x1728   :  { %v2421_v50 = vpop.permute.xlu0 %2420 }
0x1729   :  { %2438 = vst.msk [vmem:[#allocation3 + $0x35] sm:$0x1] %vm664_vm13, %v2421_v50 }
0x172a   :  { %v1365_v61 = vpop.permute.xlu1 %1364 }
0x172b   :  { %1382 = vst.msk [vmem:[#allocation3 + $0x32] sm:$0x1] %vm664_vm13, %v1365_v61 }
0x172c   :  { %v1015_v16 = vpop.permute.xlu0 %1014 }
0x172d   :  { %1031 = vst.msk [vmem:[#allocation3 + $0x39] sm:$0x1] %vm664_vm13, %v1015_v16 }
0x172e   :  { %v2069_v20 = vpop.permute.xlu1 %2068 }
0x172f   :  { %2086 = vst.msk [vmem:[#allocation3 + $0x34] sm:$0x1] %vm664_vm13, %v2069_v20 }
0x1730   :  { %v1719_v4 = vpop.permute.xlu0 %1718 }
0x1731   :  { %1735 = vst.msk [vmem:[#allocation3 + $0x3b] sm:$0x1] %vm664_vm13, %v1719_v4 }
0x1732   :  { %v2773_v8 = vpop.permute.xlu1 %2772 }
0x1733   :  { %2790 = vst.msk [vmem:[#allocation3 + $0x36] sm:$0x1] %vm664_vm13, %v2773_v8 }
0x1734   :  { %v2423_v60 = vpop.permute.xlu0 %2422 }
0x1735   :  { %2439 = vst.msk [vmem:[#allocation3 + $0x3d] sm:$0x1] %vm664_vm13, %v2423_v60 }
0x1736   :  { %v655_v1 = vpop.permute.xlu1 %654 }
0x1737   :  { %672 = vst.msk [vmem:[#allocation3 + $0x38] sm:$0x1] %vm664_vm13, %v655_v1 }
0x173a   :  { %v1367_v40 = vpop.permute.xlu1 %1366 }
0x173b   :  { %1383 = vst.msk [vmem:[#allocation3 + $0x3a] sm:$0x1] %vm664_vm13, %v1367_v40  ;;  %v3391_v40 = vrot.slane %v10098_v58, 7 }
0x173e   :  { %v2071_v24 = vpop.permute.xlu1 %2070 }
0x173f   :  { %2087 = vst.msk [vmem:[#allocation3 + $0x3c] sm:$0x1] %vm664_vm13, %v2071_v24  ;;  %v3390_v24 = vrot.slane %v10098_v58, 6 }
0x1742   :  { %v2775_v55 = vpop.permute.xlu1 %2774 }
0x1743   :  { %2791 = vst.msk [vmem:[#allocation3 + $0x3e] sm:$0x1] %vm664_vm13, %v2775_v55 }
0x176b   :  { %v3113_v63 = vpop.permute.xlu0 %3112 }
0x176c   :  { %3136 = vst.msk [vmem:[#allocation3 + $0x7] sm:$0x1] %vm664_vm13, %v3113_v63 }
0x176f   :  { %v3115_v26 = vpop.permute.xlu0 %3114 }
0x1770   :  { %3137 = vst.msk [vmem:[#allocation3 + $0xf] sm:$0x1] %vm664_vm13, %v3115_v26 }
0x1773   :  { %v3153_v13 = vld [vmem:[#allocation3] sm:$0xff]  ;;  %v3117_v49 = vpop.permute.xlu0 %3116 }
0x1774   :  { %6370 = vmatprep.mubr.msk.f32.mxu1 %vm311_vm5, %v3153_v13  ;;  %3138 = vst.msk [vmem:[#allocation3 + $0x17] sm:$0x1] %vm664_vm13, %v3117_v49 }
0x1777   :  { %v3119_v35 = vpop.permute.xlu0 %3118  ;;  %v3154_v27 = vld [vmem:[#allocation3 + $0x8] sm:$0xff] }
0x1778   :  { %3139 = vst.msk [vmem:[#allocation3 + $0x1f] sm:$0x1] %vm664_vm13, %v3119_v35  ;;  %6371 = vmatmul.mubr.msk.f32.vlgmr.msra.gmra.mrb[14].mxu1 %vm311_vm5, %v3154_v27  ;;  %v10099_v27 = vld [vmem:[#allocation7_spill] sm:$0xff] }
0x1779   :  { %6551 = vmatpush3.bf16.msra.mxu1 %v10095_v38 }
0x177a   :  { %6552 = vmatprep.subr.bf16.mxu1 %v10094_v43 }
0x177b   :  { %v3121_v36 = vpop.permute.xlu0 %3120  ;;  %v3155_v19 = vld [vmem:[#allocation3 + $0x10] sm:$0xff] }
0x177c   :  { %3140 = vst.msk [vmem:[#allocation3 + $0x27] sm:$0x1] %vm664_vm13, %v3121_v36  ;;  %6373 = vmatprep.mubr.msk.f32.mxu1 %vm311_vm5, %v3155_v19  ;;  %v10100_v36 = vrot.slane %v10099_v27, 2  ;;  %v10101_v19 = vrot.slane %v10099_v27, 1 }
0x177d   :  { %6554 = vmatpush3.bf16.msra.mxu1 %v10096_v34 }
0x177e   :  { %6561 = vmatprep.subr.bf16.mxu1 %v10094_v43 }
0x177f   :  { %v3123_v29 = vpop.permute.xlu0 %3122  ;;  %v3156_v37 = vld [vmem:[#allocation3 + $0x18] sm:$0xff] }
0x1780   :  { %3141 = vst.msk [vmem:[#allocation3 + $0x2f] sm:$0x1] %vm664_vm13, %v3123_v29  ;;  %6374 = vmatmul.mubr.msk.f32.gmra.mrb[16].mxu1 %vm311_vm5, %v3156_v37  ;;  %v10102_v29 = vrot.slane %v10099_v27, 3  ;;  %v10103_v37 = vrot.slane %v10099_v27, 4 }
0x1783   :  { %v3125_v9 = vpop.permute.xlu0 %3124  ;;  %v3157_v21 = vld [vmem:[#allocation3 + $0x20] sm:$0xff] }
0x1784   :  { %3142 = vst.msk [vmem:[#allocation3 + $0x37] sm:$0x1] %vm664_vm13, %v3125_v9  ;;  %6376 = vmatprep.mubr.msk.f32.mxu1 %vm311_vm5, %v3157_v21  ;;  %v10104_v9 = vrot.slane %v10099_v27, 6  ;;  %v10105_v21 = vrot.slane %v10099_v27, 5 }
0x1787   :  { %v3158_v17 = vld [vmem:[#allocation3 + $0x28] sm:$0xff] }
0x1788   :  { %6377 = vmatmul.mubr.msk.f32.gmra.mrb[18].mxu1 %vm311_vm5, %v3158_v17  ;;  %v10106_v17 = vrot.slane %v10099_v27, 7 }
0x178b   :  { %v3159_v2 = vld [vmem:[#allocation3 + $0x30] sm:$0xff] }
0x178c   :  { %6379 = vmatprep.mubr.msk.f32.mxu1 %vm311_vm5, %v3159_v2 }
0x178d   :  { %v3127_v45 = vpop.permute.xlu0 %3126 }
0x178e   :  { %3143 = vst.msk [vmem:[#allocation3 + $0x3f] sm:$0x1] %vm664_vm13, %v3127_v45 }
0x1795   :  { %v3160_v18 = vld [vmem:[#allocation3 + $0x38] sm:$0xff] }
0x1796   :  { %6380 = vmatmul.mubr.msk.f32.gmra.mrb[20].mxu1 %vm311_vm5, %v3160_v18 }
0x1797   :  { %6412 = vmatprep.mubr.msk.f32.mxu1 %vm7648_vm0, %v10097_v59 }
0x184b   :  { %v6372_v25 = vpop.f32.mrb[14].mxu1 }
0x184c   :  { %v3263_v11 = vadd.f32 %v6372_v25, %v6064_v52  ;;  %v3257_v3 = vpop.f32.mrb[15].mxu1 }
0x184d   :  { %v3258_v48 = vadd.f32 %v6064_v52, %v3257_v3 }
0x184e   :  { %3297 = vst [vmem:[#allocation2 + $0x8] sm:$0xff] %v3263_v11 }
0x184f   :  { %3296 = vst [vmem:[#allocation2] sm:$0xff] %v3258_v48 }
0x1853   :  { %v6375_v23 = vpop.f32.mrb[16].mxu1 }
0x1854   :  { %v3273_v57 = vadd.f32 %v6375_v23, %v6064_v52  ;;  %v3267_v30 = vpop.f32.mrb[17].mxu1 }
0x1855   :  { %v3268_v42 = vadd.f32 %v6064_v52, %v3267_v30  ;;  %v3305_v44 = vld [vmem:[#allocation2 + $0x8] sm:$0x1] }
0x1856   :  { %3299 = vst [vmem:[#allocation2 + $0x18] sm:$0xff] %v3273_v57  ;;  %v9093_v7 = vadd.f32 %v3385_v0, %v3305_v44  ;;  %v3304_v54 = vld [vmem:[#allocation2] sm:$0x1] }
0x1857   :  { %3298 = vst [vmem:[#allocation2 + $0x10] sm:$0xff] %v3268_v42  ;;  %v9097_v28 = vadd.f32 %v10098_v58, %v3304_v54 }
0x1858   :  { %7110 = vtanh.f32 %v9093_v7  ;;  %v6075_v2 = vmul.f32 -1.442695, %v9093_v7 }
0x1859   :  { %7112 = vtanh.f32 %v9097_v28  ;;  %v6074_v45 = vmul.f32 -1.442695, %v9097_v28 }
0x185b   :  { %v6378_v31 = vpop.f32.mrb[18].mxu1 }
0x185c   :  { %v3283_v6 = vadd.f32 %v6378_v31, %v6064_v52  ;;  %v3277_v5 = vpop.f32.mrb[19].mxu1 }
0x185d   :  { %v3278_v51 = vadd.f32 %v6064_v52, %v3277_v5  ;;  %v3307_v33 = vld [vmem:[#allocation2 + $0x18] sm:$0x1] }
0x185e   :  { %3301 = vst [vmem:[#allocation2 + $0x28] sm:$0xff] %v3283_v6  ;;  %v3403_v15 = vadd.f32 %v3387_v32, %v3307_v33  ;;  %v3306_v47 = vld [vmem:[#allocation2 + $0x10] sm:$0x1] }
0x185f   :  { %3300 = vst [vmem:[#allocation2 + $0x20] sm:$0xff] %v3278_v51  ;;  %v3402_v22 = vadd.f32 %v3386_v14, %v3306_v47 }
0x1860   :  { %7114 = vtanh.f32 %v3403_v15  ;;  %v6077_v18 = vmul.f32 -1.442695, %v3403_v15 }
0x1861   :  { %7116 = vtanh.f32 %v3402_v22 }
0x1862   :  { %v7111_v41 = vpop.eup %7110 }
0x1863   :  { %3506 = vrot.lane.b32.xlu1 %v7111_v41, %s7650_s3  ;;  %v7113_v62 = vpop.eup %7112 }
0x1865   :  { %v3309_v56 = vld [vmem:[#allocation2 + $0x28] sm:$0x1] }
0x1866   :  { %v3405_v39 = vadd.f32 %v3389_v53, %v3309_v56  ;;  %v3308_v46 = vld [vmem:[#allocation2 + $0x20] sm:$0x1] }
0x1867   :  { %3504 = vrot.lane.b32.xlu1 %v7113_v62, %s7650_s3  ;;  %v3404_v10 = vadd.f32 %v3388_v12, %v3308_v46 }
0x1868   :  { %7118 = vtanh.f32 %v3405_v39  ;;  %v6079_v11 = vmul.f32 -1.442695, %v3405_v39 }
0x1869   :  { %7120 = vtanh.f32 %v3404_v10  ;;  %v6381_v61 = vpop.f32.mrb[20].mxu1  ;;  %v6078_v23 = vmul.f32 -1.442695, %v3404_v10 }
0x186a   :  { %v7115_v50 = vpop.eup %7114  ;;  %v3293_v16 = vadd.f32 %v6381_v61, %v6064_v52  ;;  %v3287_v20 = vpop.f32.mrb[21].mxu1 }
0x186b   :  { %3510 = vrot.lane.b32.xlu0 %v7115_v50, %s7650_s3  ;;  %v3288_v4 = vadd.f32 %v6064_v52, %v3287_v20  ;;  %v7117_v8 = vpop.eup %7116  ;;  %v6076_v52 = vmul.f32 -1.442695, %v3402_v22 }
0x186c   :  { %3303 = vst [vmem:[#allocation2 + $0x38] sm:$0xff] %v3293_v16 }
0x186d   :  { %3302 = vst [vmem:[#allocation2 + $0x30] sm:$0xff] %v3288_v4 }
0x186f   :  { %3508 = vrot.lane.b32.xlu0 %v7117_v8, %s7650_s3 }
0x1872   :  { %v7119_v60 = vpop.eup %7118 }
0x1873   :  { %v7121_v1 = vpop.eup %7120  ;;  %3514 = vrot.lane.b32.xlu0 %v7119_v60, %s7650_s3  ;;  %v3311_v55 = vld [vmem:[#allocation2 + $0x38] sm:$0x1] }
0x1874   :  { %3512 = vrot.lane.b32.xlu1 %v7121_v1, %s7650_s3  ;;  %v3407_v63 = vadd.f32 %v3391_v40, %v3311_v55  ;;  %v3310_v13 = vld [vmem:[#allocation2 + $0x30] sm:$0x1] }
0x1875   :  { %v3406_v26 = vadd.f32 %v3390_v24, %v3310_v13 }
0x1876   :  { %7122 = vtanh.f32 %v3407_v63  ;;  %v6081_v32 = vmul.f32 -1.442695, %v3407_v63 }
0x1877   :  { %7124 = vtanh.f32 %v3406_v26  ;;  %v6080_v6 = vmul.f32 -1.442695, %v3406_v26 }
0x1878   :  { %7126 = vpow2.f32 %v6075_v2 }
0x1879   :  { %7128 = vpow2.f32 %v6074_v45 }
0x187a   :  { %7130 = vpow2.f32 %v6077_v18 }
0x187b   :  { %7132 = vpow2.f32 %v6076_v52 }
0x187c   :  { %7134 = vpow2.f32 %v6079_v11 }
0x1880   :  { %v7123_v49 = vpop.eup %7122 }
0x1881   :  { %v7125_v35 = vpop.eup %7124  ;;  %3518 = vrot.lane.b32.xlu0 %v7123_v49, %s7650_s3 }
0x1882   :  { %3516 = vrot.lane.b32.xlu1 %v7125_v35, %s7650_s3  ;;  %v7127_v25 = vpop.eup %7126 }
0x1883   :  { %v3433_v3 = vadd.f32 1.0, %v7127_v25  ;;  %v7129_v48 = vpop.eup %7128 }
0x1884   :  { %v3432_v58 = vadd.f32 1.0, %v7129_v48  ;;  %v7131_v0 = vpop.eup %7130 }
0x1885   :  { %3468 = vrot.lane.b32.xlu0 %v10100_v36, %s7650_s3  ;;  %7136 = vrcp.f32 %v3433_v3  ;;  %v3435_v57 = vadd.f32 1.0, %v7131_v0  ;;  %v7133_v30 = vpop.eup %7132 }
0x1886   :  { %3466 = vrot.lane.b32.xlu1 %v10101_v19, %s7650_s3  ;;  %7138 = vpow2.f32 %v6078_v23  ;;  %v7135_v42 = vpop.eup %7134  ;;  %v3434_v44 = vadd.f32 1.0, %v7133_v30 }
0x1887   :  { %7140 = vrcp.f32 %v3432_v58  ;;  %v3437_v28 = vadd.f32 1.0, %v7135_v42 }
0x1888   :  { %7142 = vrcp.f32 %v3435_v57 }
0x1889   :  { %3470 = vrot.lane.b32.xlu0 %v10102_v29, %s7650_s3  ;;  %7144 = vrcp.f32 %v3434_v44 }
0x188a   :  { %3464 = vrot.lane.b32.xlu1 %v10099_v27, %s7650_s3  ;;  %7146 = vrcp.f32 %v3437_v28 }
0x188b   :  { %7148 = vpow2.f32 %v6081_v32 }
0x188c   :  { %7150 = vpow2.f32 %v6080_v6 }
0x188d   :  { %3472 = vrot.lane.b32.xlu0 %v10103_v37, %s7650_s3 }
0x188e   :  { %3476 = vrot.lane.b32.xlu1 %v10104_v9, %s7650_s3 }
0x188f   :  { %v9139_v7 = vpop.eup %7136 }
0x1890   :  { %v7139_v5 = vpop.eup %7138 }
0x1891   :  { %3474 = vrot.lane.b32.xlu0 %v10105_v21, %s7650_s3  ;;  %v9143_v51 = vpop.eup %7140  ;;  %v3436_v15 = vadd.f32 1.0, %v7139_v5 }
0x1892   :  { %3478 = vrot.lane.b32.xlu1 %v10106_v17, %s7650_s3  ;;  %v9147_v47 = vpop.eup %7142 }
0x1893   :  { %7152 = vrcp.f32 %v3436_v15  ;;  %v9151_v53 = vpop.eup %7144 }
0x1894   :  { %v9154_v62 = vpop.eup %7146 }
0x1895   :  { %v7149_v39 = vpop.eup %7148 }
0x1896   :  { %v7151_v46 = vpop.eup %7150  ;;  %v3439_v16 = vadd.f32 1.0, %v7149_v39 }
0x1897   :  { %v3438_v20 = vadd.f32 1.0, %v7151_v46 }
0x1898   :  { %7154 = vrcp.f32 %v3439_v16 }
0x1899   :  { %7156 = vrcp.f32 %v3438_v20 }
0x189d   :  { %v9159_v4 = vpop.eup %7152 }
0x18a2   :  { %v9163_v60 = vpop.eup %7154 }
0x18a3   :  { %v9165_v40 = vpop.eup %7156 }
0x18d5   :  { %v3507_v54 = vpop.permute.xlu1 %3506 }
0x18d6   :  { %v3529_v31 = vmul.f32 %v9139_v7, %v3507_v54 }
0x18d8   :  { %3546 = vrot.lane.b32.xlu1 %v3529_v31, %s7652_s6 }
0x18d9   :  { %v3505_v33 = vpop.permute.xlu1 %3504 }
0x18da   :  { %v3528_v14 = vmul.f32 %v9143_v51, %v3505_v33 }
0x18dc   :  { %3544 = vrot.lane.b32.xlu1 %v3528_v14, %s7652_s6 }
0x18dd   :  { %v3511_v22 = vpop.permute.xlu0 %3510 }
0x18de   :  { %v3531_v41 = vmul.f32 %v9147_v47, %v3511_v22 }
0x18e0   :  { %3550 = vrot.lane.b32.xlu0 %v3531_v41, %s7652_s6 }
0x18e1   :  { %v3509_v12 = vpop.permute.xlu0 %3508 }
0x18e2   :  { %v3530_v56 = vmul.f32 %v9151_v53, %v3509_v12 }
0x18e4   :  { %3548 = vrot.lane.b32.xlu1 %v3530_v56, %s7652_s6 }
0x18e5   :  { %v3515_v10 = vpop.permute.xlu0 %3514 }
0x18e6   :  { %v3533_v50 = vmul.f32 %v9154_v62, %v3515_v10  ;;  %v3513_v61 = vpop.permute.xlu1 %3512 }
0x18e7   :  { %v3532_v8 = vmul.f32 %v9159_v4, %v3513_v61 }
0x18e8   :  { %3554 = vrot.lane.b32.xlu0 %v3533_v50, %s7652_s6 }
0x18ec   :  { %3552 = vrot.lane.b32.xlu0 %v3532_v8, %s7652_s6 }
0x18f3   :  { %v3519_v1 = vpop.permute.xlu0 %3518 }
0x18f4   :  { %v3535_v24 = vmul.f32 %v9163_v60, %v3519_v1  ;;  %v3517_v55 = vpop.permute.xlu1 %3516 }
0x18f5   :  { %v3534_v63 = vmul.f32 %v9165_v40, %v3517_v55 }
0x18f6   :  { %3558 = vrot.lane.b32.xlu0 %v3535_v24, %s7652_s6 }
0x18f7   :  { %3556 = vrot.lane.b32.xlu1 %v3534_v63, %s7652_s6  ;;  %v3469_v49 = vpop.permute.xlu0 %3468 }
0x18f8   :  { %v3467_v13 = vpop.permute.xlu1 %3466  ;;  %v3490_v11 = vmul.f32 %v9151_v53, %v3469_v49 }
0x18f9   :  { %v3489_v29 = vmul.f32 %v9139_v7, %v3467_v13 }
0x18fb   :  { %v3471_v27 = vpop.permute.xlu0 %3470 }
0x18fc   :  { %v3465_v26 = vpop.permute.xlu1 %3464  ;;  %v3491_v18 = vmul.f32 %v9147_v47, %v3471_v27 }
0x18fd   :  { %v3488_v21 = vmul.f32 %v9143_v51, %v3465_v26 }
0x18ff   :  { %v3473_v19 = vpop.permute.xlu0 %3472 }
0x1900   :  { %v3477_v35 = vpop.permute.xlu1 %3476  ;;  %v3492_v42 = vmul.f32 %v9159_v4, %v3473_v19 }
0x1901   :  { %v3494_v5 = vmul.f32 %v9165_v40, %v3477_v35 }
0x1903   :  { %v3475_v17 = vpop.permute.xlu0 %3474 }
0x1904   :  { %v3479_v36 = vpop.permute.xlu1 %3478  ;;  %v3493_v58 = vmul.f32 %v9154_v62, %v3475_v17 }
0x1905   :  { %v3495_v6 = vmul.f32 %v9163_v60, %v3479_v36 }
0x194a   :  { %v3547_v37 = vpop.permute.xlu1 %3546 }
0x194b   :  { %v9172_v9 = vadd.f32 %v3547_v37, %v3489_v29 }
0x194d   :  { %7158 = vtanh.f32 %v9172_v9 }
0x194e   :  { %v3545_v2 = vpop.permute.xlu1 %3544 }
0x194f   :  { %v9176_v45 = vadd.f32 %v3545_v2, %v3488_v21 }
0x1951   :  { %7160 = vtanh.f32 %v9176_v45 }
0x1952   :  { %v3551_v52 = vpop.permute.xlu0 %3550 }
0x1953   :  { %v9180_v25 = vadd.f32 %v3551_v52, %v3491_v18 }
0x1955   :  { %7162 = vtanh.f32 %v9180_v25 }
0x1956   :  { %v3549_v3 = vpop.permute.xlu1 %3548 }
0x1957   :  { %v7159_v48 = vpop.eup %7158  ;;  %v9184_v23 = vadd.f32 %v3549_v3, %v3490_v11 }
0x1958   :  { %3594 = vrot.lane.b32.xlu1 %v7159_v48, %s7650_s3 }
0x1959   :  { %7164 = vtanh.f32 %v9184_v23 }
0x195a   :  { %v3555_v0 = vpop.permute.xlu0 %3554 }
0x195b   :  { %v7161_v57 = vpop.eup %7160  ;;  %v9189_v30 = vadd.f32 %v3555_v0, %v3493_v58  ;;  %v3625_v58 = vld [vmem:[#allocation2 + $0x9] sm:$0x1]  ;;  %v3626_v0 = vld [vmem:[#allocation2 + $0x11] sm:$0x1] }
0x195c   :  { %3592 = vrot.lane.b32.xlu1 %v7161_v57, %s7650_s3 }
0x195d   :  { %7166 = vtanh.f32 %v9189_v30 }
0x195e   :  { %v3553_v44 = vpop.permute.xlu0 %3552 }
0x195f   :  { %v7163_v54 = vpop.eup %7162  ;;  %v9194_v28 = vadd.f32 %v3553_v44, %v3492_v42 }
0x1960   :  { %3598 = vrot.lane.b32.xlu0 %v7163_v54, %s7650_s3 }
0x1961   :  { %7168 = vtanh.f32 %v9194_v28 }
0x1963   :  { %v7165_v31 = vpop.eup %7164 }
0x1964   :  { %3596 = vrot.lane.b32.xlu0 %v7165_v31, %s7650_s3  ;;  %v3628_v31 = vld [vmem:[#allocation2 + $0x21] sm:$0x1] }
0x1967   :  { %v7167_v32 = vpop.eup %7166 }
0x1968   :  { %3602 = vrot.lane.b32.xlu0 %v7167_v32, %s7650_s3  ;;  %v3559_v33 = vpop.permute.xlu0 %3558  ;;  %v3627_v32 = vld [vmem:[#allocation2 + $0x19] sm:$0x1] }
0x1969   :  { %v9202_v15 = vadd.f32 %v3559_v33, %v3495_v6  ;;  %v3557_v22 = vpop.permute.xlu1 %3556 }
0x196a   :  { %v9204_v41 = vadd.f32 %v3557_v22, %v3494_v5 }
0x196b   :  { %v7169_v14 = vpop.eup %7168  ;;  %7170 = vtanh.f32 %v9202_v15 }
0x196c   :  { %3600 = vrot.lane.b32.xlu1 %v7169_v14, %s7650_s3  ;;  %7172 = vtanh.f32 %v9204_v41 }
0x1975   :  { %v7171_v12 = vpop.eup %7170 }
0x1976   :  { %v7173_v56 = vpop.eup %7172  ;;  %3606 = vrot.lane.b32.xlu0 %v7171_v12, %s7650_s3  ;;  %v3630_v12 = vld [vmem:[#allocation2 + $0x31] sm:$0x1] }
0x1977   :  { %3604 = vrot.lane.b32.xlu1 %v7173_v56, %s7650_s3  ;;  %v3629_v56 = vld [vmem:[#allocation2 + $0x29] sm:$0x1] }
0x19ca   :  { %v3595_v39 = vpop.permute.xlu1 %3594 }
0x19cb   :  { %v3617_v16 = vmul.f32 %v9139_v7, %v3595_v39 }
0x19cd   :  { %v3640_v55 = vrot.slane %v3617_v16, 7 }
0x19ce   :  { %v3593_v10 = vpop.permute.xlu1 %3592 }
0x19cf   :  { %v3616_v8 = vmul.f32 %v9143_v51, %v3593_v10 }
0x19d1   :  { %v3641_v26 = vsel %vm682_vm6, %v3640_v55, %v3616_v8 }
0x19d2   :  { %v3599_v46 = vpop.permute.xlu0 %3598 }
0x19d3   :  { %v3619_v63 = vmul.f32 %v9147_v47, %v3599_v46 }
0x19d5   :  { %v3644_v27 = vrot.slane %v3619_v63, 5 }
0x19d6   :  { %v3597_v50 = vpop.permute.xlu0 %3596 }
0x19d7   :  { %v3618_v61 = vmul.f32 %v9151_v53, %v3597_v50  ;;  %v3631_v50 = vld [vmem:[#allocation2 + $0x39] sm:$0x1] }
0x19d9   :  { %v3642_v1 = vrot.slane %v3618_v61, 6 }
0x19da   :  { %v3603_v13 = vpop.permute.xlu0 %3602 }
0x19db   :  { %v3643_v49 = vsel %vm685_vm7, %v3642_v1, %v3641_v26  ;;  %v3621_v53 = vmul.f32 %v9154_v62, %v3603_v13 }
0x19dc   :  { %v3645_v7 = vsel %vm688_vm8, %v3644_v27, %v3643_v49 }
0x19dd   :  { %v3648_v47 = vrot.slane %v3621_v53, 3 }
0x19de   :  { %v3601_v20 = vpop.permute.xlu1 %3600 }
0x19df   :  { %v3620_v24 = vmul.f32 %v9159_v4, %v3601_v20 }
0x19e1   :  { %v3646_v35 = vrot.slane %v3620_v24, 4 }
0x19e3   :  { %v3647_v4 = vsel %vm691_vm9, %v3646_v35, %v3645_v7 }
0x19e4   :  { %v3649_v17 = vsel %vm694_vm10, %v3648_v47, %v3647_v4 }
0x19e8   :  { %v3607_v36 = vpop.permute.xlu0 %3606 }
0x19e9   :  { %v3623_v51 = vmul.f32 %v9163_v60, %v3607_v36  ;;  %v3605_v19 = vpop.permute.xlu1 %3604 }
0x19ea   :  { %v3622_v29 = vmul.f32 %v9165_v40, %v3605_v19  ;;  %v3624_v40 = vld [vmem:[#allocation2 + $0x1] sm:$0x1] }
0x19eb   :  { %v3652_v21 = vrot.slane %v3623_v51, 1 }
0x19ec   :  { %v3650_v37 = vrot.slane %v3622_v29, 2 }
0x19ee   :  { %v3651_v2 = vsel %vm697_vm11, %v3650_v37, %v3649_v17 }
0x19ef   :  { %v3653_v18 = vsel %vm700_vm12, %v3652_v21, %v3651_v2 }
0x19f0   :  { %3654 = vrot.lane.b32.xlu1 %v3653_v18, %s7652_s6 }
0x1a62   :  { %v3655_v62 = vpop.permute.xlu1 %3654 }
0x1a63   :  { %6402 = vmatmul.mubr.msk.f32.vlgmr.msra.gmra.mrb[14].mxu0 %vm311_vm5, %v3655_v62 }
0x1a64   :  { %6557 = vmatpush3.bf16.msra.mxu0 %v10095_v38  ;;  %6423 = vmatprep.mubr.msk.f32.mxu0 %vm7648_vm0, %v10097_v59 }
0x1a65   :  { %6558 = vmatprep.subr.bf16.mxu0 %v10094_v43 }
0x1a68   :  { %6560 = vmatpush3.bf16.msra.mxu0 %v10096_v34 }
0x1a69   :  { %6567 = vmatprep.subr.bf16.mxu0 %v10094_v43 }
0x1b36   :  { %v3724_v60 = vpop.f32.mrb[14].mxu0 }
0x1b37   :  { %v6403_v52 = vpop.f32.mrb[15].mxu0  ;;  %v3744_v11 = vadd.f32 %v3724_v60, %v3624_v40  ;;  %v3729_v3 = vrot.slane %v3724_v60, 1  ;;  %v3730_v48 = vrot.slane %v3724_v60, 2  ;;  %v3732_v57 = vrot.slane %v3724_v60, 4 }
0x1b38   :  { %v3731_v44 = vrot.slane %v3724_v60, 3  ;;  %v3734_v6 = vrot.slane %v3724_v60, 6  ;;  %v3733_v14 = vrot.slane %v3724_v60, 5  ;;  %v3735_v46 = vrot.slane %v3724_v60, 7 }
0x1b39   :  { %7174 = vtanh.f32 %v3744_v11  ;;  %v3745_v42 = vadd.f32 %v3729_v3, %v3625_v58  ;;  %v3746_v54 = vadd.f32 %v3730_v48, %v3626_v0  ;;  %v3748_v5 = vadd.f32 %v3732_v57, %v3628_v31 }
0x1b3a   :  { %v3747_v22 = vadd.f32 %v3731_v44, %v3627_v32  ;;  %v3750_v39 = vadd.f32 %v3734_v6, %v3630_v12  ;;  %v3749_v10 = vadd.f32 %v3733_v14, %v3629_v56  ;;  %v3751_v61 = vadd.f32 %v3735_v46, %v3631_v50 }
0x1b3b   :  { %7176 = vtanh.f32 %v3745_v42  ;;  %v6083_v13 = vmul.f32 -1.442695, %v3744_v11  ;;  %v6084_v26 = vmul.f32 -1.442695, %v3745_v42  ;;  %v6085_v49 = vmul.f32 -1.442695, %v3746_v54 }
0x1b3c   :  { %7178 = vtanh.f32 %v3746_v54  ;;  %v6087_v35 = vmul.f32 -1.442695, %v3748_v5  ;;  %v6086_v53 = vmul.f32 -1.442695, %v3747_v22  ;;  %v6089_v36 = vmul.f32 -1.442695, %v3750_v39 }
0x1b3d   :  { %7180 = vtanh.f32 %v3748_v5  ;;  %v6088_v51 = vmul.f32 -1.442695, %v3749_v10  ;;  %v6090_v19 = vmul.f32 -1.442695, %v3751_v61 }
0x1b3e   :  { %7182 = vtanh.f32 %v3747_v22 }
0x1b3f   :  { %7184 = vtanh.f32 %v3750_v39 }
0x1b40   :  { %7186 = vtanh.f32 %v3749_v10 }
0x1b41   :  { %7188 = vtanh.f32 %v3751_v61 }
0x1b42   :  { %7190 = vpow2.f32 %v6083_v13 }
0x1b43   :  { %v7175_v33 = vpop.eup %7174  ;;  %7192 = vpow2.f32 %v6084_v26 }
0x1b44   :  { %3824 = vrot.lane.b32.xlu0 %v7175_v33, %s7650_s3  ;;  %7194 = vpow2.f32 %v6085_v49 }
0x1b45   :  { %v7177_v16 = vpop.eup %7176  ;;  %7196 = vpow2.f32 %v6087_v35 }
0x1b46   :  { %v7179_v20 = vpop.eup %7178  ;;  %7198 = vpow2.f32 %v6086_v53 }
0x1b47   :  { %3828 = vrot.lane.b32.xlu1 %v7179_v20, %s7650_s3  ;;  %v7181_v8 = vpop.eup %7180  ;;  %7200 = vpow2.f32 %v6089_v36 }
0x1b48   :  { %3826 = vrot.lane.b32.xlu0 %v7177_v16, %s7650_s3  ;;  %v7183_v1 = vpop.eup %7182 }
0x1b49   :  { %v7185_v24 = vpop.eup %7184 }
0x1b4a   :  { %v7187_v55 = vpop.eup %7186 }
0x1b4b   :  { %3830 = vrot.lane.b32.xlu1 %v7183_v1, %s7650_s3  ;;  %v7189_v63 = vpop.eup %7188 }
0x1b4c   :  { %3832 = vrot.lane.b32.xlu0 %v7181_v8, %s7650_s3  ;;  %v7191_v27 = vpop.eup %7190 }
0x1b4d   :  { %v3776_v7 = vadd.f32 1.0, %v7191_v27  ;;  %v7193_v4 = vpop.eup %7192 }
0x1b4e   :  { %v7195_v29 = vpop.eup %7194  ;;  %v3777_v47 = vadd.f32 1.0, %v7193_v4 }
0x1b4f   :  { %3834 = vrot.lane.b32.xlu1 %v7187_v55, %s7650_s3  ;;  %7202 = vrcp.f32 %v3776_v7  ;;  %v7197_v37 = vpop.eup %7196  ;;  %v3778_v21 = vadd.f32 1.0, %v7195_v29 }
0x1b50   :  { %3836 = vrot.lane.b32.xlu0 %v7185_v24, %s7650_s3  ;;  %7204 = vpow2.f32 %v6088_v51  ;;  %v7199_v17 = vpop.eup %7198  ;;  %v3780_v18 = vadd.f32 1.0, %v7197_v37 }
0x1b51   :  { %7206 = vpow2.f32 %v6090_v19  ;;  %v7201_v2 = vpop.eup %7200  ;;  %v3779_v40 = vadd.f32 1.0, %v7199_v17 }
0x1b52   :  { %7208 = vrcp.f32 %v3777_v47  ;;  %v3782_v3 = vadd.f32 1.0, %v7201_v2 }
0x1b53   :  { %3838 = vrot.lane.b32.xlu1 %v7189_v63, %s7650_s3  ;;  %7210 = vrcp.f32 %v3778_v21 }
0x1b54   :  { %7212 = vrcp.f32 %v3780_v18 }
0x1b55   :  { %7214 = vrcp.f32 %v3779_v40 }
0x1b56   :  { %7216 = vrcp.f32 %v3782_v3 }
0x1b59   :  { %v9242_v62 = vpop.eup %7202 }
0x1b5a   :  { %v7205_v52 = vpop.eup %7204  ;;  %v3808_v1 = vmul.f32 %v9242_v62, %v9176_v45 }
0x1b5b   :  { %v3781_v48 = vadd.f32 1.0, %v7205_v52  ;;  %v7207_v58 = vpop.eup %7206 }
0x1b5c   :  { %v3783_v0 = vadd.f32 1.0, %v7207_v58  ;;  %v9246_v57 = vpop.eup %7208 }
0x1b5d   :  { %7218 = vrcp.f32 %v3781_v48  ;;  %v9248_v44 = vpop.eup %7210  ;;  %v3809_v63 = vmul.f32 %v9246_v57, %v9172_v9 }
0x1b5e   :  { %7220 = vrcp.f32 %v3783_v0  ;;  %v9253_v6 = vpop.eup %7212  ;;  %v3810_v13 = vmul.f32 %v9248_v44, %v9184_v23 }
0x1b5f   :  { %v9256_v33 = vpop.eup %7214  ;;  %v3812_v45 = vmul.f32 %v9253_v6, %v9194_v28 }
0x1b60   :  { %v9261_v56 = vpop.eup %7216  ;;  %v3811_v9 = vmul.f32 %v9256_v33, %v9180_v25 }
0x1b61   :  { %v3814_v19 = vmul.f32 %v9261_v56, %v9204_v41 }
0x1b67   :  { %v9264_v46 = vpop.eup %7218 }
0x1b68   :  { %v9270_v16 = vpop.eup %7220  ;;  %v3813_v28 = vmul.f32 %v9264_v46, %v9189_v30 }
0x1b69   :  { %v3815_v37 = vmul.f32 %v9270_v16, %v9202_v15 }
0x1bb6   :  { %v3825_v60 = vpop.permute.xlu0 %3824 }
0x1bb7   :  { %v3848_v11 = vmul.f32 %v9242_v62, %v3825_v60 }
0x1bb9   :  { %3864 = vrot.lane.b32.xlu0 %v3848_v11, %s7652_s6  ;;  %v3829_v54 = vpop.permute.xlu1 %3828 }
0x1bba   :  { %v3827_v42 = vpop.permute.xlu0 %3826  ;;  %v3850_v32 = vmul.f32 %v9248_v44, %v3829_v54 }
0x1bbb   :  { %v3849_v31 = vmul.f32 %v9246_v57, %v3827_v42 }
0x1bbc   :  { %3868 = vrot.lane.b32.xlu1 %v3850_v32, %s7652_s6 }
0x1bbd   :  { %3866 = vrot.lane.b32.xlu0 %v3849_v31, %s7652_s6  ;;  %v3831_v14 = vpop.permute.xlu1 %3830 }
0x1bbe   :  { %v3833_v5 = vpop.permute.xlu0 %3832  ;;  %v3851_v12 = vmul.f32 %v9256_v33, %v3831_v14 }
0x1bbf   :  { %v3852_v22 = vmul.f32 %v9253_v6, %v3833_v5 }
0x1bc0   :  { %3870 = vrot.lane.b32.xlu1 %v3851_v12, %s7652_s6 }
0x1bc1   :  { %3872 = vrot.lane.b32.xlu0 %v3852_v22, %s7652_s6  ;;  %v3835_v10 = vpop.permute.xlu1 %3834 }
0x1bc2   :  { %v3837_v39 = vpop.permute.xlu0 %3836  ;;  %v3853_v61 = vmul.f32 %v9264_v46, %v3835_v10 }
0x1bc3   :  { %v3854_v50 = vmul.f32 %v9261_v56, %v3837_v39 }
0x1bc4   :  { %3874 = vrot.lane.b32.xlu1 %v3853_v61, %s7652_s6 }
0x1bc5   :  { %3876 = vrot.lane.b32.xlu0 %v3854_v50, %s7652_s6  ;;  %v3839_v20 = vpop.permute.xlu1 %3838 }
0x1bc6   :  { %v3855_v8 = vmul.f32 %v9270_v16, %v3839_v20 }
0x1bc8   :  { %3878 = vrot.lane.b32.xlu1 %v3855_v8, %s7652_s6 }
0x1c2b   :  { %v3865_v24 = vpop.permute.xlu0 %3864 }
0x1c2c   :  { %v9276_v55 = vadd.f32 %v3865_v24, %v3808_v1 }
0x1c2e   :  { %7222 = vtanh.f32 %v9276_v55  ;;  %v3869_v49 = vpop.permute.xlu1 %3868 }
0x1c2f   :  { %v3867_v26 = vpop.permute.xlu0 %3866  ;;  %v9285_v27 = vadd.f32 %v3869_v49, %v3810_v13 }
0x1c30   :  { %v9283_v35 = vadd.f32 %v3867_v26, %v3809_v63 }
0x1c32   :  { %7224 = vtanh.f32 %v9283_v35  ;;  %v3871_v7 = vpop.permute.xlu1 %3870 }
0x1c33   :  { %7226 = vtanh.f32 %v9285_v27  ;;  %v3873_v36 = vpop.permute.xlu0 %3872  ;;  %v9296_v51 = vadd.f32 %v3871_v7, %v3811_v9  ;;  %v3946_v7 = vld [vmem:[#allocation2 + $0x12] sm:$0x1] }
0x1c34   :  { %v9293_v23 = vadd.f32 %v3873_v36, %v3812_v45  ;;  %v3945_v36 = vld [vmem:[#allocation2 + $0xa] sm:$0x1] }
0x1c36   :  { %7228 = vtanh.f32 %v9293_v23  ;;  %v3875_v25 = vpop.permute.xlu1 %3874 }
0x1c37   :  { %7230 = vtanh.f32 %v9296_v51  ;;  %v3877_v4 = vpop.permute.xlu0 %3876  ;;  %v9306_v47 = vadd.f32 %v3875_v25, %v3813_v28 }
0x1c38   :  { %v7223_v53 = vpop.eup %7222  ;;  %v9304_v29 = vadd.f32 %v3877_v4, %v3814_v19 }
0x1c39   :  { %3912 = vrot.lane.b32.xlu0 %v7223_v53, %s7650_s3 }
0x1c3a   :  { %7232 = vtanh.f32 %v9304_v29  ;;  %v3879_v41 = vpop.permute.xlu1 %3878 }
0x1c3b   :  { %7234 = vtanh.f32 %v9306_v47  ;;  %v9312_v2 = vadd.f32 %v3879_v41, %v3815_v37  ;;  %v3948_v37 = vld [vmem:[#allocation2 + $0x22] sm:$0x1] }
0x1c3c   :  { %v7225_v21 = vpop.eup %7224 }
0x1c3d   :  { %v7227_v17 = vpop.eup %7226  ;;  %3914 = vrot.lane.b32.xlu0 %v7225_v21, %s7650_s3  ;;  %7236 = vtanh.f32 %v9312_v2  ;;  %v3947_v21 = vld [vmem:[#allocation2 + $0x1a] sm:$0x1] }
0x1c3e   :  { %3916 = vrot.lane.b32.xlu1 %v7227_v17, %s7650_s3 }
0x1c40   :  { %v7229_v30 = vpop.eup %7228 }
0x1c41   :  { %v7231_v18 = vpop.eup %7230  ;;  %3920 = vrot.lane.b32.xlu0 %v7229_v30, %s7650_s3 }
0x1c42   :  { %3918 = vrot.lane.b32.xlu1 %v7231_v18, %s7650_s3 }
0x1c44   :  { %v7233_v60 = vpop.eup %7232 }
0x1c45   :  { %v7235_v40 = vpop.eup %7234  ;;  %3924 = vrot.lane.b32.xlu0 %v7233_v60, %s7650_s3 }
0x1c46   :  { %3922 = vrot.lane.b32.xlu1 %v7235_v40, %s7650_s3  ;;  %v3950_v40 = vld [vmem:[#allocation2 + $0x32] sm:$0x1] }
0x1c47   :  { %v7237_v15 = vpop.eup %7236 }
0x1c4a   :  { %3926 = vrot.lane.b32.xlu1 %v7237_v15, %s7650_s3  ;;  %v3949_v15 = vld [vmem:[#allocation2 + $0x2a] sm:$0x1] }
0x1cab   :  { %v3913_v52 = vpop.permute.xlu0 %3912 }
0x1cac   :  { %v3936_v0 = vmul.f32 %v9242_v62, %v3913_v52 }
0x1caf   :  { %v3915_v11 = vpop.permute.xlu0 %3914 }
0x1cb0   :  { %v3917_v3 = vpop.permute.xlu1 %3916  ;;  %v3937_v48 = vmul.f32 %v9246_v57, %v3915_v11 }
0x1cb1   :  { %v3938_v58 = vmul.f32 %v9248_v44, %v3917_v3 }
0x1cb2   :  { %v3960_v42 = vrot.slane %v3937_v48, 7  ;;  %v3951_v48 = vld [vmem:[#allocation2 + $0x3a] sm:$0x1] }
0x1cb3   :  { %v3921_v54 = vpop.permute.xlu0 %3920  ;;  %v3962_v31 = vrot.slane %v3938_v58, 6 }
0x1cb4   :  { %v3961_v32 = vsel %vm682_vm6, %v3960_v42, %v3936_v0  ;;  %v3919_v5 = vpop.permute.xlu1 %3918  ;;  %v3940_v14 = vmul.f32 %v9253_v6, %v3921_v54 }
0x1cb5   :  { %v3939_v22 = vmul.f32 %v9256_v33, %v3919_v5  ;;  %v3963_v12 = vsel %vm685_vm7, %v3962_v31, %v3961_v32 }
0x1cb6   :  { %v3966_v39 = vrot.slane %v3940_v14, 4 }
0x1cb7   :  { %v3964_v10 = vrot.slane %v3939_v22, 5  ;;  %v3925_v50 = vpop.permute.xlu0 %3924 }
0x1cb8   :  { %v3923_v57 = vpop.permute.xlu1 %3922  ;;  %v3942_v44 = vmul.f32 %v9261_v56, %v3925_v50 }
0x1cb9   :  { %v3965_v62 = vsel %vm688_vm8, %v3964_v10, %v3963_v12  ;;  %v3941_v61 = vmul.f32 %v9264_v46, %v3923_v57 }
0x1cba   :  { %v3967_v20 = vsel %vm691_vm9, %v3966_v39, %v3965_v62  ;;  %v3970_v8 = vrot.slane %v3942_v44, 2 }
0x1cbb   :  { %v3968_v1 = vrot.slane %v3941_v61, 3 }
0x1cbc   :  { %v3927_v24 = vpop.permute.xlu1 %3926 }
0x1cbd   :  { %v3969_v6 = vsel %vm694_vm10, %v3968_v1, %v3967_v20  ;;  %v3943_v33 = vmul.f32 %v9270_v16, %v3927_v24  ;;  %v3944_v16 = vld [vmem:[#allocation2 + $0x2] sm:$0x1] }
0x1cbe   :  { %v3971_v63 = vsel %vm697_vm11, %v3970_v8, %v3969_v6 }
0x1cbf   :  { %v3972_v13 = vrot.slane %v3943_v33, 1 }
0x1cc1   :  { %v3973_v26 = vsel %vm700_vm12, %v3972_v13, %v3971_v63 }
0x1cc2   :  { %3974 = vrot.lane.b32.xlu0 %v3973_v26, %s7652_s6 }
0x1d34   :  { %v3975_v56 = vpop.permute.xlu0 %3974 }
0x1d35   :  { %6413 = vmatmul.mubr.msk.f32.vlgmr.msra.gmra.mrb[22].mxu1 %vm311_vm5, %v3975_v56 }
0x1d36   :  { %6563 = vmatpush3.bf16.msra.mxu1 %v10095_v38  ;;  %6434 = vmatprep.mubr.msk.f32.mxu1 %vm7648_vm0, %v10097_v59 }
0x1d37   :  { %6564 = vmatprep.subr.bf16.mxu1 %v10094_v43 }
0x1d3a   :  { %6566 = vmatpush3.bf16.msra.mxu1 %v10096_v34 }
0x1d3b   :  { %6573 = vmatprep.subr.bf16.mxu1 %v10094_v43 }
0x1e08   :  { %v4044_v46 = vpop.f32.mrb[22].mxu1 }
0x1e09   :  { %v6414_v49 = vpop.f32.mrb[23].mxu1  ;;  %v4064_v45 = vadd.f32 %v4044_v46, %v3944_v16  ;;  %v4049_v53 = vrot.slane %v4044_v46, 1  ;;  %v4050_v9 = vrot.slane %v4044_v46, 2  ;;  %v4052_v19 = vrot.slane %v4044_v46, 4 }
0x1e0a   :  { %v4051_v4 = vrot.slane %v4044_v46, 3  ;;  %v4054_v41 = vrot.slane %v4044_v46, 6  ;;  %v4053_v18 = vrot.slane %v4044_v46, 5  ;;  %v4055_v11 = vrot.slane %v4044_v46, 7 }
0x1e0b   :  { %7238 = vtanh.f32 %v4064_v45  ;;  %v4065_v28 = vadd.f32 %v4049_v53, %v3945_v36  ;;  %v4066_v25 = vadd.f32 %v4050_v9, %v3946_v7  ;;  %v4068_v17 = vadd.f32 %v4052_v19, %v3948_v37 }
0x1e0c   :  { %v4067_v60 = vadd.f32 %v4051_v4, %v3947_v21  ;;  %v4070_v52 = vadd.f32 %v4054_v41, %v3950_v40  ;;  %v4069_v3 = vadd.f32 %v4053_v18, %v3949_v15  ;;  %v4071_v58 = vadd.f32 %v4055_v11, %v3951_v48 }
0x1e0d   :  { %7240 = vtanh.f32 %v4065_v28  ;;  %v6092_v22 = vmul.f32 -1.442695, %v4064_v45  ;;  %v6093_v12 = vmul.f32 -1.442695, %v4065_v28  ;;  %v6094_v39 = vmul.f32 -1.442695, %v4066_v25 }
0x1e0e   :  { %7242 = vtanh.f32 %v4066_v25  ;;  %v6096_v10 = vmul.f32 -1.442695, %v4068_v17  ;;  %v6095_v57 = vmul.f32 -1.442695, %v4067_v60  ;;  %v6098_v44 = vmul.f32 -1.442695, %v4070_v52 }
0x1e0f   :  { %7244 = vtanh.f32 %v4068_v17  ;;  %v6097_v61 = vmul.f32 -1.442695, %v4069_v3  ;;  %v6099_v20 = vmul.f32 -1.442695, %v4071_v58 }
0x1e10   :  { %7246 = vtanh.f32 %v4067_v60 }
0x1e11   :  { %7248 = vtanh.f32 %v4070_v52 }
0x1e12   :  { %7250 = vtanh.f32 %v4069_v3 }
0x1e13   :  { %7252 = vtanh.f32 %v4071_v58 }
0x1e14   :  { %7254 = vpow2.f32 %v6092_v22 }
0x1e15   :  { %v7239_v30 = vpop.eup %7238  ;;  %7256 = vpow2.f32 %v6093_v12 }
0x1e16   :  { %4144 = vrot.lane.b32.xlu1 %v7239_v30, %s7650_s3  ;;  %7258 = vpow2.f32 %v6094_v39 }
0x1e17   :  { %v7241_v0 = vpop.eup %7240  ;;  %7260 = vpow2.f32 %v6096_v10 }
0x1e18   :  { %v7243_v42 = vpop.eup %7242  ;;  %7262 = vpow2.f32 %v6095_v57 }
0x1e19   :  { %4148 = vrot.lane.b32.xlu0 %v7243_v42, %s7650_s3  ;;  %v7245_v54 = vpop.eup %7244  ;;  %7264 = vpow2.f32 %v6098_v44 }
0x1e1a   :  { %4146 = vrot.lane.b32.xlu1 %v7241_v0, %s7650_s3  ;;  %v7247_v31 = vpop.eup %7246 }
0x1e1b   :  { %v7249_v32 = vpop.eup %7248 }
0x1e1c   :  { %v7251_v5 = vpop.eup %7250 }
0x1e1d   :  { %4150 = vrot.lane.b32.xlu0 %v7247_v31, %s7650_s3  ;;  %v7253_v14 = vpop.eup %7252 }
0x1e1e   :  { %4152 = vrot.lane.b32.xlu1 %v7245_v54, %s7650_s3  ;;  %v7255_v50 = vpop.eup %7254 }
0x1e1f   :  { %v4096_v62 = vadd.f32 1.0, %v7255_v50  ;;  %v7257_v8 = vpop.eup %7256 }
0x1e20   :  { %v7259_v1 = vpop.eup %7258  ;;  %v4097_v24 = vadd.f32 1.0, %v7257_v8 }
0x1e21   :  { %4154 = vrot.lane.b32.xlu0 %v7251_v5, %s7650_s3  ;;  %7266 = vrcp.f32 %v4096_v62  ;;  %v7261_v6 = vpop.eup %7260  ;;  %v4098_v33 = vadd.f32 1.0, %v7259_v1 }
0x1e22   :  { %4156 = vrot.lane.b32.xlu1 %v7249_v32, %s7650_s3  ;;  %7268 = vpow2.f32 %v6097_v61  ;;  %v7263_v63 = vpop.eup %7262  ;;  %v4100_v26 = vadd.f32 1.0, %v7261_v6 }
0x1e23   :  { %7270 = vpow2.f32 %v6099_v20  ;;  %v7265_v13 = vpop.eup %7264  ;;  %v4099_v16 = vadd.f32 1.0, %v7263_v63 }
0x1e24   :  { %7272 = vrcp.f32 %v4097_v24  ;;  %v4102_v53 = vadd.f32 1.0, %v7265_v13 }
0x1e25   :  { %4158 = vrot.lane.b32.xlu0 %v7253_v14, %s7650_s3  ;;  %7274 = vrcp.f32 %v4098_v33 }
0x1e26   :  { %7276 = vrcp.f32 %v4100_v26 }
0x1e27   :  { %7278 = vrcp.f32 %v4099_v16 }
0x1e28   :  { %7280 = vrcp.f32 %v4102_v53 }
0x1e2b   :  { %v9353_v56 = vpop.eup %7266 }
0x1e2c   :  { %v7269_v49 = vpop.eup %7268  ;;  %v4128_v31 = vmul.f32 %v9353_v56, %v9276_v55 }
0x1e2d   :  { %v4101_v9 = vadd.f32 1.0, %v7269_v49  ;;  %v7271_v36 = vpop.eup %7270 }
0x1e2e   :  { %v4103_v7 = vadd.f32 1.0, %v7271_v36  ;;  %v9357_v19 = vpop.eup %7272 }
0x1e2f   :  { %7282 = vrcp.f32 %v4101_v9  ;;  %v9359_v4 = vpop.eup %7274  ;;  %v4129_v14 = vmul.f32 %v9357_v19, %v9283_v35 }
0x1e30   :  { %7284 = vrcp.f32 %v4103_v7  ;;  %v9364_v41 = vpop.eup %7276  ;;  %v4130_v22 = vmul.f32 %v9359_v4, %v9285_v27 }
0x1e31   :  { %v9367_v30 = vpop.eup %7278  ;;  %v4132_v55 = vmul.f32 %v9364_v41, %v9293_v23 }
0x1e32   :  { %v9372_v15 = vpop.eup %7280  ;;  %v4131_v35 = vmul.f32 %v9367_v30, %v9296_v51 }
0x1e33   :  { %v4134_v20 = vmul.f32 %v9372_v15, %v9304_v29 }
0x1e39   :  { %v9375_v11 = vpop.eup %7282 }
0x1e3a   :  { %v9381_v0 = vpop.eup %7284  ;;  %v4133_v23 = vmul.f32 %v9375_v11, %v9306_v47 }
0x1e3b   :  { %v4135_v6 = vmul.f32 %v9381_v0, %v9312_v2 }
0x1e88   :  { %v4145_v46 = vpop.permute.xlu1 %4144 }
0x1e89   :  { %v4168_v45 = vmul.f32 %v9353_v56, %v4145_v46 }
0x1e8b   :  { %4184 = vrot.lane.b32.xlu1 %v4168_v45, %s7652_s6  ;;  %v4149_v25 = vpop.permute.xlu0 %4148 }
0x1e8c   :  { %v4147_v28 = vpop.permute.xlu1 %4146  ;;  %v4170_v21 = vmul.f32 %v9359_v4, %v4149_v25 }
0x1e8d   :  { %v4169_v37 = vmul.f32 %v9357_v19, %v4147_v28 }
0x1e8e   :  { %4188 = vrot.lane.b32.xlu0 %v4170_v21, %s7652_s6 }
0x1e8f   :  { %4186 = vrot.lane.b32.xlu1 %v4169_v37, %s7652_s6  ;;  %v4151_v18 = vpop.permute.xlu0 %4150 }
0x1e90   :  { %v4153_v17 = vpop.permute.xlu1 %4152  ;;  %v4171_v40 = vmul.f32 %v9367_v30, %v4151_v18 }
0x1e91   :  { %v4172_v60 = vmul.f32 %v9364_v41, %v4153_v17 }
0x1e92   :  { %4190 = vrot.lane.b32.xlu0 %v4171_v40, %s7652_s6 }
0x1e93   :  { %4192 = vrot.lane.b32.xlu1 %v4172_v60, %s7652_s6  ;;  %v4155_v3 = vpop.permute.xlu0 %4154 }
0x1e94   :  { %v4157_v52 = vpop.permute.xlu1 %4156  ;;  %v4173_v58 = vmul.f32 %v9375_v11, %v4155_v3 }
0x1e95   :  { %v4174_v48 = vmul.f32 %v9372_v15, %v4157_v52 }
0x1e96   :  { %4194 = vrot.lane.b32.xlu0 %v4173_v58, %s7652_s6 }
0x1e97   :  { %4196 = vrot.lane.b32.xlu1 %v4174_v48, %s7652_s6  ;;  %v4159_v42 = vpop.permute.xlu0 %4158 }
0x1e98   :  { %v4175_v54 = vmul.f32 %v9381_v0, %v4159_v42 }
0x1e9a   :  { %4198 = vrot.lane.b32.xlu0 %v4175_v54, %s7652_s6 }
0x1efd   :  { %v4185_v32 = vpop.permute.xlu1 %4184 }
0x1efe   :  { %v9387_v5 = vadd.f32 %v4185_v32, %v4128_v31 }
0x1f00   :  { %7286 = vtanh.f32 %v9387_v5  ;;  %v4189_v39 = vpop.permute.xlu0 %4188 }
0x1f01   :  { %v4187_v12 = vpop.permute.xlu1 %4186  ;;  %v9396_v50 = vadd.f32 %v4189_v39, %v4130_v22 }
0x1f02   :  { %v9394_v10 = vadd.f32 %v4187_v12, %v4129_v14 }
0x1f04   :  { %7288 = vtanh.f32 %v9394_v10  ;;  %v4191_v62 = vpop.permute.xlu0 %4190 }
0x1f05   :  { %7290 = vtanh.f32 %v9396_v50  ;;  %v4193_v44 = vpop.permute.xlu1 %4192  ;;  %v9407_v61 = vadd.f32 %v4191_v62, %v4131_v35  ;;  %v4266_v62 = vld [vmem:[#allocation2 + $0x13] sm:$0x1] }
0x1f06   :  { %v9404_v27 = vadd.f32 %v4193_v44, %v4132_v55  ;;  %v4265_v44 = vld [vmem:[#allocation2 + $0xb] sm:$0x1] }
0x1f08   :  { %7292 = vtanh.f32 %v9404_v27  ;;  %v4195_v51 = vpop.permute.xlu0 %4194 }
0x1f09   :  { %7294 = vtanh.f32 %v9407_v61  ;;  %v4197_v8 = vpop.permute.xlu1 %4196  ;;  %v9417_v24 = vadd.f32 %v4195_v51, %v4133_v23 }
0x1f0a   :  { %v7287_v57 = vpop.eup %7286  ;;  %v9415_v1 = vadd.f32 %v4197_v8, %v4134_v20 }
0x1f0b   :  { %4232 = vrot.lane.b32.xlu1 %v7287_v57, %s7650_s3 }
0x1f0c   :  { %7296 = vtanh.f32 %v9415_v1  ;;  %v4199_v29 = vpop.permute.xlu0 %4198 }
0x1f0d   :  { %7298 = vtanh.f32 %v9417_v24  ;;  %v9423_v13 = vadd.f32 %v4199_v29, %v4135_v6  ;;  %v4268_v6 = vld [vmem:[#allocation2 + $0x23] sm:$0x1] }
0x1f0e   :  { %v7289_v33 = vpop.eup %7288 }
0x1f0f   :  { %v7291_v63 = vpop.eup %7290  ;;  %4234 = vrot.lane.b32.xlu1 %v7289_v33, %s7650_s3  ;;  %7300 = vtanh.f32 %v9423_v13  ;;  %v4267_v33 = vld [vmem:[#allocation2 + $0x1b] sm:$0x1] }
0x1f10   :  { %4236 = vrot.lane.b32.xlu0 %v7291_v63, %s7650_s3 }
0x1f12   :  { %v7293_v47 = vpop.eup %7292 }
0x1f13   :  { %v7295_v26 = vpop.eup %7294  ;;  %4240 = vrot.lane.b32.xlu1 %v7293_v47, %s7650_s3 }
0x1f14   :  { %4238 = vrot.lane.b32.xlu0 %v7295_v26, %s7650_s3 }
0x1f16   :  { %v7297_v46 = vpop.eup %7296 }
0x1f17   :  { %v7299_v16 = vpop.eup %7298  ;;  %4244 = vrot.lane.b32.xlu1 %v7297_v46, %s7650_s3 }
0x1f18   :  { %4242 = vrot.lane.b32.xlu0 %v7299_v16, %s7650_s3  ;;  %v4270_v16 = vld [vmem:[#allocation2 + $0x33] sm:$0x1] }
0x1f19   :  { %v7301_v2 = vpop.eup %7300 }
0x1f1c   :  { %4246 = vrot.lane.b32.xlu0 %v7301_v2, %s7650_s3  ;;  %v4269_v2 = vld [vmem:[#allocation2 + $0x2b] sm:$0x1] }
0x1f7d   :  { %v4233_v49 = vpop.permute.xlu1 %4232 }
0x1f7e   :  { %v4256_v7 = vmul.f32 %v9353_v56, %v4233_v49 }
0x1f81   :  { %v4235_v45 = vpop.permute.xlu1 %4234 }
0x1f82   :  { %v4237_v53 = vpop.permute.xlu0 %4236  ;;  %v4257_v9 = vmul.f32 %v9357_v19, %v4235_v45 }
0x1f83   :  { %v4258_v36 = vmul.f32 %v9359_v4, %v4237_v53 }
0x1f84   :  { %v4280_v28 = vrot.slane %v4257_v9, 7  ;;  %v4271_v9 = vld [vmem:[#allocation2 + $0x3b] sm:$0x1] }
0x1f85   :  { %v4241_v25 = vpop.permute.xlu1 %4240  ;;  %v4282_v37 = vrot.slane %v4258_v36, 6 }
0x1f86   :  { %v4281_v21 = vsel %vm682_vm6, %v4280_v28, %v4256_v7  ;;  %v4239_v17 = vpop.permute.xlu0 %4238  ;;  %v4260_v18 = vmul.f32 %v9364_v41, %v4241_v25 }
0x1f87   :  { %v4259_v60 = vmul.f32 %v9367_v30, %v4239_v17  ;;  %v4283_v40 = vsel %vm685_vm7, %v4282_v37, %v4281_v21 }
0x1f88   :  { %v4286_v52 = vrot.slane %v4260_v18, 4 }
0x1f89   :  { %v4284_v3 = vrot.slane %v4259_v60, 5  ;;  %v4245_v48 = vpop.permute.xlu1 %4244 }
0x1f8a   :  { %v4243_v19 = vpop.permute.xlu0 %4242  ;;  %v4262_v4 = vmul.f32 %v9372_v15, %v4245_v48 }
0x1f8b   :  { %v4285_v56 = vsel %vm688_vm8, %v4284_v3, %v4283_v40  ;;  %v4261_v58 = vmul.f32 %v9375_v11, %v4243_v19 }
0x1f8c   :  { %v4287_v42 = vsel %vm691_vm9, %v4286_v52, %v4285_v56  ;;  %v4290_v54 = vrot.slane %v4262_v4, 2 }
0x1f8d   :  { %v4288_v31 = vrot.slane %v4261_v58, 3 }
0x1f8e   :  { %v4247_v32 = vpop.permute.xlu0 %4246 }
0x1f8f   :  { %v4289_v41 = vsel %vm694_vm10, %v4288_v31, %v4287_v42  ;;  %v4263_v30 = vmul.f32 %v9381_v0, %v4247_v32  ;;  %v4264_v0 = vld [vmem:[#allocation2 + $0x3] sm:$0x1] }
0x1f90   :  { %v4291_v14 = vsel %vm697_vm11, %v4290_v54, %v4289_v41 }
0x1f91   :  { %v4292_v22 = vrot.slane %v4263_v30, 1 }
0x1f93   :  { %v4293_v12 = vsel %vm700_vm12, %v4292_v22, %v4291_v14 }
0x1f94   :  { %4294 = vrot.lane.b32.xlu1 %v4293_v12, %s7652_s6 }
0x2006   :  { %v4295_v15 = vpop.permute.xlu1 %4294 }
0x2007   :  { %6424 = vmatmul.mubr.msk.f32.vlgmr.msra.gmra.mrb[16].mxu0 %vm311_vm5, %v4295_v15 }
0x2008   :  { %6569 = vmatpush3.bf16.msra.mxu0 %v10095_v38  ;;  %6445 = vmatprep.mubr.msk.f32.mxu0 %vm7648_vm0, %v10097_v59 }
0x2009   :  { %6570 = vmatprep.subr.bf16.mxu0 %v10094_v43 }
0x200c   :  { %6572 = vmatpush3.bf16.msra.mxu0 %v10096_v34 }
0x200d   :  { %6579 = vmatprep.subr.bf16.mxu0 %v10094_v43 }
0x20da   :  { %v4364_v11 = vpop.f32.mrb[16].mxu0 }
0x20db   :  { %v6425_v39 = vpop.f32.mrb[17].mxu0  ;;  %v4384_v55 = vadd.f32 %v4364_v11, %v4264_v0  ;;  %v4369_v57 = vrot.slane %v4364_v11, 1  ;;  %v4370_v35 = vrot.slane %v4364_v11, 2  ;;  %v4372_v20 = vrot.slane %v4364_v11, 4 }
0x20dc   :  { %v4371_v8 = vrot.slane %v4364_v11, 3  ;;  %v4374_v29 = vrot.slane %v4364_v11, 6  ;;  %v4373_v26 = vrot.slane %v4364_v11, 5  ;;  %v4375_v45 = vrot.slane %v4364_v11, 7 }
0x20dd   :  { %7302 = vtanh.f32 %v4384_v55  ;;  %v4385_v23 = vadd.f32 %v4369_v57, %v4265_v44  ;;  %v4386_v51 = vadd.f32 %v4370_v35, %v4266_v62  ;;  %v4388_v63 = vadd.f32 %v4372_v20, %v4268_v6 }
0x20de   :  { %v4387_v46 = vadd.f32 %v4371_v8, %v4267_v33  ;;  %v4390_v49 = vadd.f32 %v4374_v29, %v4270_v16  ;;  %v4389_v53 = vadd.f32 %v4373_v26, %v4269_v2  ;;  %v4391_v36 = vadd.f32 %v4375_v45, %v4271_v9 }
0x20df   :  { %7304 = vtanh.f32 %v4385_v23  ;;  %v6101_v60 = vmul.f32 -1.442695, %v4384_v55  ;;  %v6102_v40 = vmul.f32 -1.442695, %v4385_v23  ;;  %v6103_v52 = vmul.f32 -1.442695, %v4386_v51 }
0x20e0   :  { %7306 = vtanh.f32 %v4386_v51  ;;  %v6105_v3 = vmul.f32 -1.442695, %v4388_v63  ;;  %v6104_v19 = vmul.f32 -1.442695, %v4387_v46  ;;  %v6107_v4 = vmul.f32 -1.442695, %v4390_v49 }
0x20e1   :  { %7308 = vtanh.f32 %v4388_v63  ;;  %v6106_v58 = vmul.f32 -1.442695, %v4389_v53  ;;  %v6108_v42 = vmul.f32 -1.442695, %v4391_v36 }
0x20e2   :  { %7310 = vtanh.f32 %v4387_v46 }
0x20e3   :  { %7312 = vtanh.f32 %v4390_v49 }
0x20e4   :  { %7314 = vtanh.f32 %v4389_v53 }
0x20e5   :  { %7316 = vtanh.f32 %v4391_v36 }
0x20e6   :  { %7318 = vpow2.f32 %v6101_v60 }
0x20e7   :  { %v7303_v47 = vpop.eup %7302  ;;  %7320 = vpow2.f32 %v6102_v40 }
0x20e8   :  { %4464 = vrot.lane.b32.xlu0 %v7303_v47, %s7650_s3  ;;  %7322 = vpow2.f32 %v6103_v52 }
0x20e9   :  { %v7305_v7 = vpop.eup %7304  ;;  %7324 = vpow2.f32 %v6105_v3 }
0x20ea   :  { %v7307_v28 = vpop.eup %7306  ;;  %7326 = vpow2.f32 %v6104_v19 }
0x20eb   :  { %4468 = vrot.lane.b32.xlu1 %v7307_v28, %s7650_s3  ;;  %v7309_v25 = vpop.eup %7308  ;;  %7328 = vpow2.f32 %v6107_v4 }
0x20ec   :  { %4466 = vrot.lane.b32.xlu0 %v7305_v7, %s7650_s3  ;;  %v7311_v37 = vpop.eup %7310 }
0x20ed   :  { %v7313_v21 = vpop.eup %7312 }
0x20ee   :  { %v7315_v17 = vpop.eup %7314 }
0x20ef   :  { %4470 = vrot.lane.b32.xlu1 %v7311_v37, %s7650_s3  ;;  %v7317_v18 = vpop.eup %7316 }
0x20f0   :  { %4472 = vrot.lane.b32.xlu0 %v7309_v25, %s7650_s3  ;;  %v7319_v48 = vpop.eup %7318 }
0x20f1   :  { %v4416_v56 = vadd.f32 1.0, %v7319_v48  ;;  %v7321_v54 = vpop.eup %7320 }
0x20f2   :  { %v7323_v31 = vpop.eup %7322  ;;  %v4417_v32 = vadd.f32 1.0, %v7321_v54 }
0x20f3   :  { %4474 = vrot.lane.b32.xlu1 %v7315_v17, %s7650_s3  ;;  %7330 = vrcp.f32 %v4416_v56  ;;  %v7325_v41 = vpop.eup %7324  ;;  %v4418_v30 = vadd.f32 1.0, %v7323_v31 }
0x20f4   :  { %4476 = vrot.lane.b32.xlu0 %v7313_v21, %s7650_s3  ;;  %7332 = vpow2.f32 %v6106_v58  ;;  %v7327_v14 = vpop.eup %7326  ;;  %v4420_v12 = vadd.f32 1.0, %v7325_v41 }
0x20f5   :  { %7334 = vpow2.f32 %v6108_v42  ;;  %v7329_v22 = vpop.eup %7328  ;;  %v4419_v0 = vadd.f32 1.0, %v7327_v14 }
0x20f6   :  { %7336 = vrcp.f32 %v4417_v32  ;;  %v4422_v57 = vadd.f32 1.0, %v7329_v22 }
0x20f7   :  { %4478 = vrot.lane.b32.xlu1 %v7317_v18, %s7650_s3  ;;  %7338 = vrcp.f32 %v4418_v30 }
0x20f8   :  { %7340 = vrcp.f32 %v4420_v12 }
0x20f9   :  { %7342 = vrcp.f32 %v4419_v0 }
0x20fa   :  { %7344 = vrcp.f32 %v4422_v57 }
0x20fd   :  { %v9464_v15 = vpop.eup %7330 }
0x20fe   :  { %v7333_v39 = vpop.eup %7332  ;;  %v4448_v37 = vmul.f32 %v9464_v15, %v9387_v5 }
0x20ff   :  { %v4421_v35 = vadd.f32 1.0, %v7333_v39  ;;  %v7335_v44 = vpop.eup %7334 }
0x2100   :  { %v4423_v62 = vadd.f32 1.0, %v7335_v44  ;;  %v9468_v20 = vpop.eup %7336 }
0x2101   :  { %7346 = vrcp.f32 %v4421_v35  ;;  %v9470_v8 = vpop.eup %7338  ;;  %v4449_v18 = vmul.f32 %v9468_v20, %v9394_v10 }
0x2102   :  { %7348 = vrcp.f32 %v4423_v62  ;;  %v9475_v29 = vpop.eup %7340  ;;  %v4450_v60 = vmul.f32 %v9470_v8, %v9396_v50 }
0x2103   :  { %v9478_v47 = vpop.eup %7342  ;;  %v4452_v5 = vmul.f32 %v9475_v29, %v9404_v27 }
0x2104   :  { %v9483_v2 = vpop.eup %7344  ;;  %v4451_v10 = vmul.f32 %v9478_v47, %v9407_v61 }
0x2105   :  { %v4454_v42 = vmul.f32 %v9483_v2, %v9415_v1 }
0x210b   :  { %v9486_v45 = vpop.eup %7346 }
0x210c   :  { %v9492_v7 = vpop.eup %7348  ;;  %v4453_v27 = vmul.f32 %v9486_v45, %v9417_v24 }
0x210d   :  { %v4455_v41 = vmul.f32 %v9492_v7, %v9423_v13 }
0x215a   :  { %v4465_v11 = vpop.permute.xlu0 %4464 }
0x215b   :  { %v4488_v55 = vmul.f32 %v9464_v15, %v4465_v11 }
0x215d   :  { %4504 = vrot.lane.b32.xlu0 %v4488_v55, %s7652_s6  ;;  %v4469_v51 = vpop.permute.xlu1 %4468 }
0x215e   :  { %v4467_v23 = vpop.permute.xlu0 %4466  ;;  %v4490_v33 = vmul.f32 %v9470_v8, %v4469_v51 }
0x215f   :  { %v4489_v6 = vmul.f32 %v9468_v20, %v4467_v23 }
0x2160   :  { %4508 = vrot.lane.b32.xlu1 %v4490_v33, %s7652_s6 }
0x2161   :  { %4506 = vrot.lane.b32.xlu0 %v4489_v6, %s7652_s6  ;;  %v4471_v26 = vpop.permute.xlu1 %4470 }
0x2162   :  { %v4473_v63 = vpop.permute.xlu0 %4472  ;;  %v4491_v16 = vmul.f32 %v9478_v47, %v4471_v26 }
0x2163   :  { %v4492_v46 = vmul.f32 %v9475_v29, %v4473_v63 }
0x2164   :  { %4510 = vrot.lane.b32.xlu1 %v4491_v16, %s7652_s6 }
0x2165   :  { %4512 = vrot.lane.b32.xlu0 %v4492_v46, %s7652_s6  ;;  %v4475_v53 = vpop.permute.xlu1 %4474 }
0x2166   :  { %v4477_v49 = vpop.permute.xlu0 %4476  ;;  %v4493_v36 = vmul.f32 %v9486_v45, %v4475_v53 }
0x2167   :  { %v4494_v9 = vmul.f32 %v9483_v2, %v4477_v49 }
0x2168   :  { %4514 = vrot.lane.b32.xlu1 %v4493_v36, %s7652_s6 }
0x2169   :  { %4516 = vrot.lane.b32.xlu0 %v4494_v9, %s7652_s6  ;;  %v4479_v28 = vpop.permute.xlu1 %4478 }
0x216a   :  { %v4495_v25 = vmul.f32 %v9492_v7, %v4479_v28 }
0x216c   :  { %4518 = vrot.lane.b32.xlu1 %v4495_v25, %s7652_s6 }
0x21cf   :  { %v4505_v21 = vpop.permute.xlu0 %4504 }
0x21d0   :  { %v9498_v17 = vadd.f32 %v4505_v21, %v4448_v37 }
0x21d2   :  { %7350 = vtanh.f32 %v9498_v17  ;;  %v4509_v52 = vpop.permute.xlu1 %4508 }
0x21d3   :  { %v4507_v40 = vpop.permute.xlu0 %4506  ;;  %v9507_v48 = vadd.f32 %v4509_v52, %v4450_v60 }
0x21d4   :  { %v9505_v3 = vadd.f32 %v4507_v40, %v4449_v18 }
0x21d6   :  { %7352 = vtanh.f32 %v9505_v3  ;;  %v4511_v56 = vpop.permute.xlu1 %4510 }
0x21d7   :  { %7354 = vtanh.f32 %v9507_v48  ;;  %v4513_v4 = vpop.permute.xlu0 %4512  ;;  %v9518_v58 = vadd.f32 %v4511_v56, %v4451_v10  ;;  %v4586_v56 = vld [vmem:[#allocation2 + $0x14] sm:$0x1] }
0x21d8   :  { %v9515_v50 = vadd.f32 %v4513_v4, %v4452_v5  ;;  %v4585_v4 = vld [vmem:[#allocation2 + $0xc] sm:$0x1] }
0x21da   :  { %7356 = vtanh.f32 %v9515_v50  ;;  %v4515_v61 = vpop.permute.xlu1 %4514 }
0x21db   :  { %7358 = vtanh.f32 %v9518_v58  ;;  %v4517_v54 = vpop.permute.xlu0 %4516  ;;  %v9528_v32 = vadd.f32 %v4515_v61, %v4453_v27 }
0x21dc   :  { %v7351_v19 = vpop.eup %7350  ;;  %v9526_v31 = vadd.f32 %v4517_v54, %v4454_v42 }
0x21dd   :  { %4552 = vrot.lane.b32.xlu0 %v7351_v19, %s7650_s3 }
0x21de   :  { %7360 = vtanh.f32 %v9526_v31  ;;  %v4519_v1 = vpop.permute.xlu1 %4518 }
0x21df   :  { %7362 = vtanh.f32 %v9528_v32  ;;  %v9534_v22 = vadd.f32 %v4519_v1, %v4455_v41  ;;  %v4588_v41 = vld [vmem:[#allocation2 + $0x24] sm:$0x1] }
0x21e0   :  { %v7353_v30 = vpop.eup %7352 }
0x21e1   :  { %v7355_v14 = vpop.eup %7354  ;;  %4554 = vrot.lane.b32.xlu0 %v7353_v30, %s7650_s3  ;;  %7364 = vtanh.f32 %v9534_v22  ;;  %v4587_v30 = vld [vmem:[#allocation2 + $0x1c] sm:$0x1] }
0x21e2   :  { %4556 = vrot.lane.b32.xlu1 %v7355_v14, %s7650_s3 }
0x21e4   :  { %v7357_v24 = vpop.eup %7356 }
0x21e5   :  { %v7359_v12 = vpop.eup %7358  ;;  %4560 = vrot.lane.b32.xlu0 %v7357_v24, %s7650_s3 }
0x21e6   :  { %4558 = vrot.lane.b32.xlu1 %v7359_v12, %s7650_s3 }
0x21e8   :  { %v7361_v11 = vpop.eup %7360 }
0x21e9   :  { %v7363_v0 = vpop.eup %7362  ;;  %4564 = vrot.lane.b32.xlu0 %v7361_v11, %s7650_s3 }
0x21ea   :  { %4562 = vrot.lane.b32.xlu1 %v7363_v0, %s7650_s3  ;;  %v4590_v0 = vld [vmem:[#allocation2 + $0x34] sm:$0x1] }
0x21eb   :  { %v7365_v13 = vpop.eup %7364 }
0x21ee   :  { %4566 = vrot.lane.b32.xlu1 %v7365_v13, %s7650_s3  ;;  %v4589_v13 = vld [vmem:[#allocation2 + $0x2c] sm:$0x1] }
0x224f   :  { %v4553_v39 = vpop.permute.xlu0 %4552 }
0x2250   :  { %v4576_v62 = vmul.f32 %v9464_v15, %v4553_v39 }
0x2253   :  { %v4555_v55 = vpop.permute.xlu0 %4554 }
0x2254   :  { %v4557_v57 = vpop.permute.xlu1 %4556  ;;  %v4577_v35 = vmul.f32 %v9468_v20, %v4555_v55 }
0x2255   :  { %v4578_v44 = vmul.f32 %v9470_v8, %v4557_v57 }
0x2256   :  { %v4600_v23 = vrot.slane %v4577_v35, 7  ;;  %v4591_v35 = vld [vmem:[#allocation2 + $0x3c] sm:$0x1] }
0x2257   :  { %v4561_v51 = vpop.permute.xlu0 %4560  ;;  %v4602_v6 = vrot.slane %v4578_v44, 6 }
0x2258   :  { %v4601_v33 = vsel %vm682_vm6, %v4600_v23, %v4576_v62  ;;  %v4559_v63 = vpop.permute.xlu1 %4558  ;;  %v4580_v26 = vmul.f32 %v9475_v29, %v4561_v51 }
0x2259   :  { %v4579_v46 = vmul.f32 %v9478_v47, %v4559_v63  ;;  %v4603_v16 = vsel %vm685_vm7, %v4602_v6, %v4601_v33 }
0x225a   :  { %v4606_v49 = vrot.slane %v4580_v26, 4 }
0x225b   :  { %v4604_v53 = vrot.slane %v4579_v46, 5  ;;  %v4565_v9 = vpop.permute.xlu0 %4564 }
0x225c   :  { %v4563_v20 = vpop.permute.xlu1 %4562  ;;  %v4582_v8 = vmul.f32 %v9483_v2, %v4565_v9 }
0x225d   :  { %v4605_v15 = vsel %vm688_vm8, %v4604_v53, %v4603_v16  ;;  %v4581_v36 = vmul.f32 %v9486_v45, %v4563_v20 }
0x225e   :  { %v4607_v28 = vsel %vm691_vm9, %v4606_v49, %v4605_v15  ;;  %v4610_v25 = vrot.slane %v4582_v8, 2 }
0x225f   :  { %v4608_v37 = vrot.slane %v4581_v36, 3 }
0x2260   :  { %v4567_v21 = vpop.permute.xlu1 %4566 }
0x2261   :  { %v4609_v29 = vsel %vm694_vm10, %v4608_v37, %v4607_v28  ;;  %v4583_v47 = vmul.f32 %v9492_v7, %v4567_v21  ;;  %v4584_v7 = vld [vmem:[#allocation2 + $0x4] sm:$0x1] }
0x2262   :  { %v4611_v18 = vsel %vm697_vm11, %v4610_v25, %v4609_v29 }
0x2263   :  { %v4612_v60 = vrot.slane %v4583_v47, 1 }
0x2265   :  { %v4613_v40 = vsel %vm700_vm12, %v4612_v60, %v4611_v18 }
0x2266   :  { %4614 = vrot.lane.b32.xlu0 %v4613_v40, %s7652_s6 }
0x22d8   :  { %v4615_v2 = vpop.permute.xlu0 %4614 }
0x22d9   :  { %6435 = vmatmul.mubr.msk.f32.vlgmr.msra.gmra.mrb[24].mxu1 %vm311_vm5, %v4615_v2 }
0x22da   :  { %6575 = vmatpush3.bf16.msra.mxu1 %v10095_v38  ;;  %6456 = vmatprep.mubr.msk.f32.mxu1 %vm7648_vm0, %v10097_v59 }
0x22db   :  { %6576 = vmatprep.subr.bf16.mxu1 %v10094_v43 }
0x22de   :  { %6578 = vmatpush3.bf16.msra.mxu1 %v10096_v34 }
0x22df   :  { %6585 = vmatprep.subr.bf16.mxu1 %v10094_v43 }
0x23ac   :  { %v4684_v45 = vpop.f32.mrb[24].mxu1 }
0x23ad   :  { %v6436_v52 = vpop.f32.mrb[25].mxu1  ;;  %v4704_v5 = vadd.f32 %v4684_v45, %v4584_v7  ;;  %v4689_v19 = vrot.slane %v4684_v45, 1  ;;  %v4690_v10 = vrot.slane %v4684_v45, 2  ;;  %v4692_v42 = vrot.slane %v4684_v45, 4 }
0x23ae   :  { %v4691_v54 = vrot.slane %v4684_v45, 3  ;;  %v4694_v1 = vrot.slane %v4684_v45, 6  ;;  %v4693_v12 = vrot.slane %v4684_v45, 5  ;;  %v4695_v55 = vrot.slane %v4684_v45, 7 }
0x23af   :  { %7366 = vtanh.f32 %v4704_v5  ;;  %v4705_v27 = vadd.f32 %v4689_v19, %v4585_v4  ;;  %v4706_v61 = vadd.f32 %v4690_v10, %v4586_v56  ;;  %v4708_v14 = vadd.f32 %v4692_v42, %v4588_v41 }
0x23b0   :  { %v4707_v11 = vadd.f32 %v4691_v54, %v4587_v30  ;;  %v4710_v39 = vadd.f32 %v4694_v1, %v4590_v0  ;;  %v4709_v57 = vadd.f32 %v4693_v12, %v4589_v13  ;;  %v4711_v44 = vadd.f32 %v4695_v55, %v4591_v35 }
0x23b1   :  { %7368 = vtanh.f32 %v4705_v27  ;;  %v6110_v46 = vmul.f32 -1.442695, %v4704_v5  ;;  %v6111_v16 = vmul.f32 -1.442695, %v4705_v27  ;;  %v6112_v49 = vmul.f32 -1.442695, %v4706_v61 }
0x23b2   :  { %7370 = vtanh.f32 %v4706_v61  ;;  %v6114_v53 = vmul.f32 -1.442695, %v4708_v14  ;;  %v6113_v20 = vmul.f32 -1.442695, %v4707_v11  ;;  %v6116_v8 = vmul.f32 -1.442695, %v4710_v39 }
0x23b3   :  { %7372 = vtanh.f32 %v4708_v14  ;;  %v6115_v36 = vmul.f32 -1.442695, %v4709_v57  ;;  %v6117_v28 = vmul.f32 -1.442695, %v4711_v44 }
0x23b4   :  { %7374 = vtanh.f32 %v4707_v11 }
0x23b5   :  { %7376 = vtanh.f32 %v4710_v39 }
0x23b6   :  { %7378 = vtanh.f32 %v4709_v57 }
0x23b7   :  { %7380 = vtanh.f32 %v4711_v44 }
0x23b8   :  { %7382 = vpow2.f32 %v6110_v46 }
0x23b9   :  { %v7367_v24 = vpop.eup %7366  ;;  %7384 = vpow2.f32 %v6111_v16 }
0x23ba   :  { %4784 = vrot.lane.b32.xlu1 %v7367_v24, %s7650_s3  ;;  %7386 = vpow2.f32 %v6112_v49 }
0x23bb   :  { %v7369_v62 = vpop.eup %7368  ;;  %7388 = vpow2.f32 %v6114_v53 }
0x23bc   :  { %v7371_v23 = vpop.eup %7370  ;;  %7390 = vpow2.f32 %v6113_v20 }
0x23bd   :  { %4788 = vrot.lane.b32.xlu0 %v7371_v23, %s7650_s3  ;;  %v7373_v51 = vpop.eup %7372  ;;  %7392 = vpow2.f32 %v6116_v8 }
0x23be   :  { %4786 = vrot.lane.b32.xlu1 %v7369_v62, %s7650_s3  ;;  %v7375_v6 = vpop.eup %7374 }
0x23bf   :  { %v7377_v33 = vpop.eup %7376 }
0x23c0   :  { %v7379_v63 = vpop.eup %7378 }
0x23c1   :  { %4790 = vrot.lane.b32.xlu0 %v7375_v6, %s7650_s3  ;;  %v7381_v26 = vpop.eup %7380 }
0x23c2   :  { %4792 = vrot.lane.b32.xlu1 %v7373_v51, %s7650_s3  ;;  %v7383_v9 = vpop.eup %7382 }
0x23c3   :  { %v4736_v15 = vadd.f32 1.0, %v7383_v9  ;;  %v7385_v25 = vpop.eup %7384 }
0x23c4   :  { %v7387_v37 = vpop.eup %7386  ;;  %v4737_v21 = vadd.f32 1.0, %v7385_v25 }
0x23c5   :  { %4794 = vrot.lane.b32.xlu0 %v7379_v63, %s7650_s3  ;;  %7394 = vrcp.f32 %v4736_v15  ;;  %v7389_v29 = vpop.eup %7388  ;;  %v4738_v47 = vadd.f32 1.0, %v7387_v37 }
0x23c6   :  { %4796 = vrot.lane.b32.xlu1 %v7377_v33, %s7650_s3  ;;  %7396 = vpow2.f32 %v6115_v36  ;;  %v7391_v18 = vpop.eup %7390  ;;  %v4740_v40 = vadd.f32 1.0, %v7389_v29 }
0x23c7   :  { %7398 = vpow2.f32 %v6117_v28  ;;  %v7393_v60 = vpop.eup %7392  ;;  %v4739_v7 = vadd.f32 1.0, %v7391_v18 }
0x23c8   :  { %7400 = vrcp.f32 %v4737_v21  ;;  %v4742_v19 = vadd.f32 1.0, %v7393_v60 }
0x23c9   :  { %4798 = vrot.lane.b32.xlu0 %v7381_v26, %s7650_s3  ;;  %7402 = vrcp.f32 %v4738_v47 }
0x23ca   :  { %7404 = vrcp.f32 %v4740_v40 }
0x23cb   :  { %7406 = vrcp.f32 %v4739_v7 }
0x23cc   :  { %7408 = vrcp.f32 %v4742_v19 }
0x23cf   :  { %v9575_v2 = vpop.eup %7394 }
0x23d0   :  { %v7397_v52 = vpop.eup %7396  ;;  %v4768_v6 = vmul.f32 %v9575_v2, %v9498_v17 }
0x23d1   :  { %v4741_v10 = vadd.f32 1.0, %v7397_v52  ;;  %v7399_v4 = vpop.eup %7398 }
0x23d2   :  { %v4743_v56 = vadd.f32 1.0, %v7399_v4  ;;  %v9579_v42 = vpop.eup %7400 }
0x23d3   :  { %7410 = vrcp.f32 %v4741_v10  ;;  %v9581_v54 = vpop.eup %7402  ;;  %v4769_v26 = vmul.f32 %v9579_v42, %v9505_v3 }
0x23d4   :  { %7412 = vrcp.f32 %v4743_v56  ;;  %v9586_v1 = vpop.eup %7404  ;;  %v4770_v46 = vmul.f32 %v9581_v54, %v9507_v48 }
0x23d5   :  { %v9589_v24 = vpop.eup %7406  ;;  %v4772_v17 = vmul.f32 %v9586_v1, %v9515_v50 }
0x23d6   :  { %v9594_v13 = vpop.eup %7408  ;;  %v4771_v3 = vmul.f32 %v9589_v24, %v9518_v58 }
0x23d7   :  { %v4774_v28 = vmul.f32 %v9594_v13, %v9526_v31 }
0x23dd   :  { %v9597_v55 = vpop.eup %7410 }
0x23de   :  { %v9603_v62 = vpop.eup %7412  ;;  %v4773_v50 = vmul.f32 %v9597_v55, %v9528_v32 }
0x23df   :  { %v4775_v29 = vmul.f32 %v9603_v62, %v9534_v22 }
0x242c   :  { %v4785_v45 = vpop.permute.xlu1 %4784 }
0x242d   :  { %v4808_v5 = vmul.f32 %v9575_v2, %v4785_v45 }
0x242f   :  { %4824 = vrot.lane.b32.xlu1 %v4808_v5, %s7652_s6  ;;  %v4789_v61 = vpop.permute.xlu0 %4788 }
0x2430   :  { %v4787_v27 = vpop.permute.xlu1 %4786  ;;  %v4810_v30 = vmul.f32 %v9581_v54, %v4789_v61 }
0x2431   :  { %v4809_v41 = vmul.f32 %v9579_v42, %v4787_v27 }
0x2432   :  { %4828 = vrot.lane.b32.xlu0 %v4810_v30, %s7652_s6 }
0x2433   :  { %4826 = vrot.lane.b32.xlu1 %v4809_v41, %s7652_s6  ;;  %v4791_v12 = vpop.permute.xlu0 %4790 }
0x2434   :  { %v4793_v14 = vpop.permute.xlu1 %4792  ;;  %v4811_v0 = vmul.f32 %v9589_v24, %v4791_v12 }
0x2435   :  { %v4812_v11 = vmul.f32 %v9586_v1, %v4793_v14 }
0x2436   :  { %4830 = vrot.lane.b32.xlu0 %v4811_v0, %s7652_s6 }
0x2437   :  { %4832 = vrot.lane.b32.xlu1 %v4812_v11, %s7652_s6  ;;  %v4795_v57 = vpop.permute.xlu0 %4794 }
0x2438   :  { %v4797_v39 = vpop.permute.xlu1 %4796  ;;  %v4813_v44 = vmul.f32 %v9597_v55, %v4795_v57 }
0x2439   :  { %v4814_v35 = vmul.f32 %v9594_v13, %v4797_v39 }
0x243a   :  { %4834 = vrot.lane.b32.xlu0 %v4813_v44, %s7652_s6 }
0x243b   :  { %4836 = vrot.lane.b32.xlu1 %v4814_v35, %s7652_s6  ;;  %v4799_v23 = vpop.permute.xlu0 %4798 }
0x243c   :  { %v4815_v51 = vmul.f32 %v9603_v62, %v4799_v23 }
0x243e   :  { %4838 = vrot.lane.b32.xlu0 %v4815_v51, %s7652_s6 }
0x24a1   :  { %v4825_v33 = vpop.permute.xlu1 %4824 }
0x24a2   :  { %v9609_v63 = vadd.f32 %v4825_v33, %v4768_v6 }
0x24a4   :  { %7414 = vtanh.f32 %v9609_v63  ;;  %v4829_v49 = vpop.permute.xlu0 %4828 }
0x24a5   :  { %v4827_v16 = vpop.permute.xlu1 %4826  ;;  %v9618_v9 = vadd.f32 %v4829_v49, %v4770_v46 }
0x24a6   :  { %v9616_v53 = vadd.f32 %v4827_v16, %v4769_v26 }
0x24a8   :  { %7416 = vtanh.f32 %v9616_v53  ;;  %v4831_v15 = vpop.permute.xlu0 %4830 }
0x24a9   :  { %7418 = vtanh.f32 %v9618_v9  ;;  %v4833_v8 = vpop.permute.xlu1 %4832  ;;  %v9629_v36 = vadd.f32 %v4831_v15, %v4771_v3  ;;  %v4906_v15 = vld [vmem:[#allocation2 + $0x15] sm:$0x1] }
0x24aa   :  { %v9626_v48 = vadd.f32 %v4833_v8, %v4772_v17  ;;  %v4905_v8 = vld [vmem:[#allocation2 + $0xd] sm:$0x1] }
0x24ac   :  { %7420 = vtanh.f32 %v9626_v48  ;;  %v4835_v58 = vpop.permute.xlu0 %4834 }
0x24ad   :  { %7422 = vtanh.f32 %v9629_v36  ;;  %v4837_v25 = vpop.permute.xlu1 %4836  ;;  %v9639_v21 = vadd.f32 %v4835_v58, %v4773_v50  ;;  %v4908_v58 = vld [vmem:[#allocation2 + $0x25] sm:$0x1] }
0x24ae   :  { %v7415_v20 = vpop.eup %7414  ;;  %v9637_v37 = vadd.f32 %v4837_v25, %v4774_v28 }
0x24af   :  { %4872 = vrot.lane.b32.xlu1 %v7415_v20, %s7650_s3 }
0x24b0   :  { %7424 = vtanh.f32 %v9637_v37  ;;  %v4839_v31 = vpop.permute.xlu0 %4838 }
0x24b1   :  { %7426 = vtanh.f32 %v9639_v21  ;;  %v9645_v60 = vadd.f32 %v4839_v31, %v4775_v29  ;;  %v4907_v29 = vld [vmem:[#allocation2 + $0x1d] sm:$0x1] }
0x24b2   :  { %v7417_v47 = vpop.eup %7416 }
0x24b3   :  { %v7419_v18 = vpop.eup %7418  ;;  %4874 = vrot.lane.b32.xlu1 %v7417_v47, %s7650_s3  ;;  %7428 = vtanh.f32 %v9645_v60 }
0x24b4   :  { %4876 = vrot.lane.b32.xlu0 %v7419_v18, %s7650_s3 }
0x24b6   :  { %v7421_v32 = vpop.eup %7420 }
0x24b7   :  { %v7423_v40 = vpop.eup %7422  ;;  %4880 = vrot.lane.b32.xlu1 %v7421_v32, %s7650_s3 }
0x24b8   :  { %4878 = vrot.lane.b32.xlu0 %v7423_v40, %s7650_s3  ;;  %v4910_v40 = vld [vmem:[#allocation2 + $0x35] sm:$0x1] }
0x24ba   :  { %v7425_v45 = vpop.eup %7424 }
0x24bb   :  { %v7427_v7 = vpop.eup %7426  ;;  %4884 = vrot.lane.b32.xlu1 %v7425_v45, %s7650_s3  ;;  %v4909_v45 = vld [vmem:[#allocation2 + $0x2d] sm:$0x1] }
0x24bc   :  { %4882 = vrot.lane.b32.xlu0 %v7427_v7, %s7650_s3 }
0x24bd   :  { %v7429_v22 = vpop.eup %7428 }
0x24c0   :  { %4886 = vrot.lane.b32.xlu0 %v7429_v22, %s7650_s3 }
0x2521   :  { %v4873_v52 = vpop.permute.xlu1 %4872 }
0x2522   :  { %v4896_v56 = vmul.f32 %v9575_v2, %v4873_v52 }
0x2525   :  { %v4875_v5 = vpop.permute.xlu1 %4874 }
0x2526   :  { %v4877_v19 = vpop.permute.xlu0 %4876  ;;  %v4897_v10 = vmul.f32 %v9579_v42, %v4875_v5  ;;  %v4911_v5 = vld [vmem:[#allocation2 + $0x3d] sm:$0x1] }
0x2527   :  { %v4898_v4 = vmul.f32 %v9581_v54, %v4877_v19 }
0x2528   :  { %v4920_v27 = vrot.slane %v4897_v10, 7 }
0x2529   :  { %v4881_v61 = vpop.permute.xlu1 %4880  ;;  %v4922_v41 = vrot.slane %v4898_v4, 6 }
0x252a   :  { %v4921_v30 = vsel %vm682_vm6, %v4920_v27, %v4896_v56  ;;  %v4879_v14 = vpop.permute.xlu0 %4878  ;;  %v4900_v12 = vmul.f32 %v9586_v1, %v4881_v61 }
0x252b   :  { %v4899_v11 = vmul.f32 %v9589_v24, %v4879_v14  ;;  %v4923_v0 = vsel %vm685_vm7, %v4922_v41, %v4921_v30 }
0x252c   :  { %v4926_v39 = vrot.slane %v4900_v12, 4 }
0x252d   :  { %v4924_v57 = vrot.slane %v4899_v11, 5  ;;  %v4885_v35 = vpop.permute.xlu1 %4884 }
0x252e   :  { %v4883_v42 = vpop.permute.xlu0 %4882  ;;  %v4902_v54 = vmul.f32 %v9594_v13, %v4885_v35 }
0x252f   :  { %v4925_v2 = vsel %vm688_vm8, %v4924_v57, %v4923_v0  ;;  %v4901_v44 = vmul.f32 %v9597_v55, %v4883_v42 }
0x2530   :  { %v4927_v23 = vsel %vm691_vm9, %v4926_v39, %v4925_v2  ;;  %v4930_v51 = vrot.slane %v4902_v54, 2 }
0x2531   :  { %v4928_v6 = vrot.slane %v4901_v44, 3 }
0x2532   :  { %v4887_v33 = vpop.permute.xlu0 %4886 }
0x2533   :  { %v4929_v1 = vsel %vm694_vm10, %v4928_v6, %v4927_v23  ;;  %v4903_v24 = vmul.f32 %v9603_v62, %v4887_v33  ;;  %v4904_v62 = vld [vmem:[#allocation2 + $0x5] sm:$0x1] }
0x2534   :  { %v4931_v26 = vsel %vm697_vm11, %v4930_v51, %v4929_v1 }
0x2535   :  { %v4932_v46 = vrot.slane %v4903_v24, 1 }
0x2537   :  { %v4933_v16 = vsel %vm700_vm12, %v4932_v46, %v4931_v26 }
0x2538   :  { %4934 = vrot.lane.b32.xlu1 %v4933_v16, %s7652_s6 }
0x25aa   :  { %v4935_v13 = vpop.permute.xlu1 %4934 }
0x25ab   :  { %6446 = vmatmul.mubr.msk.f32.vlgmr.msra.gmra.mrb[18].mxu0 %vm311_vm5, %v4935_v13 }
0x25ac   :  { %6581 = vmatpush3.bf16.msra.mxu0 %v10095_v38  ;;  %6467 = vmatprep.mubr.msk.f32.mxu0 %vm7648_vm0, %v10097_v59 }
0x25ad   :  { %6582 = vmatprep.subr.bf16.mxu0 %v10094_v43 }
0x25b0   :  { %6584 = vmatpush3.bf16.msra.mxu0 %v10096_v34 }
0x267e   :  { %v5004_v55 = vpop.f32.mrb[18].mxu0 }
0x267f   :  { %v6447_v49 = vpop.f32.mrb[19].mxu0  ;;  %v5024_v17 = vadd.f32 %v5004_v55, %v4904_v62  ;;  %v5009_v20 = vrot.slane %v5004_v55, 1  ;;  %v5010_v3 = vrot.slane %v5004_v55, 2  ;;  %v5012_v28 = vrot.slane %v5004_v55, 4 }
0x2680   :  { %v5011_v25 = vrot.slane %v5004_v55, 3  ;;  %v5014_v47 = vrot.slane %v5004_v55, 6  ;;  %v5013_v34 = vrot.slane %v5004_v55, 5  ;;  %v5015_v22 = vrot.slane %v5004_v55, 7 }
0x2681   :  { %7430 = vtanh.f32 %v5024_v17  ;;  %v5025_v50 = vadd.f32 %v5009_v20, %v4905_v8  ;;  %v5026_v38 = vadd.f32 %v5010_v3, %v4906_v15  ;;  %v5028_v31 = vadd.f32 %v5012_v28, %v4908_v58 }
0x2682   :  { %v5027_v32 = vadd.f32 %v5011_v25, %v4907_v29  ;;  %v5030_v7 = vadd.f32 %v5014_v47, %v4910_v40  ;;  %v5029_v52 = vadd.f32 %v5013_v34, %v4909_v45  ;;  %v5031_v19 = vadd.f32 %v5015_v22, %v4911_v5 }
0x2683   :  { %7432 = vtanh.f32 %v5025_v50  ;;  %v6119_v14 = vmul.f32 -1.442695, %v5024_v17  ;;  %v6120_v12 = vmul.f32 -1.442695, %v5025_v50  ;;  %v6121_v11 = vmul.f32 -1.442695, %v5026_v38 }
0x2684   :  { %7434 = vtanh.f32 %v5026_v38  ;;  %v6123_v0 = vmul.f32 -1.442695, %v5028_v31  ;;  %v6122_v57 = vmul.f32 -1.442695, %v5027_v32  ;;  %v6125_v35 = vmul.f32 -1.442695, %v5030_v7 }
0x2685   :  { %7436 = vtanh.f32 %v5028_v31  ;;  %v6124_v54 = vmul.f32 -1.442695, %v5029_v52  ;;  %v6126_v2 = vmul.f32 -1.442695, %v5031_v19 }
0x2686   :  { %7438 = vtanh.f32 %v5027_v32 }
0x2687   :  { %7440 = vtanh.f32 %v5030_v7 }
0x2688   :  { %7442 = vtanh.f32 %v5029_v52 }
0x2689   :  { %7444 = vtanh.f32 %v5031_v19 }
0x268a   :  { %7446 = vpow2.f32 %v6119_v14 }
0x268b   :  { %v7431_v18 = vpop.eup %7430  ;;  %7448 = vpow2.f32 %v6120_v12 }
0x268c   :  { %5104 = vrot.lane.b32.xlu0 %v7431_v18, %s7650_s3  ;;  %7450 = vpow2.f32 %v6121_v11 }
0x268d   :  { %v7433_v10 = vpop.eup %7432  ;;  %7452 = vpow2.f32 %v6123_v0 }
0x268e   :  { %v7435_v4 = vpop.eup %7434  ;;  %7454 = vpow2.f32 %v6122_v57 }
0x268f   :  { %5108 = vrot.lane.b32.xlu1 %v7435_v4, %s7650_s3  ;;  %v7437_v56 = vpop.eup %7436  ;;  %7456 = vpow2.f32 %v6125_v35 }
0x2690   :  { %5106 = vrot.lane.b32.xlu0 %v7433_v10, %s7650_s3  ;;  %v7439_v27 = vpop.eup %7438 }
0x2691   :  { %v7441_v61 = vpop.eup %7440 }
0x2692   :  { %v7443_v41 = vpop.eup %7442 }
0x2693   :  { %5110 = vrot.lane.b32.xlu1 %v7439_v27, %s7650_s3  ;;  %v7445_v30 = vpop.eup %7444 }
0x2694   :  { %5112 = vrot.lane.b32.xlu0 %v7437_v56, %s7650_s3  ;;  %v7447_v39 = vpop.eup %7446 }
0x2695   :  { %v5056_v42 = vadd.f32 1.0, %v7447_v39  ;;  %v7449_v44 = vpop.eup %7448 }
0x2696   :  { %v7451_v23 = vpop.eup %7450  ;;  %v5057_v51 = vadd.f32 1.0, %v7449_v44 }
0x2697   :  { %5114 = vrot.lane.b32.xlu1 %v7443_v41, %s7650_s3  ;;  %7458 = vrcp.f32 %v5056_v42  ;;  %v7453_v6 = vpop.eup %7452  ;;  %v5058_v33 = vadd.f32 1.0, %v7451_v23 }
0x2698   :  { %5116 = vrot.lane.b32.xlu0 %v7441_v61, %s7650_s3  ;;  %7460 = vpow2.f32 %v6124_v54  ;;  %v7455_v1 = vpop.eup %7454  ;;  %v5060_v26 = vadd.f32 1.0, %v7453_v6 }
0x2699   :  { %7462 = vpow2.f32 %v6126_v2  ;;  %v7457_v24 = vpop.eup %7456  ;;  %v5059_v13 = vadd.f32 1.0, %v7455_v1 }
0x269a   :  { %7464 = vrcp.f32 %v5057_v51  ;;  %v5062_v49 = vadd.f32 1.0, %v7457_v24 }
0x269b   :  { %5118 = vrot.lane.b32.xlu1 %v7445_v30, %s7650_s3  ;;  %7466 = vrcp.f32 %v5058_v33 }
0x269c   :  { %7468 = vrcp.f32 %v5060_v26 }
0x269d   :  { %7470 = vrcp.f32 %v5059_v13 }
0x269e   :  { %7472 = vrcp.f32 %v5062_v49 }
0x26a1   :  { %v9685_v46 = vpop.eup %7458 }
0x26a2   :  { %v7461_v55 = vpop.eup %7460  ;;  %v5088_v4 = vmul.f32 %v9685_v46, %v9609_v63 }
0x26a3   :  { %v5061_v17 = vadd.f32 1.0, %v7461_v55  ;;  %v7463_v20 = vpop.eup %7462 }
0x26a4   :  { %v5063_v3 = vadd.f32 1.0, %v7463_v20  ;;  %v9689_v8 = vpop.eup %7464 }
0x26a5   :  { %7474 = vrcp.f32 %v5061_v17  ;;  %v9691_v28 = vpop.eup %7466  ;;  %v5089_v61 = vmul.f32 %v9689_v8, %v9616_v53 }
0x26a6   :  { %7476 = vrcp.f32 %v5063_v3  ;;  %v9696_v58 = vpop.eup %7468  ;;  %v5090_v41 = vmul.f32 %v9691_v28, %v9618_v9 }
0x26a7   :  { %v9699_v47 = vpop.eup %7470  ;;  %v5092_v63 = vmul.f32 %v9696_v58, %v9626_v48 }
0x26a8   :  { %v9704_v32 = vpop.eup %7472  ;;  %v5091_v53 = vmul.f32 %v9699_v47, %v9629_v36 }
0x26a9   :  { %v5094_v42 = vmul.f32 %v9704_v32, %v9637_v37 }
0x26af   :  { %v9707_v45 = vpop.eup %7474 }
0x26b0   :  { %v9713_v5 = vpop.eup %7476  ;;  %v5093_v48 = vmul.f32 %v9707_v45, %v9639_v21 }
0x26b1   :  { %v5095_v23 = vmul.f32 %v9713_v5, %v9645_v60 }
0x26fe   :  { %v5105_v16 = vpop.permute.xlu0 %5104 }
0x26ff   :  { %v5128_v62 = vmul.f32 %v9685_v46, %v5105_v16 }
0x2701   :  { %5144 = vrot.lane.b32.xlu0 %v5128_v62, %s7652_s6  ;;  %v5109_v50 = vpop.permute.xlu1 %5108 }
0x2702   :  { %v5107_v15 = vpop.permute.xlu0 %5106  ;;  %v5130_v38 = vmul.f32 %v9691_v28, %v5109_v50 }
0x2703   :  { %v5129_v25 = vmul.f32 %v9689_v8, %v5107_v15 }
0x2704   :  { %5148 = vrot.lane.b32.xlu1 %v5130_v38, %s7652_s6 }
0x2705   :  { %5146 = vrot.lane.b32.xlu0 %v5129_v25, %s7652_s6  ;;  %v5111_v31 = vpop.permute.xlu1 %5110 }
0x2706   :  { %v5113_v29 = vpop.permute.xlu0 %5112  ;;  %v5131_v34 = vmul.f32 %v9699_v47, %v5111_v31 }
0x2707   :  { %v5132_v18 = vmul.f32 %v9696_v58, %v5113_v29 }
0x2708   :  { %5150 = vrot.lane.b32.xlu1 %v5131_v34, %s7652_s6 }
0x2709   :  { %5152 = vrot.lane.b32.xlu0 %v5132_v18, %s7652_s6  ;;  %v5115_v7 = vpop.permute.xlu1 %5114 }
0x270a   :  { %v5117_v40 = vpop.permute.xlu0 %5116  ;;  %v5133_v52 = vmul.f32 %v9707_v45, %v5115_v7 }
0x270b   :  { %v5134_v22 = vmul.f32 %v9704_v32, %v5117_v40 }
0x270c   :  { %5154 = vrot.lane.b32.xlu1 %v5133_v52, %s7652_s6 }
0x270d   :  { %5156 = vrot.lane.b32.xlu0 %v5134_v22, %s7652_s6  ;;  %v5119_v19 = vpop.permute.xlu1 %5118 }
0x270e   :  { %v5135_v10 = vmul.f32 %v9713_v5, %v5119_v19 }
0x2710   :  { %5158 = vrot.lane.b32.xlu1 %v5135_v10, %s7652_s6 }
0x2773   :  { %v5145_v56 = vpop.permute.xlu0 %5144 }
0x2774   :  { %v9719_v27 = vadd.f32 %v5145_v56, %v5088_v4 }
0x2776   :  { %7478 = vtanh.f32 %v9719_v27  ;;  %v5149_v14 = vpop.permute.xlu1 %5148 }
0x2777   :  { %v5147_v30 = vpop.permute.xlu0 %5146  ;;  %v9728_v11 = vadd.f32 %v5149_v14, %v5090_v41  ;;  %v5224_v41 = vld [vmem:[#allocation2 + $0x6] sm:$0x1] }
0x2778   :  { %v9726_v12 = vadd.f32 %v5147_v30, %v5089_v61 }
0x277a   :  { %7480 = vtanh.f32 %v9726_v12  ;;  %v5151_v57 = vpop.permute.xlu1 %5150 }
0x277b   :  { %7482 = vtanh.f32 %v9728_v11  ;;  %v5153_v39 = vpop.permute.xlu0 %5152  ;;  %v9739_v35 = vadd.f32 %v5151_v57, %v5091_v53  ;;  %v5226_v53 = vld [vmem:[#allocation2 + $0x16] sm:$0x1] }
0x277c   :  { %v9736_v9 = vadd.f32 %v5153_v39, %v5092_v63 }
0x277e   :  { %7484 = vtanh.f32 %v9736_v9  ;;  %v5155_v36 = vpop.permute.xlu1 %5154 }
0x277f   :  { %7486 = vtanh.f32 %v9739_v35  ;;  %v5157_v54 = vpop.permute.xlu0 %5156  ;;  %v9749_v44 = vadd.f32 %v5155_v36, %v5093_v48  ;;  %v5227_v36 = vld [vmem:[#allocation2 + $0x1e] sm:$0x1] }
0x2780   :  { %v7479_v0 = vpop.eup %7478  ;;  %v9747_v2 = vadd.f32 %v5157_v54, %v5094_v42  ;;  %v5228_v54 = vld [vmem:[#allocation2 + $0x26] sm:$0x1] }
0x2781   :  { %5192 = vrot.lane.b32.xlu0 %v7479_v0, %s7650_s3  ;;  %v5225_v0 = vld [vmem:[#allocation2 + $0xe] sm:$0x1] }
0x2782   :  { %7488 = vtanh.f32 %v9747_v2  ;;  %v5159_v37 = vpop.permute.xlu1 %5158 }
0x2783   :  { %7490 = vtanh.f32 %v9749_v44  ;;  %v9755_v33 = vadd.f32 %v5159_v37, %v5095_v23 }
0x2784   :  { %v7481_v51 = vpop.eup %7480 }
0x2785   :  { %v7483_v6 = vpop.eup %7482  ;;  %5194 = vrot.lane.b32.xlu0 %v7481_v51, %s7650_s3  ;;  %7492 = vtanh.f32 %v9755_v33 }
0x2786   :  { %5196 = vrot.lane.b32.xlu1 %v7483_v6, %s7650_s3 }
0x2788   :  { %v7485_v21 = vpop.eup %7484 }
0x2789   :  { %v7487_v1 = vpop.eup %7486  ;;  %5200 = vrot.lane.b32.xlu0 %v7485_v21, %s7650_s3  ;;  %v5230_v21 = vld [vmem:[#allocation2 + $0x36] sm:$0x1] }
0x278a   :  { %5198 = vrot.lane.b32.xlu1 %v7487_v1, %s7650_s3  ;;  %v5229_v1 = vld [vmem:[#allocation2 + $0x2e] sm:$0x1] }
0x278c   :  { %v7489_v24 = vpop.eup %7488 }
0x278d   :  { %v7491_v26 = vpop.eup %7490  ;;  %5204 = vrot.lane.b32.xlu0 %v7489_v24, %s7650_s3 }
0x278e   :  { %5202 = vrot.lane.b32.xlu1 %v7491_v26, %s7650_s3 }
0x278f   :  { %v7493_v60 = vpop.eup %7492 }
0x2792   :  { %5206 = vrot.lane.b32.xlu1 %v7493_v60, %s7650_s3 }
0x27f3   :  { %v5193_v16 = vpop.permute.xlu0 %5192 }
0x27f4   :  { %v5216_v17 = vmul.f32 %v9685_v46, %v5193_v16  ;;  %v5231_v16 = vld [vmem:[#allocation2 + $0x3e] sm:$0x1] }
0x27f7   :  { %v5195_v13 = vpop.permute.xlu0 %5194 }
0x27f8   :  { %v5197_v55 = vpop.permute.xlu1 %5196  ;;  %v5217_v62 = vmul.f32 %v9689_v8, %v5195_v13 }
0x27f9   :  { %v5218_v49 = vmul.f32 %v9691_v28, %v5197_v55 }
0x27fa   :  { %v5240_v20 = vrot.slane %v5217_v62, 7 }
0x27fb   :  { %v5201_v3 = vpop.permute.xlu0 %5200  ;;  %v5242_v15 = vrot.slane %v5218_v49, 6 }
0x27fc   :  { %v5241_v50 = vsel %vm682_vm6, %v5240_v20, %v5216_v17  ;;  %v5199_v25 = vpop.permute.xlu1 %5198  ;;  %v5220_v38 = vmul.f32 %v9696_v58, %v5201_v3 }
0x27fd   :  { %v5219_v29 = vmul.f32 %v9699_v47, %v5199_v25  ;;  %v5243_v31 = vsel %vm685_vm7, %v5242_v15, %v5241_v50 }
0x27fe   :  { %v5246_v18 = vrot.slane %v5220_v38, 4 }
0x27ff   :  { %v5244_v34 = vrot.slane %v5219_v29, 5  ;;  %v5205_v40 = vpop.permute.xlu0 %5204 }
0x2800   :  { %v5203_v8 = vpop.permute.xlu1 %5202  ;;  %v5222_v28 = vmul.f32 %v9704_v32, %v5205_v40 }
0x2801   :  { %v5245_v46 = vsel %vm688_vm8, %v5244_v34, %v5243_v31  ;;  %v5221_v7 = vmul.f32 %v9707_v45, %v5203_v8 }
0x2802   :  { %v5247_v22 = vsel %vm691_vm9, %v5246_v18, %v5245_v46  ;;  %v5250_v52 = vrot.slane %v5222_v28, 2 }
0x2803   :  { %v5248_v19 = vrot.slane %v5221_v7, 3 }
0x2804   :  { %v5207_v10 = vpop.permute.xlu1 %5206 }
0x2805   :  { %v5249_v58 = vsel %vm694_vm10, %v5248_v19, %v5247_v22  ;;  %v5223_v47 = vmul.f32 %v9713_v5, %v5207_v10 }
0x2806   :  { %v5251_v4 = vsel %vm697_vm11, %v5250_v52, %v5249_v58 }
0x2807   :  { %v5252_v56 = vrot.slane %v5223_v47, 1 }
0x2809   :  { %v5253_v61 = vsel %vm700_vm12, %v5252_v56, %v5251_v4 }
0x280a   :  { %5254 = vrot.lane.b32.xlu0 %v5253_v61, %s7652_s6 }
0x287c   :  { %v5255_v32 = vpop.permute.xlu0 %5254 }
0x287d   :  { %6457 = vmatmul.mubr.msk.f32.vlgmr.msra.gmra.mrb[26].mxu1 %vm311_vm5, %v5255_v32 }
0x287e   :  { %6478 = vmatprep.mubr.msk.f32.mxu1 %vm7648_vm0, %v10097_v59 }
0x2950   :  { %v5324_v45 = vpop.f32.mrb[26].mxu1 }
0x2951   :  { %v6458_v30 = vpop.f32.mrb[27].mxu1  ;;  %v5344_v14 = vadd.f32 %v5324_v45, %v5224_v41  ;;  %v5329_v63 = vrot.slane %v5324_v45, 1  ;;  %v5330_v5 = vrot.slane %v5324_v45, 2  ;;  %v5332_v39 = vrot.slane %v5324_v45, 4 }
0x2952   :  { %v5331_v42 = vrot.slane %v5324_v45, 3  ;;  %v5334_v23 = vrot.slane %v5324_v45, 6  ;;  %v5333_v59 = vrot.slane %v5324_v45, 5  ;;  %v5335_v26 = vrot.slane %v5324_v45, 7 }
0x2953   :  { %7494 = vtanh.f32 %v5344_v14  ;;  %v5345_v57 = vadd.f32 %v5329_v63, %v5225_v0  ;;  %v5346_v48 = vadd.f32 %v5330_v5, %v5226_v53  ;;  %v5348_v51 = vadd.f32 %v5332_v39, %v5228_v54 }
0x2954   :  { %v5347_v6 = vadd.f32 %v5331_v42, %v5227_v36  ;;  %v5350_v24 = vadd.f32 %v5334_v23, %v5230_v21  ;;  %v5349_v60 = vadd.f32 %v5333_v59, %v5229_v1  ;;  %v5351_v13 = vadd.f32 %v5335_v26, %v5231_v16 }
0x2955   :  { %7496 = vtanh.f32 %v5345_v57  ;;  %v6128_v50 = vmul.f32 -1.442695, %v5344_v14  ;;  %v6129_v25 = vmul.f32 -1.442695, %v5345_v57  ;;  %v6130_v38 = vmul.f32 -1.442695, %v5346_v48 }
0x2956   :  { %7498 = vtanh.f32 %v5346_v48  ;;  %v6132_v29 = vmul.f32 -1.442695, %v5348_v51  ;;  %v6131_v18 = vmul.f32 -1.442695, %v5347_v6  ;;  %v6134_v34 = vmul.f32 -1.442695, %v5350_v24 }
0x2957   :  { %7500 = vtanh.f32 %v5348_v51  ;;  %v6133_v8 = vmul.f32 -1.442695, %v5349_v60  ;;  %v6135_v28 = vmul.f32 -1.442695, %v5351_v13 }
0x2958   :  { %7502 = vtanh.f32 %v5347_v6 }
0x2959   :  { %7504 = vtanh.f32 %v5350_v24 }
0x295a   :  { %7506 = vtanh.f32 %v5349_v60 }
0x295b   :  { %7508 = vtanh.f32 %v5351_v13 }
0x295c   :  { %7510 = vpow2.f32 %v6128_v50 }
0x295d   :  { %v7495_v37 = vpop.eup %7494  ;;  %7512 = vpow2.f32 %v6129_v25 }
0x295e   :  { %5424 = vrot.lane.b32.xlu1 %v7495_v37, %s7650_s3  ;;  %7514 = vpow2.f32 %v6130_v38 }
0x295f   :  { %v7497_v55 = vpop.eup %7496  ;;  %7516 = vpow2.f32 %v6132_v29 }
0x2960   :  { %v7499_v62 = vpop.eup %7498  ;;  %7518 = vpow2.f32 %v6131_v18 }
0x2961   :  { %5428 = vrot.lane.b32.xlu0 %v7499_v62, %s7650_s3  ;;  %v7501_v49 = vpop.eup %7500  ;;  %7520 = vpow2.f32 %v6134_v34 }
0x2962   :  { %5426 = vrot.lane.b32.xlu1 %v7497_v55, %s7650_s3  ;;  %v7503_v17 = vpop.eup %7502 }
0x2963   :  { %v7505_v20 = vpop.eup %7504 }
0x2964   :  { %v7507_v3 = vpop.eup %7506 }
0x2965   :  { %5430 = vrot.lane.b32.xlu0 %v7503_v17, %s7650_s3  ;;  %v7509_v15 = vpop.eup %7508 }
0x2966   :  { %5432 = vrot.lane.b32.xlu1 %v7501_v49, %s7650_s3  ;;  %v7511_v31 = vpop.eup %7510 }
0x2967   :  { %v5376_v40 = vadd.f32 1.0, %v7511_v31  ;;  %v7513_v46 = vpop.eup %7512 }
0x2968   :  { %v7515_v7 = vpop.eup %7514  ;;  %v5377_v22 = vadd.f32 1.0, %v7513_v46 }
0x2969   :  { %5434 = vrot.lane.b32.xlu0 %v7507_v3, %s7650_s3  ;;  %7522 = vrcp.f32 %v5376_v40  ;;  %v7517_v52 = vpop.eup %7516  ;;  %v5378_v19 = vadd.f32 1.0, %v7515_v7 }
0x296a   :  { %5436 = vrot.lane.b32.xlu1 %v7505_v20, %s7650_s3  ;;  %7524 = vpow2.f32 %v6133_v8  ;;  %v7519_v10 = vpop.eup %7518  ;;  %v5380_v47 = vadd.f32 1.0, %v7517_v52 }
0x296b   :  { %7526 = vpow2.f32 %v6135_v28  ;;  %v7521_v58 = vpop.eup %7520  ;;  %v5379_v61 = vadd.f32 1.0, %v7519_v10 }
0x296c   :  { %7528 = vrcp.f32 %v5377_v22  ;;  %v5382_v41 = vadd.f32 1.0, %v7521_v58 }
0x296d   :  { %5438 = vrot.lane.b32.xlu0 %v7509_v15, %s7650_s3  ;;  %7530 = vrcp.f32 %v5378_v19 }
0x296e   :  { %7532 = vrcp.f32 %v5380_v47 }
0x296f   :  { %7534 = vrcp.f32 %v5379_v61 }
0x2970   :  { %7536 = vrcp.f32 %v5382_v41 }
0x2973   :  { %v9792_v4 = vpop.eup %7522 }
0x2974   :  { %v7525_v32 = vpop.eup %7524  ;;  %v5408_v55 = vmul.f32 %v9792_v4, %v9719_v27 }
0x2975   :  { %v5381_v30 = vadd.f32 1.0, %v7525_v32  ;;  %v7527_v14 = vpop.eup %7526 }
0x2976   :  { %v5383_v63 = vadd.f32 1.0, %v7527_v14  ;;  %v9796_v5 = vpop.eup %7528 }
0x2977   :  { %7538 = vrcp.f32 %v5381_v30  ;;  %v9798_v53 = vpop.eup %7530  ;;  %v5409_v17 = vmul.f32 %v9796_v5, %v9726_v12 }
0x2978   :  { %7540 = vrcp.f32 %v5383_v63  ;;  %v9803_v48 = vpop.eup %7532  ;;  %v5410_v20 = vmul.f32 %v9798_v53, %v9728_v11 }
0x2979   :  { %v9806_v36 = vpop.eup %7534  ;;  %v5412_v27 = vmul.f32 %v9803_v48, %v9736_v9 }
0x297a   :  { %v9811_v59 = vpop.eup %7536  ;;  %v5411_v12 = vmul.f32 %v9806_v36, %v9739_v35 }
0x297b   :  { %v5414_v34 = vmul.f32 %v9811_v59, %v9747_v2 }
0x2981   :  { %v9814_v21 = vpop.eup %7538 }
0x2982   :  { %v9820_v60 = vpop.eup %7540  ;;  %v5413_v9 = vmul.f32 %v9814_v21, %v9749_v44 }
0x2983   :  { %v5415_v46 = vmul.f32 %v9820_v60, %v9755_v33 }
0x29d0   :  { %v5425_v56 = vpop.permute.xlu1 %5424 }
0x29d1   :  { %v5448_v45 = vmul.f32 %v9792_v4, %v5425_v56 }
0x29d3   :  { %5464 = vrot.lane.b32.xlu1 %v5448_v45, %s7652_s6  ;;  %v5429_v39 = vpop.permute.xlu0 %5428 }
0x29d4   :  { %v5427_v0 = vpop.permute.xlu1 %5426  ;;  %v5450_v42 = vmul.f32 %v9798_v53, %v5429_v39 }
0x29d5   :  { %v5449_v57 = vmul.f32 %v9796_v5, %v5427_v0 }
0x29d6   :  { %5468 = vrot.lane.b32.xlu0 %v5450_v42, %s7652_s6 }
0x29d7   :  { %5466 = vrot.lane.b32.xlu1 %v5449_v57, %s7652_s6  ;;  %v5431_v23 = vpop.permute.xlu0 %5430 }
0x29d8   :  { %v5433_v54 = vpop.permute.xlu1 %5432  ;;  %v5451_v37 = vmul.f32 %v9806_v36, %v5431_v23 }
0x29d9   :  { %v5452_v51 = vmul.f32 %v9803_v48, %v5433_v54 }
0x29da   :  { %5470 = vrot.lane.b32.xlu0 %v5451_v37, %s7652_s6 }
0x29db   :  { %5472 = vrot.lane.b32.xlu1 %v5452_v51, %s7652_s6  ;;  %v5435_v1 = vpop.permute.xlu0 %5434 }
0x29dc   :  { %v5437_v6 = vpop.permute.xlu1 %5436  ;;  %v5453_v26 = vmul.f32 %v9814_v21, %v5435_v1 }
0x29dd   :  { %v5454_v24 = vmul.f32 %v9811_v59, %v5437_v6 }
0x29de   :  { %5474 = vrot.lane.b32.xlu0 %v5453_v26, %s7652_s6 }
0x29df   :  { %5476 = vrot.lane.b32.xlu1 %v5454_v24, %s7652_s6  ;;  %v5439_v16 = vpop.permute.xlu0 %5438 }
0x29e0   :  { %v5455_v13 = vmul.f32 %v9820_v60, %v5439_v16 }
0x29e2   :  { %5478 = vrot.lane.b32.xlu0 %v5455_v13, %s7652_s6 }
0x2a45   :  { %v5465_v62 = vpop.permute.xlu1 %5464 }
0x2a46   :  { %v9826_v49 = vadd.f32 %v5465_v62, %v5408_v55 }
0x2a48   :  { %7542 = vtanh.f32 %v9826_v49  ;;  %v5469_v15 = vpop.permute.xlu0 %5468 }
0x2a49   :  { %v5467_v3 = vpop.permute.xlu1 %5466  ;;  %v9835_v25 = vadd.f32 %v5469_v15, %v5410_v20 }
0x2a4a   :  { %v9833_v50 = vadd.f32 %v5467_v3, %v5409_v17  ;;  %v5544_v17 = vld [vmem:[#allocation2 + $0x7] sm:$0x1] }
0x2a4c   :  { %7544 = vtanh.f32 %v9833_v50  ;;  %v5471_v31 = vpop.permute.xlu0 %5470 }
0x2a4d   :  { %7546 = vtanh.f32 %v9835_v25  ;;  %v5473_v29 = vpop.permute.xlu1 %5472  ;;  %v9846_v18 = vadd.f32 %v5471_v31, %v5411_v12  ;;  %v5546_v12 = vld [vmem:[#allocation2 + $0x17] sm:$0x1] }
0x2a4e   :  { %v9843_v11 = vadd.f32 %v5473_v29, %v5412_v27 }
0x2a50   :  { %7548 = vtanh.f32 %v9843_v11  ;;  %v5475_v35 = vpop.permute.xlu0 %5474 }
0x2a51   :  { %7550 = vtanh.f32 %v9846_v18  ;;  %v5477_v40 = vpop.permute.xlu1 %5476  ;;  %v9856_v28 = vadd.f32 %v5475_v35, %v5413_v9  ;;  %v5548_v9 = vld [vmem:[#allocation2 + $0x27] sm:$0x1] }
0x2a52   :  { %v7543_v38 = vpop.eup %7542  ;;  %v9854_v8 = vadd.f32 %v5477_v40, %v5414_v34  ;;  %v5547_v40 = vld [vmem:[#allocation2 + $0x1f] sm:$0x1] }
0x2a53   :  { %5512 = vrot.lane.b32.xlu1 %v7543_v38, %s7650_s3  ;;  %v5545_v38 = vld [vmem:[#allocation2 + $0xf] sm:$0x1] }
0x2a54   :  { %7552 = vtanh.f32 %v9854_v8  ;;  %v5479_v2 = vpop.permute.xlu0 %5478 }
0x2a55   :  { %7554 = vtanh.f32 %v9856_v28  ;;  %v9862_v52 = vadd.f32 %v5479_v2, %v5415_v46 }
0x2a56   :  { %v7545_v7 = vpop.eup %7544 }
0x2a57   :  { %v7547_v22 = vpop.eup %7546  ;;  %5514 = vrot.lane.b32.xlu1 %v7545_v7, %s7650_s3  ;;  %7556 = vtanh.f32 %v9862_v52 }
0x2a58   :  { %5516 = vrot.lane.b32.xlu0 %v7547_v22, %s7650_s3 }
0x2a5a   :  { %v7549_v44 = vpop.eup %7548 }
0x2a5b   :  { %v7551_v19 = vpop.eup %7550  ;;  %5520 = vrot.lane.b32.xlu1 %v7549_v44, %s7650_s3  ;;  %v5550_v44 = vld [vmem:[#allocation2 + $0x37] sm:$0x1] }
0x2a5c   :  { %5518 = vrot.lane.b32.xlu0 %v7551_v19, %s7650_s3  ;;  %v5549_v19 = vld [vmem:[#allocation2 + $0x2f] sm:$0x1] }
0x2a5e   :  { %v7553_v10 = vpop.eup %7552 }
0x2a5f   :  { %v7555_v58 = vpop.eup %7554  ;;  %5524 = vrot.lane.b32.xlu1 %v7553_v10, %s7650_s3 }
0x2a60   :  { %5522 = vrot.lane.b32.xlu0 %v7555_v58, %s7650_s3 }
0x2a61   :  { %v7557_v33 = vpop.eup %7556 }
0x2a64   :  { %5526 = vrot.lane.b32.xlu0 %v7557_v33, %s7650_s3 }
0x2ac5   :  { %v5513_v47 = vpop.permute.xlu1 %5512 }
0x2ac6   :  { %v5536_v41 = vmul.f32 %v9792_v4, %v5513_v47  ;;  %v5551_v47 = vld [vmem:[#allocation2 + $0x3f] sm:$0x1] }
0x2ac9   :  { %v5515_v56 = vpop.permute.xlu1 %5514 }
0x2aca   :  { %v5517_v61 = vpop.permute.xlu0 %5516  ;;  %v5537_v32 = vmul.f32 %v9796_v5, %v5515_v56 }
0x2acb   :  { %v5538_v45 = vmul.f32 %v9798_v53, %v5517_v61 }
0x2acc   :  { %v5560_v30 = vrot.slane %v5537_v32, 7 }
0x2acd   :  { %v5521_v14 = vpop.permute.xlu1 %5520  ;;  %v5562_v63 = vrot.slane %v5538_v45, 6 }
0x2ace   :  { %v5561_v0 = vsel %vm682_vm6, %v5560_v30, %v5536_v41  ;;  %v5519_v39 = vpop.permute.xlu0 %5518  ;;  %v5540_v57 = vmul.f32 %v9803_v48, %v5521_v14 }
0x2acf   :  { %v5539_v42 = vmul.f32 %v9806_v36, %v5519_v39  ;;  %v5563_v54 = vsel %vm685_vm7, %v5562_v63, %v5561_v0 }
0x2ad0   :  { %v5566_v23 = vrot.slane %v5540_v57, 4 }
0x2ad1   :  { %v5564_v51 = vrot.slane %v5539_v42, 5  ;;  %v5525_v37 = vpop.permute.xlu1 %5524 }
0x2ad2   :  { %v5523_v5 = vpop.permute.xlu0 %5522  ;;  %v5542_v53 = vmul.f32 %v9811_v59, %v5525_v37 }
0x2ad3   :  { %v5565_v4 = vsel %vm688_vm8, %v5564_v51, %v5563_v54  ;;  %v5541_v6 = vmul.f32 %v9814_v21, %v5523_v5 }
0x2ad4   :  { %v5567_v1 = vsel %vm691_vm9, %v5566_v23, %v5565_v4  ;;  %v5570_v24 = vrot.slane %v5542_v53, 2 }
0x2ad5   :  { %v5568_v26 = vrot.slane %v5541_v6, 3 }
0x2ad6   :  { %v5527_v16 = vpop.permute.xlu0 %5526 }
0x2ad7   :  { %v5569_v48 = vsel %vm694_vm10, %v5568_v26, %v5567_v1  ;;  %v5543_v36 = vmul.f32 %v9820_v60, %v5527_v16 }
0x2ad8   :  { %v5571_v13 = vsel %vm697_vm11, %v5570_v24, %v5569_v48 }
0x2ad9   :  { %v5572_v55 = vrot.slane %v5543_v36, 1 }
0x2adb   :  { %v5573_v62 = vsel %vm700_vm12, %v5572_v55, %v5571_v13 }
0x2adc   :  { %5574 = vrot.lane.b32.xlu1 %v5573_v62, %s7652_s6 }
0x2b4e   :  { %v5575_v59 = vpop.permute.xlu1 %5574 }
0x2b4f   :  { %6468 = vmatmul.mubr.msk.f32.vlgmr.msra.gmra.mrb[20].mxu0 %vm311_vm5, %v5575_v59 }
0x2c22   :  { %v5644_v21 = vpop.f32.mrb[20].mxu0 }
0x2c23   :  { %v6469_v20 = vpop.f32.mrb[21].mxu0  ;;  %v5664_v3 = vadd.f32 %v5644_v21, %v5544_v17  ;;  %v5649_v15 = vrot.slane %v5644_v21, 1  ;;  %v5650_v27 = vrot.slane %v5644_v21, 2  ;;  %v5652_v60 = vrot.slane %v5644_v21, 4 }
0x2c24   :  { %v5651_v31 = vrot.slane %v5644_v21, 3  ;;  %v5654_v35 = vrot.slane %v5644_v21, 6  ;;  %v5653_v2 = vrot.slane %v5644_v21, 5  ;;  %v5655_v58 = vrot.slane %v5644_v21, 7 }
0x2c25   :  { %7558 = vtanh.f32 %v5664_v3  ;;  %v5665_v29 = vadd.f32 %v5649_v15, %v5545_v38  ;;  %v5666_v34 = vadd.f32 %v5650_v27, %v5546_v12  ;;  %v5668_v46 = vadd.f32 %v5652_v60, %v5548_v9 }
0x2c26   :  { %v5667_v22 = vadd.f32 %v5651_v31, %v5547_v40  ;;  %v5670_v10 = vadd.f32 %v5654_v35, %v5550_v44  ;;  %v5669_v33 = vadd.f32 %v5653_v2, %v5549_v19  ;;  %v5671_v56 = vadd.f32 %v5655_v58, %v5551_v47 }
0x2c27   :  { %7560 = vtanh.f32 %v5665_v29  ;;  %v6137_v0 = vmul.f32 -1.442695, %v5664_v3  ;;  %v6138_v39 = vmul.f32 -1.442695, %v5665_v29  ;;  %v6139_v57 = vmul.f32 -1.442695, %v5666_v34 }
0x2c28   :  { %7562 = vtanh.f32 %v5666_v34  ;;  %v6141_v42 = vmul.f32 -1.442695, %v5668_v46  ;;  %v6140_v23 = vmul.f32 -1.442695, %v5667_v22  ;;  %v6143_v51 = vmul.f32 -1.442695, %v5670_v10 }
0x2c29   :  { %7564 = vtanh.f32 %v5668_v46  ;;  %v6142_v5 = vmul.f32 -1.442695, %v5669_v33  ;;  %v6144_v53 = vmul.f32 -1.442695, %v5671_v56 }
0x2c2a   :  { %7566 = vtanh.f32 %v5667_v22 }
0x2c2b   :  { %7568 = vtanh.f32 %v5670_v10 }
0x2c2c   :  { %7570 = vtanh.f32 %v5669_v33 }
0x2c2d   :  { %7572 = vtanh.f32 %v5671_v56 }
0x2c2e   :  { %7574 = vpow2.f32 %v6137_v0 }
0x2c2f   :  { %v7559_v7 = vpop.eup %7558  ;;  %7576 = vpow2.f32 %v6138_v39 }
0x2c30   :  { %5744 = vrot.lane.b32.xlu0 %v7559_v7, %s7650_s3  ;;  %7578 = vpow2.f32 %v6139_v57 }
0x2c31   :  { %v7561_v61 = vpop.eup %7560  ;;  %7580 = vpow2.f32 %v6141_v42 }
0x2c32   :  { %v7563_v32 = vpop.eup %7562  ;;  %7582 = vpow2.f32 %v6140_v23 }
0x2c33   :  { %5748 = vrot.lane.b32.xlu1 %v7563_v32, %s7650_s3  ;;  %v7565_v45 = vpop.eup %7564  ;;  %7584 = vpow2.f32 %v6143_v51 }
0x2c34   :  { %5746 = vrot.lane.b32.xlu0 %v7561_v61, %s7650_s3  ;;  %v7567_v41 = vpop.eup %7566 }
0x2c35   :  { %v7569_v30 = vpop.eup %7568 }
0x2c36   :  { %v7571_v14 = vpop.eup %7570 }
0x2c37   :  { %5750 = vrot.lane.b32.xlu1 %v7567_v41, %s7650_s3  ;;  %v7573_v63 = vpop.eup %7572 }
0x2c38   :  { %5752 = vrot.lane.b32.xlu0 %v7565_v45, %s7650_s3  ;;  %v7575_v54 = vpop.eup %7574 }
0x2c39   :  { %v5696_v37 = vadd.f32 1.0, %v7575_v54  ;;  %v7577_v4 = vpop.eup %7576 }
0x2c3a   :  { %v7579_v6 = vpop.eup %7578  ;;  %v5697_v1 = vadd.f32 1.0, %v7577_v4 }
0x2c3b   :  { %5754 = vrot.lane.b32.xlu1 %v7571_v14, %s7650_s3  ;;  %7586 = vrcp.f32 %v5696_v37  ;;  %v7581_v24 = vpop.eup %7580  ;;  %v5698_v26 = vadd.f32 1.0, %v7579_v6 }
0x2c3c   :  { %5756 = vrot.lane.b32.xlu0 %v7569_v30, %s7650_s3  ;;  %7588 = vpow2.f32 %v6142_v5  ;;  %v7583_v16 = vpop.eup %7582  ;;  %v5700_v36 = vadd.f32 1.0, %v7581_v24 }
0x2c3d   :  { %7590 = vpow2.f32 %v6144_v53  ;;  %v7585_v48 = vpop.eup %7584  ;;  %v5699_v62 = vadd.f32 1.0, %v7583_v16  ;;  %v5864_v16 = vld [vmem:[%s9999_s10] sm:$0xff] }
0x2c3e   :  { %7592 = vrcp.f32 %v5697_v1  ;;  %v5702_v17 = vadd.f32 1.0, %v7585_v48  ;;  %v5866_v48 = vld [vmem:[%s9999_s10 + $0x10] sm:$0xff] }
0x2c3f   :  { %5758 = vrot.lane.b32.xlu1 %v7573_v63, %s7650_s3  ;;  %7594 = vrcp.f32 %v5698_v26 }
0x2c40   :  { %7596 = vrcp.f32 %v5700_v36 }
0x2c41   :  { %7598 = vrcp.f32 %v5699_v62 }
0x2c42   :  { %7600 = vrcp.f32 %v5702_v17 }
0x2c45   :  { %v9897_v13 = vpop.eup %7586 }
0x2c46   :  { %v7589_v59 = vpop.eup %7588  ;;  %v5728_v61 = vmul.f32 %v9897_v13, %v9826_v49 }
0x2c47   :  { %v5701_v20 = vadd.f32 1.0, %v7589_v59  ;;  %v7591_v3 = vpop.eup %7590 }
0x2c48   :  { %v5703_v15 = vadd.f32 1.0, %v7591_v3  ;;  %v9901_v27 = vpop.eup %7592 }
0x2c49   :  { %7602 = vrcp.f32 %v5701_v20  ;;  %v9903_v12 = vpop.eup %7594  ;;  %v5729_v41 = vmul.f32 %v9901_v27, %v9833_v50 }
0x2c4a   :  { %7604 = vrcp.f32 %v5703_v15  ;;  %v9908_v34 = vpop.eup %7596  ;;  %v5730_v30 = vmul.f32 %v9903_v12, %v9835_v25 }
0x2c4b   :  { %v9911_v40 = vpop.eup %7598  ;;  %v5732_v57 = vmul.f32 %v9908_v34, %v9843_v11 }
0x2c4c   :  { %v9916_v2 = vpop.eup %7600  ;;  %v5731_v49 = vmul.f32 %v9911_v40, %v9846_v18 }
0x2c4d   :  { %v5734_v25 = vmul.f32 %v9916_v2, %v9854_v8 }
0x2c53   :  { %v9919_v44 = vpop.eup %7602 }
0x2c54   :  { %v9925_v33 = vpop.eup %7604  ;;  %v5733_v37 = vmul.f32 %v9919_v44, %v9856_v28 }
0x2c55   :  { %v5735_v18 = vmul.f32 %v9925_v33, %v9862_v52  ;;  %v5865_v52 = vld [vmem:[%s9999_s10 + $0x8] sm:$0xff] }
0x2c56   :  { %v6586_v36 = vpack.c.bf16 %v5865_v52, %v5864_v16 }
0x2c58   :  { %6587 = vmatpush3.bf16.msra.mxu1 %v6586_v36 }
0x2c59   :  { %6588 = vmatprep.subr.bf16.mxu1 %v10094_v43 }
0x2ca2   :  { %v5745_v55 = vpop.permute.xlu0 %5744 }
0x2ca3   :  { %v5768_v21 = vmul.f32 %v9897_v13, %v5745_v55  ;;  %v5867_v55 = vld [vmem:[%s9999_s10 + $0x18] sm:$0xff] }
0x2ca5   :  { %5784 = vrot.lane.b32.xlu0 %v5768_v21, %s7652_s6  ;;  %v5749_v60 = vpop.permute.xlu1 %5748  ;;  %v6589_v21 = vpack.c.bf16 %v5867_v55, %v5866_v48 }
0x2ca6   :  { %v5747_v38 = vpop.permute.xlu0 %5746  ;;  %v5770_v31 = vmul.f32 %v9903_v12, %v5749_v60 }
0x2ca7   :  { %v5769_v29 = vmul.f32 %v9901_v27, %v5747_v38  ;;  %6590 = vmatpush3.bf16.msra.mxu1 %v6589_v21 }
0x2ca8   :  { %5788 = vrot.lane.b32.xlu1 %v5770_v31, %s7652_s6 }
0x2ca9   :  { %5786 = vrot.lane.b32.xlu0 %v5769_v29, %s7652_s6  ;;  %v5751_v35 = vpop.permute.xlu1 %5750 }
0x2caa   :  { %v5753_v9 = vpop.permute.xlu0 %5752  ;;  %v5771_v7 = vmul.f32 %v9911_v40, %v5751_v35 }
0x2cab   :  { %v5772_v46 = vmul.f32 %v9908_v34, %v5753_v9 }
0x2cac   :  { %5790 = vrot.lane.b32.xlu1 %v5771_v7, %s7652_s6 }
0x2cad   :  { %5792 = vrot.lane.b32.xlu0 %v5772_v46, %s7652_s6  ;;  %v5755_v19 = vpop.permute.xlu1 %5754 }
0x2cae   :  { %v5757_v22 = vpop.permute.xlu0 %5756  ;;  %v5773_v58 = vmul.f32 %v9919_v44, %v5755_v19 }
0x2caf   :  { %v5774_v10 = vmul.f32 %v9916_v2, %v5757_v22 }
0x2cb0   :  { %5794 = vrot.lane.b32.xlu1 %v5773_v58, %s7652_s6 }
0x2cb1   :  { %5796 = vrot.lane.b32.xlu0 %v5774_v10, %s7652_s6  ;;  %v5759_v47 = vpop.permute.xlu1 %5758 }
0x2cb2   :  { %v5775_v56 = vmul.f32 %v9925_v33, %v5759_v47 }
0x2cb4   :  { %5798 = vrot.lane.b32.xlu1 %v5775_v56, %s7652_s6 }
0x2d17   :  { %v5785_v32 = vpop.permute.xlu0 %5784 }
0x2d18   :  { %v5808_v45 = vadd.f32 %v5785_v32, %v5728_v61 }
0x2d1a   :  { %7606 = vtanh.f32 %v5808_v45  ;;  %v5789_v63 = vpop.permute.xlu1 %5788 }
0x2d1b   :  { %v5787_v14 = vpop.permute.xlu0 %5786  ;;  %v5810_v39 = vadd.f32 %v5789_v63, %v5730_v30 }
0x2d1c   :  { %v5809_v0 = vadd.f32 %v5787_v14, %v5729_v41 }
0x2d1e   :  { %7608 = vtanh.f32 %v5809_v0  ;;  %v5791_v23 = vpop.permute.xlu1 %5790 }
0x2d1f   :  { %7610 = vtanh.f32 %v5810_v39  ;;  %v5793_v54 = vpop.permute.xlu0 %5792  ;;  %v5811_v50 = vadd.f32 %v5791_v23, %v5731_v49 }
0x2d20   :  { %v5812_v51 = vadd.f32 %v5793_v54, %v5732_v57 }
0x2d22   :  { %7612 = vtanh.f32 %v5812_v51  ;;  %v5795_v5 = vpop.permute.xlu1 %5794 }
0x2d23   :  { %7614 = vtanh.f32 %v5811_v50  ;;  %v5797_v11 = vpop.permute.xlu0 %5796  ;;  %v5813_v4 = vadd.f32 %v5795_v5, %v5733_v37 }
0x2d24   :  { %v7607_v42 = vpop.eup %7606  ;;  %v5814_v53 = vadd.f32 %v5797_v11, %v5734_v25 }
0x2d25   :  { %5832 = vrot.lane.b32.xlu0 %v7607_v42, %s7650_s3 }
0x2d26   :  { %7616 = vtanh.f32 %v5814_v53  ;;  %v5799_v1 = vpop.permute.xlu1 %5798 }
0x2d27   :  { %7618 = vtanh.f32 %v5813_v4  ;;  %v5815_v26 = vadd.f32 %v5799_v1, %v5735_v18 }
0x2d28   :  { %v7609_v6 = vpop.eup %7608 }
0x2d29   :  { %v7611_v24 = vpop.eup %7610  ;;  %5834 = vrot.lane.b32.xlu0 %v7609_v6, %s7650_s3  ;;  %7620 = vtanh.f32 %v5815_v26 }
0x2d2a   :  { %5836 = vrot.lane.b32.xlu1 %v7611_v24, %s7650_s3 }
0x2d2c   :  { %v7613_v8 = vpop.eup %7612 }
0x2d2d   :  { %v7615_v28 = vpop.eup %7614  ;;  %5840 = vrot.lane.b32.xlu0 %v7613_v8, %s7650_s3 }
0x2d2e   :  { %5838 = vrot.lane.b32.xlu1 %v7615_v28, %s7650_s3 }
0x2d30   :  { %v7617_v62 = vpop.eup %7616 }
0x2d31   :  { %v7619_v59 = vpop.eup %7618  ;;  %5844 = vrot.lane.b32.xlu0 %v7617_v62, %s7650_s3 }
0x2d32   :  { %5842 = vrot.lane.b32.xlu1 %v7619_v59, %s7650_s3 }
0x2d33   :  { %v7621_v17 = vpop.eup %7620 }
0x2d36   :  { %5846 = vrot.lane.b32.xlu1 %v7621_v17, %s7650_s3 }
0x2d97   :  { %v5833_v20 = vpop.permute.xlu0 %5832 }
0x2d98   :  { %v5856_v29 = vmul.f32 %v9897_v13, %v5833_v20 }
0x2d9b   :  { %v5835_v3 = vpop.permute.xlu0 %5834 }
0x2d9c   :  { %v5837_v15 = vpop.permute.xlu1 %5836  ;;  %v5857_v38 = vmul.f32 %v9901_v27, %v5835_v3 }
0x2d9d   :  { %v5858_v60 = vmul.f32 %v9903_v12, %v5837_v15 }
0x2d9e   :  { %v5883_v31 = vrot.slane %v5857_v38, 7 }
0x2d9f   :  { %v5841_v9 = vpop.permute.xlu0 %5840  ;;  %v5885_v35 = vrot.slane %v5858_v60, 6 }
0x2da0   :  { %v5884_v46 = vsel %vm682_vm6, %v5883_v31, %v5856_v29  ;;  %v5839_v7 = vpop.permute.xlu1 %5838  ;;  %v5860_v43 = vmul.f32 %v9908_v34, %v5841_v9 }
0x2da1   :  { %v5859_v22 = vmul.f32 %v9911_v40, %v5839_v7  ;;  %v5886_v19 = vsel %vm685_vm7, %v5885_v35, %v5884_v46 }
0x2da2   :  { %v5889_v10 = vrot.slane %v5860_v43, 4 }
0x2da3   :  { %v5887_v58 = vrot.slane %v5859_v22, 5  ;;  %v5845_v47 = vpop.permute.xlu0 %5844 }
0x2da4   :  { %v5843_v27 = vpop.permute.xlu1 %5842  ;;  %v5862_v12 = vmul.f32 %v9916_v2, %v5845_v47 }
0x2da5   :  { %v5888_v13 = vsel %vm688_vm8, %v5887_v58, %v5886_v19  ;;  %v5861_v56 = vmul.f32 %v9919_v44, %v5843_v27  ;;  %v6145_v44 = vld [vmem:[%s10000_s11] ss:$0 sm:$0xff] }
0x2da6   :  { %v5890_v61 = vsel %vm691_vm9, %v5889_v10, %v5888_v13  ;;  %v5893_v32 = vrot.slane %v5862_v12, 2 }
0x2da7   :  { %v5891_v45 = vrot.slane %v5861_v56, 3 }
0x2da8   :  { %v5847_v41 = vpop.permute.xlu1 %5846 }
0x2da9   :  { %v5892_v34 = vsel %vm694_vm10, %v5891_v45, %v5890_v61  ;;  %v5863_v40 = vmul.f32 %v9925_v33, %v5847_v41 }
0x2daa   :  { %v5894_v30 = vsel %vm697_vm11, %v5893_v32, %v5892_v34 }
0x2dab   :  { %v5895_v14 = vrot.slane %v5863_v40, 1 }
0x2dad   :  { %v5896_v63 = vsel %vm700_vm12, %v5895_v14, %v5894_v30 }
0x2dae   :  { %5897 = vrot.lane.b32.xlu0 %v5896_v63, %s7652_s6 }
0x2e20   :  { %v5898_v2 = vpop.permute.xlu0 %5897 }
0x2e21   :  { %6479 = vmatmul.mubr.msk.f32.vlgmr.msra.gmra.mrb[28].mxu1 %vm311_vm5, %v5898_v2 }
0x2ef4   :  { %v5967_v0 = vpop.f32.mrb[28].mxu1 }
0x2ef5   :  { %v5968_v39 = vadd.f32 %v6145_v44, %v5967_v0  ;;  %v6480_v57 = vpop.f32.mrb[29].mxu1 }
0x2ef7   :  { %v5971_v42 = vmax.f32 %v5968_v39, 0.0 }
0x2ef9   :  { %5973 = vst.msk [vmem:[%s10001_s12] sm:$0xff] %vm5972_vm14, %v5971_v42 }
0x2efa   :  { %5978 = vsyncpa [#allocation5], 1 }

</bundles_post_ra>
